<compile_context>
chip_gen: v5e
topology: v5e:2x2
jax: 0.10.0
libtpu: 0.0.40
codegen_flags: <defaults>
</compile_context>

<pallas_src>
import functools

import numpy as np
import jax
import jax.numpy as jnp
from jax.experimental import pallas as pl
from jax.experimental.pallas import tpu as pltpu

BN_EPS = 1e-5
TILE_BATCH = 8                      # images per grid step (per-tile constants are O(1))

# Conv tap lane offsets, tap index t = dy*3 + dx (must match mask / weight ordering).
_OFFS1 = tuple((dy - 1) * 5 + (dx - 1) for dy in range(3) for dx in range(3))  # 5x5 grid
_OFFS2 = tuple((dy - 1) * 3 + (dx - 1) for dy in range(3) for dx in range(3))  # 3x3 grid

# MaxPool2d(2, stride 2, pad 1) on the 3x3 layer2 output -> 2x2.
# Output position p (row-major) takes the max over these source pixels q (row-major 3x3).
_POOL2_PAIRS = ((0, 0), (1, 1), (1, 2), (2, 3), (2, 6), (3, 4), (3, 5), (3, 7), (3, 8))
_POOL2_GROUPS = ((0,), (1, 2), (3, 4), (5, 6, 7, 8))   # indices into _POOL2_PAIRS per p


# --------------------------------------------------------------------------- #
# Kernel
# --------------------------------------------------------------------------- #
def _shift_lanes(v, off):
    """y[:, c] = v[:, c + off], zero-filled out of range.  `off` is a static int.

    Pure data movement (slice + concat) — keeps the conv tap gathers off the MXU.
    Out-of-image / cross-image lanes are killed by the per-tap masks afterwards.
    """
    if off == 0:
        return v
    ch = v.shape[0]
    pad = jnp.zeros((ch, abs(off)), dtype=v.dtype)
    if off > 0:
        return jnp.concatenate([v[:, off:], pad], axis=1)
    return jnp.concatenate([pad, v[:, :off]], axis=1)


def _relation_kernel(x_ref, w1_ref, b1_ref, m1_ref, p1_ref, w2_ref, b2_ref,
                     m2_ref, sel_ref, w3_ref, b3_ref, w4_ref, b4_ref, o_ref):
    f32 = jnp.float32
    x = x_ref[...]                                            # (64, TB*25) bf16

    # ---- layer1: 3x3 conv (BN folded) as ONE K=576 matmul + ReLU ----------- #
    cols = [_shift_lanes(x, _OFFS1[t]) * m1_ref[t] for t in range(9)]
    im2col1 = jnp.concatenate(cols, axis=0)                   # (576, TB*25) bf16
    a1 = jnp.dot(w1_ref[...], im2col1, preferred_element_type=f32)   # (64, TB*25)
    a1 = jnp.maximum(a1 + b1_ref[...], 0.0)

    # ---- maxpool 2x2 / stride 2 / pad 1   (5x5 -> 3x3) --------------------- #
    # 4 small per-tile 0/1 gather matmuls + elementwise max (exact: a1 >= 0).
    pool1 = jnp.dot(a1, p1_ref[0], preferred_element_type=f32)
    for t in range(1, 4):
        pool1 = jnp.maximum(pool1,
                            jnp.dot(a1, p1_ref[t], preferred_element_type=f32))
    # pool1: (64, TB*9) f32

    # ---- layer2: 3x3 conv (64 -> 1 channel, BN folded) + ReLU -------------- #
    cols2 = [_shift_lanes(pool1, _OFFS2[t]) * m2_ref[t] for t in range(9)]
    im2col2 = jnp.concatenate(cols2, axis=0)                  # (576, TB*9) f32
    a2 = jnp.dot(w2_ref[...], im2col2, preferred_element_type=f32)   # (1, TB*9)
    a2 = jnp.maximum(a2 + b2_ref[...], 0.0)

    # ---- maxpool 2x2 / stride 2 / pad 1   (3x3 -> 2x2) + rearrange --------- #
    # Tiny per-tile selection matmuls pull pooled position p of every image onto
    # lanes, giving a (4, TB) block so the FC tail can use the raw dense weights.
    r = [jnp.dot(a2, sel_ref[k], preferred_element_type=f32) for k in range(9)]
    rows = []
    for grp in _POOL2_GROUPS:
        v = r[grp[0]]
        for k in grp[1:]:
            v = jnp.maximum(v, r[k])
        rows.append(v)
    pooled = jnp.concatenate(rows, axis=0)                    # (4, TB)

    # ---- fc3 -> ReLU -> fc4 (dense raw weights, lane-dense output) --------- #
    h3 = jnp.maximum(jnp.dot(w3_ref[...], pooled, preferred_element_type=f32)
                     + b3_ref[...], 0.0)                      # (8, TB)
    out = jnp.dot(w4_ref[...], h3, preferred_element_type=f32) + b4_ref[...]
    o_ref[...] = out.astype(o_ref.dtype)                      # (1, TB)


# --------------------------------------------------------------------------- #
# Per-TILE structure constants (depend only on the tile size, built once).
# --------------------------------------------------------------------------- #
@functools.lru_cache(maxsize=None)
def _tile_constants(tb):
    def conv_masks(h, w):
        """0/1 lane mask per conv tap: 1 where the tap source pixel is inside the image."""
        m = np.zeros((9, 1, tb * h * w), np.float32)
        for dy in range(3):
            for dx in range(3):
                t = dy * 3 + dx
                for b in range(tb):
                    for i in range(h):
                        for j in range(w):
                            si, sj = i + dy - 1, j + dx - 1
                            if 0 <= si < h and 0 <= sj < w:
                                m[t, 0, b * h * w + i * w + j] = 1.0
        return m

    masks1 = conv_masks(5, 5)                                 # (9, 1, tb*25)
    masks2 = conv_masks(3, 3)                                 # (9, 1, tb*9)

    # MaxPool(2, stride 2, pad 1) on 5x5 -> 3x3 as 4 per-tap 0/1 gather matrices.
    p1 = np.zeros((4, tb * 25, tb * 9), np.float32)
    for ti in range(2):
        for tj in range(2):
            t = ti * 2 + tj
            for b in range(tb):
                for oi in range(3):
                    for oj in range(3):
                        si, sj = 2 * oi - 1 + ti, 2 * oj - 1 + tj
                        if 0 <= si < 5 and 0 <= sj < 5:
                            p1[t, b * 25 + si * 5 + sj, b * 9 + oi * 3 + oj] = 1.0

    # MaxPool(2, stride 2, pad 1) on 3x3 -> 2x2: selection matrices that pull source
    # pixel q of every image onto lanes (one matrix per (p, q) pair in _POOL2_PAIRS).
    sel = np.zeros((9, tb * 9, tb), np.float32)
    for k, (_p, q) in enumerate(_POOL2_PAIRS):
        for b in range(tb):
            sel[k, b * 9 + q, b] = 1.0

    return masks1, masks2, p1, sel


def _fold_bn(w, b, gamma, beta, mean, var):
    """Fold eval-mode BatchNorm2d into the preceding conv's weight/bias."""
    scale = gamma / jnp.sqrt(var + BN_EPS)                    # (Cout,)
    return w * scale[:, None, None, None], (b - mean) * scale + beta


# --------------------------------------------------------------------------- #
# Wrapper
# --------------------------------------------------------------------------- #
def relation_network_forward(x, params, tile_batch=TILE_BATCH):
    x = x.reshape(-1, 64, 5, 5)
    batch = x.shape[0]
    num_tiles = -(-batch // tile_batch)                       # cdiv
    batch_pad = num_tiles * tile_batch
    if batch_pad != batch:                                    # pad to a whole tile
        x = jnp.concatenate(
            [x, jnp.zeros((batch_pad - batch, 64, 5, 5), x.dtype)], axis=0)

    # BN folding (trace time) — BN params never enter the kernel.
    w1f, b1f = _fold_bn(params["conv1_w"], params["conv1_b"],
                        params["bn1_gamma"], params["bn1_beta"],
                        params["bn1_mean"], params["bn1_var"])
    w2f, b2f = _fold_bn(params["conv2_w"], params["conv2_b"],
                        params["bn2_gamma"], params["bn2_beta"],
                        params["bn2_mean"], params["bn2_var"])

    # Conv weights as im2col matrices, row order (dy*3+dx)*64 + cin.
    w1mat = jnp.transpose(w1f, (0, 2, 3, 1)).reshape(64, 576).astype(jnp.bfloat16)
    w2row = jnp.transpose(w2f, (0, 2, 3, 1)).reshape(1, 576).astype(jnp.float32)
    b1col = b1f.reshape(64, 1).astype(jnp.float32)
    b2c = b2f.reshape(1, 1).astype(jnp.float32)
    fc3w = params["fc3_w"].astype(jnp.float32)                # (8, 4)
    b3col = params["fc3_b"].reshape(8, 1).astype(jnp.float32)
    fc4w = params["fc4_w"].astype(jnp.float32)                # (1, 8)
    b4c = params["fc4_b"].reshape(1, 1).astype(jnp.float32)

    # Per-tile structure constants (O(1) in batch size, cached).
    masks1_np, masks2_np, p1_np, sel_np = _tile_constants(tile_batch)
    masks1 = jnp.asarray(masks1_np, jnp.bfloat16)             # (9, 1, TB*25)
    masks2 = jnp.asarray(masks2_np, jnp.float32)              # (9, 1, TB*9)
    p1 = jnp.asarray(p1_np, jnp.float32)                      # (4, TB*25, TB*9)
    sel = jnp.asarray(sel_np, jnp.float32)                    # (9, TB*9, TB)

    # Input layout: channels on sublanes, (image, pixel) on lanes, one tile per row.
    lanes1 = tile_batch * 25
    x_tiles = (x.reshape(num_tiles, tile_batch, 64, 25)
                .transpose(0, 2, 1, 3)
                .reshape(num_tiles, 64, lanes1)
                .astype(jnp.bfloat16))                        # (T, 64, TB*25)

    operands = (x_tiles, w1mat, b1col, masks1, p1, w2row, b2c, masks2, sel,
                fc3w, b3col, fc4w, b4c)

    def const_spec(a):
        nd = a.ndim
        return pl.BlockSpec(a.shape, lambda i, _n=nd: (0,) * _n)   # VMEM-resident

    in_specs = [pl.BlockSpec((None, 64, lanes1), lambda i: (i, 0, 0))]
    in_specs += [const_spec(a) for a in operands[1:]]

    out = pl.pallas_call(
        _relation_kernel,
        out_shape=jax.ShapeDtypeStruct((num_tiles, 1, tile_batch), jnp.float32),
        grid=(num_tiles,),
        in_specs=in_specs,
        out_specs=pl.BlockSpec((None, 1, tile_batch), lambda i: (i, 0, 0)),
        compiler_params=pltpu.CompilerParams(
            dimension_semantics=("parallel",)),               # megacore on v7x
    )(*operands)

    # (T, 1, TB) lane-dense kernel output -> PyTorch's (B, 1).
    return out.reshape(batch_pad, 1)[:batch]


# --------------------------------------------------------------------------- #
# Parameter init + pure-JAX reference (for validation)
# --------------------------------------------------------------------------- #
def init_params(key):
    ks = jax.random.split(key, 16)
    n = lambda k, shape, s: s * jax.random.normal(k, shape, jnp.float32)
    u = lambda k, shape, lo, hi: jax.random.uniform(k, shape, jnp.float32, lo, hi)
    return {
        "conv1_w": n(ks[0], (64, 64, 3, 3), 0.05),
        "conv1_b": n(ks[1], (64,), 0.05),
        "bn1_gamma": u(ks[2], (64,), 0.8, 1.2),
        "bn1_beta": n(ks[3], (64,), 0.05),
        "bn1_mean": n(ks[4], (64,), 0.05),
        "bn1_var": u(ks[5], (64,), 0.5, 1.5),
        "conv2_w": n(ks[6], (1, 64, 3, 3), 0.05),
        "conv2_b": n(ks[7], (1,), 0.05),
        "bn2_gamma": u(ks[8], (1,), 0.8, 1.2),
        "bn2_beta": n(ks[9], (1,), 0.05),
        "bn2_mean": n(ks[10], (1,), 0.05),
        "bn2_var": u(ks[11], (1,), 0.5, 1.5),
        "fc3_w": n(ks[12], (8, 4), 0.3),
        "fc3_b": n(ks[13], (8,), 0.1),
        "fc4_w": n(ks[14], (1, 8), 0.3),
        "fc4_b": n(ks[15], (1,), 0.1),
    }


def reference_forward(x, params):
    x = x.reshape(-1, 64, 5, 5)

    def block(h, w, b, gamma, beta, mean, var):
        y = jax.lax.conv_general_dilated(
            h, w, window_strides=(1, 1), padding=((1, 1), (1, 1)),
            dimension_numbers=("NCHW", "OIHW", "NCHW"))
        y = y + b[None, :, None, None]
        y = (y - mean[None, :, None, None]) * jax.lax.rsqrt(
            var[None, :, None, None] + BN_EPS)
        y = y * gamma[None, :, None, None] + beta[None, :, None, None]
        y = jnp.maximum(y, 0.0)
        return jax.lax.reduce_window(
            y, -jnp.inf, jax.lax.max, (1, 1, 2, 2), (1, 1, 2, 2),
            [(0, 0), (0, 0), (1, 1), (1, 1)])

    h = block(x, params["conv1_w"], params["conv1_b"], params["bn1_gamma"],
              params["bn1_beta"], params["bn1_mean"], params["bn1_var"])
    h = block(h, params["conv2_w"], params["conv2_b"], params["bn2_gamma"],
              params["bn2_beta"], params["bn2_mean"], params["bn2_var"])
    h = h.reshape(h.shape[0], -1)                                  # (B, 4)
    h = jnp.maximum(h @ params["fc3_w"].T + params["fc3_b"], 0.0)  # (B, 8)
    h = h @ params["fc4_w"].T + params["fc4_b"]                    # (B, 1)
    return h.reshape(h.shape[0], -1)


if __name__ == "__main__":
    key = jax.random.PRNGKey(0)
    kx, kp = jax.random.split(key)
    batch = 2
    x = jax.random.normal(kx, (batch, 64, 5, 5), dtype=jnp.float32)
    params = init_params(kp)

    out = relation_network_forward(x, params)
    out = jax.block_until_ready(out)
    assert out.shape == (batch, 1)

    ref = reference_forward(x, params)
    err = float(jnp.max(jnp.abs(out - ref)))
    # Tolerance reflects the review-requested bf16 cast of the conv1 operands
    # (f32 MXU accumulation); observed deviations are ~1e-2 or below.
    assert jnp.allclose(out, ref, atol=2e-2, rtol=2e-2), "max abs err %g" % err

    print("KERNEL_OK")
</pallas_src>

<mosaic_0001>
module attributes {stable_mosaic.version = 11 : i64} {
  func.func @_relation_kernel(%arg0: i32, %arg1: memref<1x64x200xbf16, #tpu.memory_space<vmem>>, %arg2: memref<64x576xbf16, #tpu.memory_space<vmem>>, %arg3: memref<64x1xf32, #tpu.memory_space<vmem>>, %arg4: memref<9x1x200xbf16, #tpu.memory_space<vmem>>, %arg5: memref<4x200x72xf32, #tpu.memory_space<vmem>>, %arg6: memref<1x576xf32, #tpu.memory_space<vmem>>, %arg7: memref<1x1xf32, #tpu.memory_space<vmem>>, %arg8: memref<9x1x72xf32, #tpu.memory_space<vmem>>, %arg9: memref<9x72x8xf32, #tpu.memory_space<vmem>>, %arg10: memref<8x4xf32, #tpu.memory_space<vmem>>, %arg11: memref<8x1xf32, #tpu.memory_space<vmem>>, %arg12: memref<1x8xf32, #tpu.memory_space<vmem>>, %arg13: memref<1x1xf32, #tpu.memory_space<vmem>>, %arg14: memref<1x1x8xf32, #tpu.memory_space<vmem>>) attributes {dimension_semantics = [#tpu.dimension_semantics<parallel>], iteration_bounds = array<i64: 1>, scalar_prefetch = 0 : i64, scratch_operands = 0 : i64, tpu.core_type = #tpu.core_type<tc>, window_params = [{transform_indices = @transform_0, window_bounds = array<i64: 1, 64, 200>}, {pipeline_mode = #tpu.pipeline_mode<synchronous>, transform_indices = @transform_1, window_bounds = array<i64: 64, 576>}, {pipeline_mode = #tpu.pipeline_mode<synchronous>, transform_indices = @transform_2, window_bounds = array<i64: 64, 1>}, {pipeline_mode = #tpu.pipeline_mode<synchronous>, transform_indices = @transform_3, window_bounds = array<i64: 9, 1, 200>}, {pipeline_mode = #tpu.pipeline_mode<synchronous>, transform_indices = @transform_4, window_bounds = array<i64: 4, 200, 72>}, {pipeline_mode = #tpu.pipeline_mode<synchronous>, transform_indices = @transform_5, window_bounds = array<i64: 1, 576>}, {pipeline_mode = #tpu.pipeline_mode<synchronous>, transform_indices = @transform_6, window_bounds = array<i64: 1, 1>}, {pipeline_mode = #tpu.pipeline_mode<synchronous>, transform_indices = @transform_7, window_bounds = array<i64: 9, 1, 72>}, {pipeline_mode = #tpu.pipeline_mode<synchronous>, transform_indices = @transform_8, window_bounds = array<i64: 9, 72, 8>}, {pipeline_mode = #tpu.pipeline_mode<synchronous>, transform_indices = @transform_9, window_bounds = array<i64: 8, 4>}, {pipeline_mode = #tpu.pipeline_mode<synchronous>, transform_indices = @transform_10, window_bounds = array<i64: 8, 1>}, {pipeline_mode = #tpu.pipeline_mode<synchronous>, transform_indices = @transform_11, window_bounds = array<i64: 1, 8>}, {pipeline_mode = #tpu.pipeline_mode<synchronous>, transform_indices = @transform_12, window_bounds = array<i64: 1, 1>}, {transform_indices = @transform_13, window_bounds = array<i64: 1, 1, 8>}]} {
    %c0 = arith.constant 0 : index
    %c0_0 = arith.constant 0 : index
    %c0_1 = arith.constant 0 : index
    %0 = vector.load %arg1[%c0, %c0_0, %c0_1] : memref<1x64x200xbf16, #tpu.memory_space<vmem>>, vector<1x64x200xbf16>
    %1 = vector.shape_cast %0 : vector<1x64x200xbf16> to vector<64x200xbf16>
    %cst = arith.constant 0.000000e+00 : bf16
    %2 = vector.broadcast %cst : bf16 to vector<64x6xbf16>
    %3 = vector.extract_strided_slice %1 {offsets = [0, 0], sizes = [64, 194], strides = [1, 1]} : vector<64x200xbf16> to vector<64x194xbf16>
    %4 = tpu.concatenate %2, %3 in 1 : vector<64x6xbf16>, vector<64x194xbf16> -> vector<64x200xbf16>
    %c0_2 = arith.constant 0 : index
    %c0_3 = arith.constant 0 : index
    %c0_4 = arith.constant 0 : index
    %5 = vector.load %arg4[%c0_2, %c0_3, %c0_4] : memref<9x1x200xbf16, #tpu.memory_space<vmem>>, vector<1x1x200xbf16>
    %6 = vector.shape_cast %5 : vector<1x1x200xbf16> to vector<1x200xbf16>
    %7 = vector.broadcast %6 : vector<1x200xbf16> to vector<64x200xbf16>
    %8 = arith.mulf %4, %7 : vector<64x200xbf16>
    %cst_5 = arith.constant 0.000000e+00 : bf16
    %9 = vector.broadcast %cst_5 : bf16 to vector<64x5xbf16>
    %10 = vector.extract_strided_slice %1 {offsets = [0, 0], sizes = [64, 195], strides = [1, 1]} : vector<64x200xbf16> to vector<64x195xbf16>
    %11 = tpu.concatenate %9, %10 in 1 : vector<64x5xbf16>, vector<64x195xbf16> -> vector<64x200xbf16>
    %c1 = arith.constant 1 : index
    %c0_6 = arith.constant 0 : index
    %c0_7 = arith.constant 0 : index
    %12 = vector.load %arg4[%c1, %c0_6, %c0_7] : memref<9x1x200xbf16, #tpu.memory_space<vmem>>, vector<1x1x200xbf16>
    %13 = vector.shape_cast %12 : vector<1x1x200xbf16> to vector<1x200xbf16>
    %14 = vector.broadcast %13 : vector<1x200xbf16> to vector<64x200xbf16>
    %15 = arith.mulf %11, %14 : vector<64x200xbf16>
    %cst_8 = arith.constant 0.000000e+00 : bf16
    %16 = vector.broadcast %cst_8 : bf16 to vector<64x4xbf16>
    %17 = vector.extract_strided_slice %1 {offsets = [0, 0], sizes = [64, 196], strides = [1, 1]} : vector<64x200xbf16> to vector<64x196xbf16>
    %18 = tpu.concatenate %16, %17 in 1 : vector<64x4xbf16>, vector<64x196xbf16> -> vector<64x200xbf16>
    %c2 = arith.constant 2 : index
    %c0_9 = arith.constant 0 : index
    %c0_10 = arith.constant 0 : index
    %19 = vector.load %arg4[%c2, %c0_9, %c0_10] : memref<9x1x200xbf16, #tpu.memory_space<vmem>>, vector<1x1x200xbf16>
    %20 = vector.shape_cast %19 : vector<1x1x200xbf16> to vector<1x200xbf16>
    %21 = vector.broadcast %20 : vector<1x200xbf16> to vector<64x200xbf16>
    %22 = arith.mulf %18, %21 : vector<64x200xbf16>
    %cst_11 = arith.constant 0.000000e+00 : bf16
    %23 = vector.broadcast %cst_11 : bf16 to vector<64x1xbf16>
    %24 = vector.extract_strided_slice %1 {offsets = [0, 0], sizes = [64, 199], strides = [1, 1]} : vector<64x200xbf16> to vector<64x199xbf16>
    %25 = tpu.concatenate %23, %24 in 1 : vector<64x1xbf16>, vector<64x199xbf16> -> vector<64x200xbf16>
    %c3 = arith.constant 3 : index
    %c0_12 = arith.constant 0 : index
    %c0_13 = arith.constant 0 : index
    %26 = vector.load %arg4[%c3, %c0_12, %c0_13] : memref<9x1x200xbf16, #tpu.memory_space<vmem>>, vector<1x1x200xbf16>
    %27 = vector.shape_cast %26 : vector<1x1x200xbf16> to vector<1x200xbf16>
    %28 = vector.broadcast %27 : vector<1x200xbf16> to vector<64x200xbf16>
    %29 = arith.mulf %25, %28 : vector<64x200xbf16>
    %c4 = arith.constant 4 : index
    %c0_14 = arith.constant 0 : index
    %c0_15 = arith.constant 0 : index
    %30 = vector.load %arg4[%c4, %c0_14, %c0_15] : memref<9x1x200xbf16, #tpu.memory_space<vmem>>, vector<1x1x200xbf16>
    %31 = vector.shape_cast %30 : vector<1x1x200xbf16> to vector<1x200xbf16>
    %32 = vector.broadcast %31 : vector<1x200xbf16> to vector<64x200xbf16>
    %33 = arith.mulf %1, %32 : vector<64x200xbf16>
    %cst_16 = arith.constant 0.000000e+00 : bf16
    %34 = vector.broadcast %cst_16 : bf16 to vector<64x1xbf16>
    %35 = vector.extract_strided_slice %1 {offsets = [0, 1], sizes = [64, 199], strides = [1, 1]} : vector<64x200xbf16> to vector<64x199xbf16>
    %36 = tpu.concatenate %35, %34 in 1 : vector<64x199xbf16>, vector<64x1xbf16> -> vector<64x200xbf16>
    %c5 = arith.constant 5 : index
    %c0_17 = arith.constant 0 : index
    %c0_18 = arith.constant 0 : index
    %37 = vector.load %arg4[%c5, %c0_17, %c0_18] : memref<9x1x200xbf16, #tpu.memory_space<vmem>>, vector<1x1x200xbf16>
    %38 = vector.shape_cast %37 : vector<1x1x200xbf16> to vector<1x200xbf16>
    %39 = vector.broadcast %38 : vector<1x200xbf16> to vector<64x200xbf16>
    %40 = arith.mulf %36, %39 : vector<64x200xbf16>
    %cst_19 = arith.constant 0.000000e+00 : bf16
    %41 = vector.broadcast %cst_19 : bf16 to vector<64x4xbf16>
    %42 = vector.extract_strided_slice %1 {offsets = [0, 4], sizes = [64, 196], strides = [1, 1]} : vector<64x200xbf16> to vector<64x196xbf16>
    %43 = tpu.concatenate %42, %41 in 1 : vector<64x196xbf16>, vector<64x4xbf16> -> vector<64x200xbf16>
    %c6 = arith.constant 6 : index
    %c0_20 = arith.constant 0 : index
    %c0_21 = arith.constant 0 : index
    %44 = vector.load %arg4[%c6, %c0_20, %c0_21] : memref<9x1x200xbf16, #tpu.memory_space<vmem>>, vector<1x1x200xbf16>
    %45 = vector.shape_cast %44 : vector<1x1x200xbf16> to vector<1x200xbf16>
    %46 = vector.broadcast %45 : vector<1x200xbf16> to vector<64x200xbf16>
    %47 = arith.mulf %43, %46 : vector<64x200xbf16>
    %cst_22 = arith.constant 0.000000e+00 : bf16
    %48 = vector.broadcast %cst_22 : bf16 to vector<64x5xbf16>
    %49 = vector.extract_strided_slice %1 {offsets = [0, 5], sizes = [64, 195], strides = [1, 1]} : vector<64x200xbf16> to vector<64x195xbf16>
    %50 = tpu.concatenate %49, %48 in 1 : vector<64x195xbf16>, vector<64x5xbf16> -> vector<64x200xbf16>
    %c7 = arith.constant 7 : index
    %c0_23 = arith.constant 0 : index
    %c0_24 = arith.constant 0 : index
    %51 = vector.load %arg4[%c7, %c0_23, %c0_24] : memref<9x1x200xbf16, #tpu.memory_space<vmem>>, vector<1x1x200xbf16>
    %52 = vector.shape_cast %51 : vector<1x1x200xbf16> to vector<1x200xbf16>
    %53 = vector.broadcast %52 : vector<1x200xbf16> to vector<64x200xbf16>
    %54 = arith.mulf %50, %53 : vector<64x200xbf16>
    %cst_25 = arith.constant 0.000000e+00 : bf16
    %55 = vector.broadcast %cst_25 : bf16 to vector<64x6xbf16>
    %56 = vector.extract_strided_slice %1 {offsets = [0, 6], sizes = [64, 194], strides = [1, 1]} : vector<64x200xbf16> to vector<64x194xbf16>
    %57 = tpu.concatenate %56, %55 in 1 : vector<64x194xbf16>, vector<64x6xbf16> -> vector<64x200xbf16>
    %c8 = arith.constant 8 : index
    %c0_26 = arith.constant 0 : index
    %c0_27 = arith.constant 0 : index
    %58 = vector.load %arg4[%c8, %c0_26, %c0_27] : memref<9x1x200xbf16, #tpu.memory_space<vmem>>, vector<1x1x200xbf16>
    %59 = vector.shape_cast %58 : vector<1x1x200xbf16> to vector<1x200xbf16>
    %60 = vector.broadcast %59 : vector<1x200xbf16> to vector<64x200xbf16>
    %61 = arith.mulf %57, %60 : vector<64x200xbf16>
    %62 = tpu.concatenate %8, %15, %22, %29, %33, %40, %47, %54, %61 in 0 : vector<64x200xbf16>, vector<64x200xbf16>, vector<64x200xbf16>, vector<64x200xbf16>, vector<64x200xbf16>, vector<64x200xbf16>, vector<64x200xbf16>, vector<64x200xbf16>, vector<64x200xbf16> -> vector<576x200xbf16>
    %c0_28 = arith.constant 0 : index
    %c0_29 = arith.constant 0 : index
    %63 = vector.load %arg2[%c0_28, %c0_29] : memref<64x576xbf16, #tpu.memory_space<vmem>>, vector<64x576xbf16>
    %cst_30 = arith.constant dense<0.000000e+00> : vector<64x200xf32>
    %64 = tpu.matmul %63, %62, %cst_30 {dimension_numbers = #tpu.dot_dimension_numbers<[1], [0], [0], [1], [0, 0, 1, 1], [], []>} : vector<64x576xbf16>, vector<576x200xbf16>, vector<64x200xf32> -> vector<64x200xf32>
    %c0_31 = arith.constant 0 : index
    %c0_32 = arith.constant 0 : index
    %65 = vector.load %arg3[%c0_31, %c0_32] : memref<64x1xf32, #tpu.memory_space<vmem>>, vector<64x1xf32>
    %66 = vector.broadcast %65 : vector<64x1xf32> to vector<64x200xf32>
    %67 = arith.addf %64, %66 : vector<64x200xf32>
    %cst_33 = arith.constant 0.000000e+00 : f32
    %68 = vector.broadcast %cst_33 : f32 to vector<64x200xf32>
    %69 = arith.maximumf %67, %68 : vector<64x200xf32>
    %c0_34 = arith.constant 0 : index
    %c0_35 = arith.constant 0 : index
    %c0_36 = arith.constant 0 : index
    %70 = vector.load %arg5[%c0_34, %c0_35, %c0_36] : memref<4x200x72xf32, #tpu.memory_space<vmem>>, vector<1x200x72xf32>
    %71 = vector.shape_cast %70 : vector<1x200x72xf32> to vector<200x72xf32>
    %cst_37 = arith.constant dense<0.000000e+00> : vector<64x72xf32>
    %72 = tpu.matmul %69, %71, %cst_37 {dimension_numbers = #tpu.dot_dimension_numbers<[1], [0], [0], [1], [0, 0, 1, 1], [], []>} : vector<64x200xf32>, vector<200x72xf32>, vector<64x72xf32> -> vector<64x72xf32>
    %c1_38 = arith.constant 1 : index
    %c0_39 = arith.constant 0 : index
    %c0_40 = arith.constant 0 : index
    %73 = vector.load %arg5[%c1_38, %c0_39, %c0_40] : memref<4x200x72xf32, #tpu.memory_space<vmem>>, vector<1x200x72xf32>
    %74 = vector.shape_cast %73 : vector<1x200x72xf32> to vector<200x72xf32>
    %cst_41 = arith.constant dense<0.000000e+00> : vector<64x72xf32>
    %75 = tpu.matmul %69, %74, %cst_41 {dimension_numbers = #tpu.dot_dimension_numbers<[1], [0], [0], [1], [0, 0, 1, 1], [], []>} : vector<64x200xf32>, vector<200x72xf32>, vector<64x72xf32> -> vector<64x72xf32>
    %76 = arith.maximumf %72, %75 : vector<64x72xf32>
    %c2_42 = arith.constant 2 : index
    %c0_43 = arith.constant 0 : index
    %c0_44 = arith.constant 0 : index
    %77 = vector.load %arg5[%c2_42, %c0_43, %c0_44] : memref<4x200x72xf32, #tpu.memory_space<vmem>>, vector<1x200x72xf32>
    %78 = vector.shape_cast %77 : vector<1x200x72xf32> to vector<200x72xf32>
    %cst_45 = arith.constant dense<0.000000e+00> : vector<64x72xf32>
    %79 = tpu.matmul %69, %78, %cst_45 {dimension_numbers = #tpu.dot_dimension_numbers<[1], [0], [0], [1], [0, 0, 1, 1], [], []>} : vector<64x200xf32>, vector<200x72xf32>, vector<64x72xf32> -> vector<64x72xf32>
    %80 = arith.maximumf %76, %79 : vector<64x72xf32>
    %c3_46 = arith.constant 3 : index
    %c0_47 = arith.constant 0 : index
    %c0_48 = arith.constant 0 : index
    %81 = vector.load %arg5[%c3_46, %c0_47, %c0_48] : memref<4x200x72xf32, #tpu.memory_space<vmem>>, vector<1x200x72xf32>
    %82 = vector.shape_cast %81 : vector<1x200x72xf32> to vector<200x72xf32>
    %cst_49 = arith.constant dense<0.000000e+00> : vector<64x72xf32>
    %83 = tpu.matmul %69, %82, %cst_49 {dimension_numbers = #tpu.dot_dimension_numbers<[1], [0], [0], [1], [0, 0, 1, 1], [], []>} : vector<64x200xf32>, vector<200x72xf32>, vector<64x72xf32> -> vector<64x72xf32>
    %84 = arith.maximumf %80, %83 : vector<64x72xf32>
    %cst_50 = arith.constant 0.000000e+00 : f32
    %85 = vector.broadcast %cst_50 : f32 to vector<64x4xf32>
    %86 = vector.extract_strided_slice %84 {offsets = [0, 0], sizes = [64, 68], strides = [1, 1]} : vector<64x72xf32> to vector<64x68xf32>
    %87 = tpu.concatenate %85, %86 in 1 : vector<64x4xf32>, vector<64x68xf32> -> vector<64x72xf32>
    %c0_51 = arith.constant 0 : index
    %c0_52 = arith.constant 0 : index
    %c0_53 = arith.constant 0 : index
    %88 = vector.load %arg8[%c0_51, %c0_52, %c0_53] : memref<9x1x72xf32, #tpu.memory_space<vmem>>, vector<1x1x72xf32>
    %89 = vector.shape_cast %88 : vector<1x1x72xf32> to vector<1x72xf32>
    %90 = vector.broadcast %89 : vector<1x72xf32> to vector<64x72xf32>
    %91 = arith.mulf %87, %90 : vector<64x72xf32>
    %cst_54 = arith.constant 0.000000e+00 : f32
    %92 = vector.broadcast %cst_54 : f32 to vector<64x3xf32>
    %93 = vector.extract_strided_slice %84 {offsets = [0, 0], sizes = [64, 69], strides = [1, 1]} : vector<64x72xf32> to vector<64x69xf32>
    %94 = tpu.concatenate %92, %93 in 1 : vector<64x3xf32>, vector<64x69xf32> -> vector<64x72xf32>
    %c1_55 = arith.constant 1 : index
    %c0_56 = arith.constant 0 : index
    %c0_57 = arith.constant 0 : index
    %95 = vector.load %arg8[%c1_55, %c0_56, %c0_57] : memref<9x1x72xf32, #tpu.memory_space<vmem>>, vector<1x1x72xf32>
    %96 = vector.shape_cast %95 : vector<1x1x72xf32> to vector<1x72xf32>
    %97 = vector.broadcast %96 : vector<1x72xf32> to vector<64x72xf32>
    %98 = arith.mulf %94, %97 : vector<64x72xf32>
    %cst_58 = arith.constant 0.000000e+00 : f32
    %99 = vector.broadcast %cst_58 : f32 to vector<64x2xf32>
    %100 = vector.extract_strided_slice %84 {offsets = [0, 0], sizes = [64, 70], strides = [1, 1]} : vector<64x72xf32> to vector<64x70xf32>
    %101 = tpu.concatenate %99, %100 in 1 : vector<64x2xf32>, vector<64x70xf32> -> vector<64x72xf32>
    %c2_59 = arith.constant 2 : index
    %c0_60 = arith.constant 0 : index
    %c0_61 = arith.constant 0 : index
    %102 = vector.load %arg8[%c2_59, %c0_60, %c0_61] : memref<9x1x72xf32, #tpu.memory_space<vmem>>, vector<1x1x72xf32>
    %103 = vector.shape_cast %102 : vector<1x1x72xf32> to vector<1x72xf32>
    %104 = vector.broadcast %103 : vector<1x72xf32> to vector<64x72xf32>
    %105 = arith.mulf %101, %104 : vector<64x72xf32>
    %cst_62 = arith.constant 0.000000e+00 : f32
    %106 = vector.broadcast %cst_62 : f32 to vector<64x1xf32>
    %107 = vector.extract_strided_slice %84 {offsets = [0, 0], sizes = [64, 71], strides = [1, 1]} : vector<64x72xf32> to vector<64x71xf32>
    %108 = tpu.concatenate %106, %107 in 1 : vector<64x1xf32>, vector<64x71xf32> -> vector<64x72xf32>
    %c3_63 = arith.constant 3 : index
    %c0_64 = arith.constant 0 : index
    %c0_65 = arith.constant 0 : index
    %109 = vector.load %arg8[%c3_63, %c0_64, %c0_65] : memref<9x1x72xf32, #tpu.memory_space<vmem>>, vector<1x1x72xf32>
    %110 = vector.shape_cast %109 : vector<1x1x72xf32> to vector<1x72xf32>
    %111 = vector.broadcast %110 : vector<1x72xf32> to vector<64x72xf32>
    %112 = arith.mulf %108, %111 : vector<64x72xf32>
    %c4_66 = arith.constant 4 : index
    %c0_67 = arith.constant 0 : index
    %c0_68 = arith.constant 0 : index
    %113 = vector.load %arg8[%c4_66, %c0_67, %c0_68] : memref<9x1x72xf32, #tpu.memory_space<vmem>>, vector<1x1x72xf32>
    %114 = vector.shape_cast %113 : vector<1x1x72xf32> to vector<1x72xf32>
    %115 = vector.broadcast %114 : vector<1x72xf32> to vector<64x72xf32>
    %116 = arith.mulf %84, %115 : vector<64x72xf32>
    %cst_69 = arith.constant 0.000000e+00 : f32
    %117 = vector.broadcast %cst_69 : f32 to vector<64x1xf32>
    %118 = vector.extract_strided_slice %84 {offsets = [0, 1], sizes = [64, 71], strides = [1, 1]} : vector<64x72xf32> to vector<64x71xf32>
    %119 = tpu.concatenate %118, %117 in 1 : vector<64x71xf32>, vector<64x1xf32> -> vector<64x72xf32>
    %c5_70 = arith.constant 5 : index
    %c0_71 = arith.constant 0 : index
    %c0_72 = arith.constant 0 : index
    %120 = vector.load %arg8[%c5_70, %c0_71, %c0_72] : memref<9x1x72xf32, #tpu.memory_space<vmem>>, vector<1x1x72xf32>
    %121 = vector.shape_cast %120 : vector<1x1x72xf32> to vector<1x72xf32>
    %122 = vector.broadcast %121 : vector<1x72xf32> to vector<64x72xf32>
    %123 = arith.mulf %119, %122 : vector<64x72xf32>
    %cst_73 = arith.constant 0.000000e+00 : f32
    %124 = vector.broadcast %cst_73 : f32 to vector<64x2xf32>
    %125 = vector.extract_strided_slice %84 {offsets = [0, 2], sizes = [64, 70], strides = [1, 1]} : vector<64x72xf32> to vector<64x70xf32>
    %126 = tpu.concatenate %125, %124 in 1 : vector<64x70xf32>, vector<64x2xf32> -> vector<64x72xf32>
    %c6_74 = arith.constant 6 : index
    %c0_75 = arith.constant 0 : index
    %c0_76 = arith.constant 0 : index
    %127 = vector.load %arg8[%c6_74, %c0_75, %c0_76] : memref<9x1x72xf32, #tpu.memory_space<vmem>>, vector<1x1x72xf32>
    %128 = vector.shape_cast %127 : vector<1x1x72xf32> to vector<1x72xf32>
    %129 = vector.broadcast %128 : vector<1x72xf32> to vector<64x72xf32>
    %130 = arith.mulf %126, %129 : vector<64x72xf32>
    %cst_77 = arith.constant 0.000000e+00 : f32
    %131 = vector.broadcast %cst_77 : f32 to vector<64x3xf32>
    %132 = vector.extract_strided_slice %84 {offsets = [0, 3], sizes = [64, 69], strides = [1, 1]} : vector<64x72xf32> to vector<64x69xf32>
    %133 = tpu.concatenate %132, %131 in 1 : vector<64x69xf32>, vector<64x3xf32> -> vector<64x72xf32>
    %c7_78 = arith.constant 7 : index
    %c0_79 = arith.constant 0 : index
    %c0_80 = arith.constant 0 : index
    %134 = vector.load %arg8[%c7_78, %c0_79, %c0_80] : memref<9x1x72xf32, #tpu.memory_space<vmem>>, vector<1x1x72xf32>
    %135 = vector.shape_cast %134 : vector<1x1x72xf32> to vector<1x72xf32>
    %136 = vector.broadcast %135 : vector<1x72xf32> to vector<64x72xf32>
    %137 = arith.mulf %133, %136 : vector<64x72xf32>
    %cst_81 = arith.constant 0.000000e+00 : f32
    %138 = vector.broadcast %cst_81 : f32 to vector<64x4xf32>
    %139 = vector.extract_strided_slice %84 {offsets = [0, 4], sizes = [64, 68], strides = [1, 1]} : vector<64x72xf32> to vector<64x68xf32>
    %140 = tpu.concatenate %139, %138 in 1 : vector<64x68xf32>, vector<64x4xf32> -> vector<64x72xf32>
    %c8_82 = arith.constant 8 : index
    %c0_83 = arith.constant 0 : index
    %c0_84 = arith.constant 0 : index
    %141 = vector.load %arg8[%c8_82, %c0_83, %c0_84] : memref<9x1x72xf32, #tpu.memory_space<vmem>>, vector<1x1x72xf32>
    %142 = vector.shape_cast %141 : vector<1x1x72xf32> to vector<1x72xf32>
    %143 = vector.broadcast %142 : vector<1x72xf32> to vector<64x72xf32>
    %144 = arith.mulf %140, %143 : vector<64x72xf32>
    %145 = tpu.concatenate %91, %98, %105, %112, %116, %123, %130, %137, %144 in 0 : vector<64x72xf32>, vector<64x72xf32>, vector<64x72xf32>, vector<64x72xf32>, vector<64x72xf32>, vector<64x72xf32>, vector<64x72xf32>, vector<64x72xf32>, vector<64x72xf32> -> vector<576x72xf32>
    %c0_85 = arith.constant 0 : index
    %c0_86 = arith.constant 0 : index
    %146 = vector.load %arg6[%c0_85, %c0_86] : memref<1x576xf32, #tpu.memory_space<vmem>>, vector<1x576xf32>
    %cst_87 = arith.constant dense<0.000000e+00> : vector<1x72xf32>
    %147 = tpu.matmul %146, %145, %cst_87 {dimension_numbers = #tpu.dot_dimension_numbers<[1], [0], [0], [1], [0, 0, 1, 1], [], []>} : vector<1x576xf32>, vector<576x72xf32>, vector<1x72xf32> -> vector<1x72xf32>
    %c0_88 = arith.constant 0 : index
    %c0_89 = arith.constant 0 : index
    %148 = vector.load %arg7[%c0_88, %c0_89] : memref<1x1xf32, #tpu.memory_space<vmem>>, vector<1x1xf32>
    %149 = vector.broadcast %148 : vector<1x1xf32> to vector<1x72xf32>
    %150 = arith.addf %147, %149 : vector<1x72xf32>
    %cst_90 = arith.constant 0.000000e+00 : f32
    %151 = vector.broadcast %cst_90 : f32 to vector<1x72xf32>
    %152 = arith.maximumf %150, %151 : vector<1x72xf32>
    %c0_91 = arith.constant 0 : index
    %c0_92 = arith.constant 0 : index
    %c0_93 = arith.constant 0 : index
    %153 = vector.load %arg9[%c0_91, %c0_92, %c0_93] : memref<9x72x8xf32, #tpu.memory_space<vmem>>, vector<1x72x8xf32>
    %154 = vector.shape_cast %153 : vector<1x72x8xf32> to vector<72x8xf32>
    %cst_94 = arith.constant dense<0.000000e+00> : vector<1x8xf32>
    %155 = tpu.matmul %152, %154, %cst_94 {dimension_numbers = #tpu.dot_dimension_numbers<[1], [0], [0], [1], [0, 0, 1, 1], [], []>} : vector<1x72xf32>, vector<72x8xf32>, vector<1x8xf32> -> vector<1x8xf32>
    %c1_95 = arith.constant 1 : index
    %c0_96 = arith.constant 0 : index
    %c0_97 = arith.constant 0 : index
    %156 = vector.load %arg9[%c1_95, %c0_96, %c0_97] : memref<9x72x8xf32, #tpu.memory_space<vmem>>, vector<1x72x8xf32>
    %157 = vector.shape_cast %156 : vector<1x72x8xf32> to vector<72x8xf32>
    %cst_98 = arith.constant dense<0.000000e+00> : vector<1x8xf32>
    %158 = tpu.matmul %152, %157, %cst_98 {dimension_numbers = #tpu.dot_dimension_numbers<[1], [0], [0], [1], [0, 0, 1, 1], [], []>} : vector<1x72xf32>, vector<72x8xf32>, vector<1x8xf32> -> vector<1x8xf32>
    %c2_99 = arith.constant 2 : index
    %c0_100 = arith.constant 0 : index
    %c0_101 = arith.constant 0 : index
    %159 = vector.load %arg9[%c2_99, %c0_100, %c0_101] : memref<9x72x8xf32, #tpu.memory_space<vmem>>, vector<1x72x8xf32>
    %160 = vector.shape_cast %159 : vector<1x72x8xf32> to vector<72x8xf32>
    %cst_102 = arith.constant dense<0.000000e+00> : vector<1x8xf32>
    %161 = tpu.matmul %152, %160, %cst_102 {dimension_numbers = #tpu.dot_dimension_numbers<[1], [0], [0], [1], [0, 0, 1, 1], [], []>} : vector<1x72xf32>, vector<72x8xf32>, vector<1x8xf32> -> vector<1x8xf32>
    %c3_103 = arith.constant 3 : index
    %c0_104 = arith.constant 0 : index
    %c0_105 = arith.constant 0 : index
    %162 = vector.load %arg9[%c3_103, %c0_104, %c0_105] : memref<9x72x8xf32, #tpu.memory_space<vmem>>, vector<1x72x8xf32>
    %163 = vector.shape_cast %162 : vector<1x72x8xf32> to vector<72x8xf32>
    %cst_106 = arith.constant dense<0.000000e+00> : vector<1x8xf32>
    %164 = tpu.matmul %152, %163, %cst_106 {dimension_numbers = #tpu.dot_dimension_numbers<[1], [0], [0], [1], [0, 0, 1, 1], [], []>} : vector<1x72xf32>, vector<72x8xf32>, vector<1x8xf32> -> vector<1x8xf32>
    %c4_107 = arith.constant 4 : index
    %c0_108 = arith.constant 0 : index
    %c0_109 = arith.constant 0 : index
    %165 = vector.load %arg9[%c4_107, %c0_108, %c0_109] : memref<9x72x8xf32, #tpu.memory_space<vmem>>, vector<1x72x8xf32>
    %166 = vector.shape_cast %165 : vector<1x72x8xf32> to vector<72x8xf32>
    %cst_110 = arith.constant dense<0.000000e+00> : vector<1x8xf32>
    %167 = tpu.matmul %152, %166, %cst_110 {dimension_numbers = #tpu.dot_dimension_numbers<[1], [0], [0], [1], [0, 0, 1, 1], [], []>} : vector<1x72xf32>, vector<72x8xf32>, vector<1x8xf32> -> vector<1x8xf32>
    %c5_111 = arith.constant 5 : index
    %c0_112 = arith.constant 0 : index
    %c0_113 = arith.constant 0 : index
    %168 = vector.load %arg9[%c5_111, %c0_112, %c0_113] : memref<9x72x8xf32, #tpu.memory_space<vmem>>, vector<1x72x8xf32>
    %169 = vector.shape_cast %168 : vector<1x72x8xf32> to vector<72x8xf32>
    %cst_114 = arith.constant dense<0.000000e+00> : vector<1x8xf32>
    %170 = tpu.matmul %152, %169, %cst_114 {dimension_numbers = #tpu.dot_dimension_numbers<[1], [0], [0], [1], [0, 0, 1, 1], [], []>} : vector<1x72xf32>, vector<72x8xf32>, vector<1x8xf32> -> vector<1x8xf32>
    %c6_115 = arith.constant 6 : index
    %c0_116 = arith.constant 0 : index
    %c0_117 = arith.constant 0 : index
    %171 = vector.load %arg9[%c6_115, %c0_116, %c0_117] : memref<9x72x8xf32, #tpu.memory_space<vmem>>, vector<1x72x8xf32>
    %172 = vector.shape_cast %171 : vector<1x72x8xf32> to vector<72x8xf32>
    %cst_118 = arith.constant dense<0.000000e+00> : vector<1x8xf32>
    %173 = tpu.matmul %152, %172, %cst_118 {dimension_numbers = #tpu.dot_dimension_numbers<[1], [0], [0], [1], [0, 0, 1, 1], [], []>} : vector<1x72xf32>, vector<72x8xf32>, vector<1x8xf32> -> vector<1x8xf32>
    %c7_119 = arith.constant 7 : index
    %c0_120 = arith.constant 0 : index
    %c0_121 = arith.constant 0 : index
    %174 = vector.load %arg9[%c7_119, %c0_120, %c0_121] : memref<9x72x8xf32, #tpu.memory_space<vmem>>, vector<1x72x8xf32>
    %175 = vector.shape_cast %174 : vector<1x72x8xf32> to vector<72x8xf32>
    %cst_122 = arith.constant dense<0.000000e+00> : vector<1x8xf32>
    %176 = tpu.matmul %152, %175, %cst_122 {dimension_numbers = #tpu.dot_dimension_numbers<[1], [0], [0], [1], [0, 0, 1, 1], [], []>} : vector<1x72xf32>, vector<72x8xf32>, vector<1x8xf32> -> vector<1x8xf32>
    %c8_123 = arith.constant 8 : index
    %c0_124 = arith.constant 0 : index
    %c0_125 = arith.constant 0 : index
    %177 = vector.load %arg9[%c8_123, %c0_124, %c0_125] : memref<9x72x8xf32, #tpu.memory_space<vmem>>, vector<1x72x8xf32>
    %178 = vector.shape_cast %177 : vector<1x72x8xf32> to vector<72x8xf32>
    %cst_126 = arith.constant dense<0.000000e+00> : vector<1x8xf32>
    %179 = tpu.matmul %152, %178, %cst_126 {dimension_numbers = #tpu.dot_dimension_numbers<[1], [0], [0], [1], [0, 0, 1, 1], [], []>} : vector<1x72xf32>, vector<72x8xf32>, vector<1x8xf32> -> vector<1x8xf32>
    %180 = arith.maximumf %158, %161 : vector<1x8xf32>
    %181 = arith.maximumf %164, %167 : vector<1x8xf32>
    %182 = arith.maximumf %170, %173 : vector<1x8xf32>
    %183 = arith.maximumf %182, %176 : vector<1x8xf32>
    %184 = arith.maximumf %183, %179 : vector<1x8xf32>
    %185 = tpu.concatenate %155, %180, %181, %184 in 0 : vector<1x8xf32>, vector<1x8xf32>, vector<1x8xf32>, vector<1x8xf32> -> vector<4x8xf32>
    %c0_127 = arith.constant 0 : index
    %c0_128 = arith.constant 0 : index
    %186 = vector.load %arg10[%c0_127, %c0_128] : memref<8x4xf32, #tpu.memory_space<vmem>>, vector<8x4xf32>
    %cst_129 = arith.constant dense<0.000000e+00> : vector<8x8xf32>
    %187 = tpu.matmul %186, %185, %cst_129 {dimension_numbers = #tpu.dot_dimension_numbers<[1], [0], [0], [1], [0, 0, 1, 1], [], []>} : vector<8x4xf32>, vector<4x8xf32>, vector<8x8xf32> -> vector<8x8xf32>
    %c0_130 = arith.constant 0 : index
    %c0_131 = arith.constant 0 : index
    %188 = vector.load %arg11[%c0_130, %c0_131] : memref<8x1xf32, #tpu.memory_space<vmem>>, vector<8x1xf32>
    %189 = vector.broadcast %188 : vector<8x1xf32> to vector<8x8xf32>
    %190 = arith.addf %187, %189 : vector<8x8xf32>
    %cst_132 = arith.constant 0.000000e+00 : f32
    %191 = vector.broadcast %cst_132 : f32 to vector<8x8xf32>
    %192 = arith.maximumf %190, %191 : vector<8x8xf32>
    %c0_133 = arith.constant 0 : index
    %c0_134 = arith.constant 0 : index
    %193 = vector.load %arg12[%c0_133, %c0_134] : memref<1x8xf32, #tpu.memory_space<vmem>>, vector<1x8xf32>
    %cst_135 = arith.constant dense<0.000000e+00> : vector<1x8xf32>
    %194 = tpu.matmul %193, %192, %cst_135 {dimension_numbers = #tpu.dot_dimension_numbers<[1], [0], [0], [1], [0, 0, 1, 1], [], []>} : vector<1x8xf32>, vector<8x8xf32>, vector<1x8xf32> -> vector<1x8xf32>
    %c0_136 = arith.constant 0 : index
    %c0_137 = arith.constant 0 : index
    %195 = vector.load %arg13[%c0_136, %c0_137] : memref<1x1xf32, #tpu.memory_space<vmem>>, vector<1x1xf32>
    %196 = vector.broadcast %195 : vector<1x1xf32> to vector<1x8xf32>
    %197 = arith.addf %194, %196 : vector<1x8xf32>
    %c0_138 = arith.constant 0 : index
    %c0_139 = arith.constant 0 : index
    %c0_140 = arith.constant 0 : index
    %198 = vector.load %arg14[%c0_138, %c0_139, %c0_140] : memref<1x1x8xf32, #tpu.memory_space<vmem>>, vector<1x1x8xf32>
    %199 = vector.shape_cast %198 : vector<1x1x8xf32> to vector<1x8xf32>
    %200 = vector.shape_cast %197 : vector<1x8xf32> to vector<1x1x8xf32>
    tpu.vector_store %arg14[%c0_138, %c0_139, %c0_140], %200 {strides = array<i32>} : memref<1x1x8xf32, #tpu.memory_space<vmem>>, vector<1x1x8xf32>,
    return
  }
  func.func @transform_0(%arg0: i32) -> (i32, i32, i32) {
    %c0_i32 = arith.constant 0 : i32
    %c0_i32_0 = arith.constant 0 : i32
    %c0_i32_1 = arith.constant 0 : i32
    return %arg0, %c0_i32, %c0_i32_0 : i32, i32, i32
  }
  func.func @transform_1(%arg0: i32) -> (i32, i32) {
    %c0_i32 = arith.constant 0 : i32
    %c0_i32_0 = arith.constant 0 : i32
    %c0_i32_1 = arith.constant 0 : i32
    return %c0_i32, %c0_i32_0 : i32, i32
  }
  func.func @transform_2(%arg0: i32) -> (i32, i32) {
    %c0_i32 = arith.constant 0 : i32
    %c0_i32_0 = arith.constant 0 : i32
    %c0_i32_1 = arith.constant 0 : i32
    return %c0_i32, %c0_i32_0 : i32, i32
  }
  func.func @transform_3(%arg0: i32) -> (i32, i32, i32) {
    %c0_i32 = arith.constant 0 : i32
    %c0_i32_0 = arith.constant 0 : i32
    %c0_i32_1 = arith.constant 0 : i32
    %c0_i32_2 = arith.constant 0 : i32
    return %c0_i32, %c0_i32_0, %c0_i32_1 : i32, i32, i32
  }
  func.func @transform_4(%arg0: i32) -> (i32, i32, i32) {
    %c0_i32 = arith.constant 0 : i32
    %c0_i32_0 = arith.constant 0 : i32
    %c0_i32_1 = arith.constant 0 : i32
    %c0_i32_2 = arith.constant 0 : i32
    return %c0_i32, %c0_i32_0, %c0_i32_1 : i32, i32, i32
  }
  func.func @transform_5(%arg0: i32) -> (i32, i32) {
    %c0_i32 = arith.constant 0 : i32
    %c0_i32_0 = arith.constant 0 : i32
    %c0_i32_1 = arith.constant 0 : i32
    return %c0_i32, %c0_i32_0 : i32, i32
  }
  func.func @transform_6(%arg0: i32) -> (i32, i32) {
    %c0_i32 = arith.constant 0 : i32
    %c0_i32_0 = arith.constant 0 : i32
    %c0_i32_1 = arith.constant 0 : i32
    return %c0_i32, %c0_i32_0 : i32, i32
  }
  func.func @transform_7(%arg0: i32) -> (i32, i32, i32) {
    %c0_i32 = arith.constant 0 : i32
    %c0_i32_0 = arith.constant 0 : i32
    %c0_i32_1 = arith.constant 0 : i32
    %c0_i32_2 = arith.constant 0 : i32
    return %c0_i32, %c0_i32_0, %c0_i32_1 : i32, i32, i32
  }
  func.func @transform_8(%arg0: i32) -> (i32, i32, i32) {
    %c0_i32 = arith.constant 0 : i32
    %c0_i32_0 = arith.constant 0 : i32
    %c0_i32_1 = arith.constant 0 : i32
    %c0_i32_2 = arith.constant 0 : i32
    return %c0_i32, %c0_i32_0, %c0_i32_1 : i32, i32, i32
  }
  func.func @transform_9(%arg0: i32) -> (i32, i32) {
    %c0_i32 = arith.constant 0 : i32
    %c0_i32_0 = arith.constant 0 : i32
    %c0_i32_1 = arith.constant 0 : i32
    return %c0_i32, %c0_i32_0 : i32, i32
  }
  func.func @transform_10(%arg0: i32) -> (i32, i32) {
    %c0_i32 = arith.constant 0 : i32
    %c0_i32_0 = arith.constant 0 : i32
    %c0_i32_1 = arith.constant 0 : i32
    return %c0_i32, %c0_i32_0 : i32, i32
  }
  func.func @transform_11(%arg0: i32) -> (i32, i32) {
    %c0_i32 = arith.constant 0 : i32
    %c0_i32_0 = arith.constant 0 : i32
    %c0_i32_1 = arith.constant 0 : i32
    return %c0_i32, %c0_i32_0 : i32, i32
  }
  func.func @transform_12(%arg0: i32) -> (i32, i32) {
    %c0_i32 = arith.constant 0 : i32
    %c0_i32_0 = arith.constant 0 : i32
    %c0_i32_1 = arith.constant 0 : i32
    return %c0_i32, %c0_i32_0 : i32, i32
  }
  func.func @transform_13(%arg0: i32) -> (i32, i32, i32) {
    %c0_i32 = arith.constant 0 : i32
    %c0_i32_0 = arith.constant 0 : i32
    %c0_i32_1 = arith.constant 0 : i32
    return %arg0, %c0_i32, %c0_i32_0 : i32, i32, i32
  }
}

</mosaic_0001>

<bundles_post_ra>
// kernel: tpu_custom_call.1
= control target key start
LH: loop header
LB: loop body
LE: loop exit
PB: predicated region body
PF: predicated region fallthrough
CT: control target
= control target key end

     0   :  { %s5900_s0 = inlined_call_operand.vmem [shape: bf16[1,64,200], index: 0, kind: input, shape index: {}]   ;;  %s5901_s1 = inlined_call_operand.vmem [shape: bf16[64,576], index: 1, kind: input, shape index: {}]   ;;  %s5902_s2 = inlined_call_operand.vmem [shape: f32[64,1], index: 2, kind: input, shape index: {}]   ;;  %s5903_s3 = inlined_call_operand.vmem [shape: bf16[9,1,200], index: 3, kind: input, shape index: {}]   ;;  %s5904_s4 = inlined_call_operand.vmem [shape: f32[4,200,72], index: 4, kind: input, shape index: {}]   ;;  %s5905_s5 = inlined_call_operand.vmem [shape: f32[1,576], index: 5, kind: input, shape index: {}]   ;;  %s5906_s6 = inlined_call_operand.<no memory space> [shape: f32[1,1], index: 6, kind: input, shape index: {}]   ;;  %s5907_s7 = inlined_call_operand.vmem [shape: f32[9,1,72], index: 7, kind: input, shape index: {}]   ;;  %s5908_s8 = inlined_call_operand.vmem [shape: f32[9,72,8], index: 8, kind: input, shape index: {}]   ;;  %s5909_s9 = inlined_call_operand.vmem [shape: f32[8,4], index: 9, kind: input, shape index: {}]   ;;  %s5910_s10 = inlined_call_operand.vmem [shape: f32[8,1], index: 10, kind: input, shape index: {}]   ;;  %s5911_s11 = inlined_call_operand.vmem [shape: f32[1,8], index: 11, kind: input, shape index: {}]   ;;  %s5912_s13 = inlined_call_operand.hbm [shape: f32[1,1,8], index: 13, kind: output, shape index: {}]   ;;  %s5913_s12 = inlined_call_operand.<no memory space> [shape: f32[1,1], index: 12, kind: input, shape index: {}]  }
   0x1   :  { %v18_v0 = vstv %s5906_s6  ;;  %v20_v1 = vstv %s5913_s12 }
   0x2   :  { %19 = vst [vmem:[#allocation2] sm:$0x1] %v18_v0 }
   0x3   :  { %21 = vst [vmem:[#allocation3] sm:$0x1] %v20_v1 }
   0x4   :  { %v3119_v2 = vld [vmem:[%s5900_s0 + $0x30] sm:$0xf]  ;;  %v3428_v3 = vld [vmem:[%s5900_s0 + $0x34] sm:$0xf0]  ;;  %v3111_v5 = vld [vmem:[%s5900_s0 + $0x20] sm:$0xf] }
   0x5   :  { %v3597_v4 = vor.u32 %v3428_v3, %v3119_v2  ;;  %v3426_v6 = vld [vmem:[%s5900_s0 + $0x24] sm:$0xf0]  ;;  %s3501_s12 = smov 1   ;;  %s3502_s19 = smov 5   ;;  %v3427_v8 = vld [vmem:[%s5900_s0 + $0x34] sm:$0xf] }
   0x6   :  { %v3609_v7 = vor.u32 %v3426_v6, %v3111_v5  ;;  %v3121_v9 = vld [vmem:[%s5900_s0 + $0x38] sm:$0xf0]  ;;  %v3425_v10 = vld [vmem:[%s5900_s0 + $0x24] sm:$0xf]  ;;  %v3113_v12 = vld [vmem:[%s5900_s0 + $0x28] sm:$0xf0] }
   0x7   :  { %378 = vrot.lane.b32.xlu1 %v3597_v4, %s3501_s12  ;;  %194 = vrot.lane.b32.xlu0 %v3597_v4, %s3502_s19  ;;  %v3622_v11 = vor.u32 %v3427_v8, %v3121_v9 }
   0x8   :  { %190 = vrot.lane.b32.xlu2 %v3609_v7, %s3502_s19 }
   0x9   :  { %22 = vsyncpa [#allocation5], 0  ;;  %v3631_v13 = vor.u32 %v3425_v10, %v3113_v12  ;;  %v3103_v14 = vld [vmem:[%s5900_s0 + $0x10] sm:$0xf]  ;;  %v3424_v15 = vld [vmem:[%s5900_s0 + $0x14] sm:$0xf0] }
   0xa   :  { %v3645_v16 = vor.u32 %v3424_v15, %v3103_v14  ;;  %v3423_v17 = vld [vmem:[%s5900_s0 + $0x14] sm:$0xf]  ;;  %v3105_v18 = vld [vmem:[%s5900_s0 + $0x18] sm:$0xf0]  ;;  %v3095_v20 = vld [vmem:[%s5900_s0] sm:$0xf] }
   0xb   :  { %v3655_v19 = vor.u32 %v3423_v17, %v3105_v18  ;;  %v3422_v21 = vld [vmem:[%s5900_s0 + $0x4] sm:$0xf0]  ;;  %v3421_v22 = vld [vmem:[%s5900_s0 + $0x4] sm:$0xf]  ;;  %v3097_v23 = vld [vmem:[%s5900_s0 + $0x8] sm:$0xf0] }
   0xc   :  { %v3675_v24 = vor.u32 %v3422_v21, %v3095_v20  ;;  %v3677_v25 = vor.u32 %v3421_v22, %v3097_v23  ;;  %s3503_s27 = smov 6   ;;  %s3504_s28 = smov 4   ;;  %v129_v26 = vld [vmem:[%s5903_s3] sm:$0x3]  ;;  %v3125_v29 = vld [vmem:[%s5903_s3 + $0x2] sm:$0x3] }
   0xd   :  { %131 = vst [vmem:[#allocation1] ss:$9 sm:$0xff] %v129_v26  ;;  %v3126_v32 = vld [vmem:[%s5903_s3 + $0x4] sm:$0x3]  ;;  %v3127_v35 = vld [vmem:[%s5903_s3 + $0x6] sm:$0x3] }
   0xe   :  { %s3505_s18 = smov 127   ;;  %s3506_s20 = smov 123   ;;  %v3128_v38 = vld [vmem:[%s5903_s3 + $0x8] sm:$0x3]  ;;  %vm198_vm0 = vcmask 39936   ;;  %vm382_vm1 = vcmask 7168  }
   0xf   :  { %380 = vrot.lane.b32.xlu1 %v3622_v11, %s3501_s12  ;;  %196 = vrot.lane.b32.xlu0 %v3622_v11, %s3502_s19  ;;  %v3129_v42 = vld [vmem:[%s5903_s3 + $0xa] sm:$0x3]  ;;  %s3507_s25 = smov 124   ;;  %s3508_s26 = smov 122   ;;  %vm106_vm2 = vcmask 48128   ;;  %vm290_vm3 = vcmask 31744  }
  0x10   :  { %192 = vrot.lane.b32.xlu2 %v3631_v13, %s3502_s19  ;;  %vm721_vm4 = vcmask 547840   ;;  %vm537_vm5 = vcmask 580608   ;;  %vm528_vm6 = vcmask 1039360   ;;  %vm712_vm7 = vcmask 1006592   ;;  %s3511_s6 = smov 125  }
  0x11   :  { %vm629_vm8 = vcmask 556032   ;;  %vm620_vm9 = vcmask 1014784   ;;  %vm804_vm10 = vcmask 998400   ;;  %vm813_vm11 = vcmask 539648  }
  0x12   :  { %vm1412_vm12 = vcmask 523264   ;;  %vm1756_vm13 = vcmask 588800   ;;  %vm2287_vm14 = vcmask 23552   ;;  %vm2333_vm15 = vcmask 15360  }
  0x14   :  { %v3702_v27 = vld [vmem:[#allocation1] sm:$0xff]  ;;  %v3704_v28 = vld [vmem:[#allocation1 + $0x9] sm:$0xff] }
  0x15   :  { %223 = vst [vmem:[#allocation1] ss:$9 sm:$0xff] %v3125_v29 }
  0x17   :  { %374 = vrot.lane.b32.xlu0 %v3609_v7, %s3501_s12  ;;  %376 = vrot.lane.b32.xlu1 %v3631_v13, %s3501_s12 }
  0x18   :  { %186 = vrot.lane.b32.xlu2 %v3645_v16, %s3502_s19 }
  0x1c   :  { %v224_v30 = vld [vmem:[#allocation1] sm:$0xff]  ;;  %v225_v31 = vld [vmem:[#allocation1 + $0x9] sm:$0xff] }
  0x1d   :  { %315 = vst [vmem:[#allocation1] ss:$9 sm:$0xff] %v3126_v32  ;;  %v226_v39 = vpack.i.b16 %v224_v30, %v224_v30  ;;  %v229_v41 = vpack.i.b16 %v225_v31, %v225_v31 }
  0x1f   :  { %370 = vrot.lane.b32.xlu1 %v3645_v16, %s3501_s12  ;;  %188 = vrot.lane.b32.xlu0 %v3655_v19, %s3502_s19  ;;  %v228_v44 = vperm.slane %v226_v39, 0  ;;  %v231_v47 = vperm.slane %v229_v41, 0 }
  0x20   :  { %372 = vrot.lane.b32.xlu2 %v3655_v19, %s3501_s12 }
  0x21   :  { %v3756_v50 = vunpack.c.l.bf16 %v228_v44  ;;  %v3758_v51 = vunpack.c.l.bf16 %v231_v47 }
  0x24   :  { %v3720_v33 = vld [vmem:[#allocation1] sm:$0xff]  ;;  %v3722_v34 = vld [vmem:[#allocation1 + $0x9] sm:$0xff] }
  0x25   :  { %407 = vst [vmem:[#allocation1] ss:$9 sm:$0xff] %v3127_v35 }
  0x27   :  { %182 = vrot.lane.b32.xlu0 %v3675_v24, %s3502_s19  ;;  %184 = vrot.lane.b32.xlu1 %v3677_v25, %s3502_s19 }
  0x28   :  { %366 = vrot.lane.b32.xlu2 %v3675_v24, %s3501_s12 }
  0x2c   :  { %v408_v36 = vld [vmem:[#allocation1] sm:$0xff]  ;;  %v409_v37 = vld [vmem:[#allocation1 + $0x9] sm:$0xff] }
  0x2d   :  { %461 = vst [vmem:[#allocation1] ss:$9 sm:$0xff] %v3128_v38  ;;  %v410_v2 = vpack.i.b16 %v408_v36, %v408_v36  ;;  %v413_v6 = vpack.i.b16 %v409_v37, %v409_v37 }
  0x2f   :  { %368 = vrot.lane.b32.xlu0 %v3677_v25, %s3501_s12  ;;  %102 = vrot.lane.b32.xlu1 %v3597_v4, %s3503_s27  ;;  %v412_v9 = vperm.slane %v410_v2, 0  ;;  %v415_v14 = vperm.slane %v413_v6, 0 }
  0x30   :  { %104 = vrot.lane.b32.xlu2 %v3622_v11, %s3503_s27 }
  0x31   :  { %v3795_v15 = vunpack.c.l.bf16 %v412_v9  ;;  %v3797_v21 = vunpack.c.l.bf16 %v415_v14 }
  0x34   :  { %v3750_v45 = vld [vmem:[#allocation1] sm:$0xff]  ;;  %v3752_v46 = vld [vmem:[#allocation1 + $0x9] sm:$0xff] }
  0x35   :  { %553 = vst [vmem:[#allocation1] ss:$9 sm:$0xff] %v3129_v42 }
  0x37   :  { %286 = vrot.lane.b32.xlu0 %v3597_v4, %s3504_s28  ;;  %288 = vrot.lane.b32.xlu1 %v3622_v11, %s3504_s28 }
  0x38   :  { %98 = vrot.lane.b32.xlu2 %v3609_v7, %s3503_s27 }
  0x3f   :  { %100 = vrot.lane.b32.xlu0 %v3631_v13, %s3503_s27  ;;  %282 = vrot.lane.b32.xlu1 %v3609_v7, %s3504_s28 }
  0x40   :  { %284 = vrot.lane.b32.xlu2 %v3631_v13, %s3504_s28 }
  0x47   :  { %94 = vrot.lane.b32.xlu0 %v3645_v16, %s3503_s27  ;;  %96 = vrot.lane.b32.xlu1 %v3655_v19, %s3503_s27 }
  0x48   :  { %278 = vrot.lane.b32.xlu2 %v3645_v16, %s3504_s28 }
  0x4f   :  { %280 = vrot.lane.b32.xlu0 %v3655_v19, %s3504_s28  ;;  %90 = vrot.lane.b32.xlu1 %v3675_v24, %s3503_s27 }
  0x50   :  { %92 = vrot.lane.b32.xlu2 %v3677_v25, %s3503_s27 }
  0x57   :  { %274 = vrot.lane.b32.xlu0 %v3675_v24, %s3504_s28  ;;  %276 = vrot.lane.b32.xlu1 %v3677_v25, %s3504_s28 }
  0x58   :  { %524 = vrot.lane.b32.xlu2 %v3597_v4, %s3505_s18 }
  0x5f   :  { %526 = vrot.lane.b32.xlu0 %v3622_v11, %s3505_s18  ;;  %708 = vrot.lane.b32.xlu1 %v3597_v4, %s3506_s20 }
  0x60   :  { %710 = vrot.lane.b32.xlu2 %v3622_v11, %s3506_s20 }
  0x62   :  { %v191_v40 = vpop.permute.xlu2 %190 }
  0x63   :  { %v215_v43 = vsel %vm198_vm0, 0, %v191_v40 }
  0x64   :  { %v240_v48 = vunpack.c.l.bf16 %v215_v43  ;;  %v242_v49 = vunpack.c.h.bf16 %v215_v43 }
  0x66   :  { %v258_v54 = vmul.f32 %v3756_v50, %v240_v48  ;;  %v260_v55 = vmul.f32 %v3756_v50, %v242_v49 }
  0x67   :  { %520 = vrot.lane.b32.xlu0 %v3609_v7, %s3505_s18  ;;  %522 = vrot.lane.b32.xlu1 %v3631_v13, %s3505_s18 }
  0x68   :  { %704 = vrot.lane.b32.xlu2 %v3609_v7, %s3506_s20 }
  0x6a   :  { %v193_v52 = vpop.permute.xlu2 %192 }
  0x6b   :  { %v201_v53 = vsel %vm198_vm0, %v191_v40, %v193_v52 }
  0x6c   :  { %v241_v56 = vunpack.c.l.bf16 %v201_v53  ;;  %v243_v57 = vunpack.c.h.bf16 %v201_v53 }
  0x6e   :  { %v259_v58 = vmul.f32 %v3758_v51, %v241_v56  ;;  %v261_v59 = vmul.f32 %v3758_v51, %v243_v57 }
  0x6f   :  { %706 = vrot.lane.b32.xlu0 %v3631_v13, %s3506_s20  ;;  %516 = vrot.lane.b32.xlu1 %v3645_v16, %s3505_s18 }
  0x70   :  { %518 = vrot.lane.b32.xlu2 %v3655_v19, %s3505_s18  ;;  %v3771_v60 = vpack.c.bf16 %v259_v58, %v258_v54  ;;  %v3773_v61 = vpack.c.bf16 %v261_v59, %v260_v55 }
  0x72   :  { %v3775_v62 = vpop.permute.xlu2 %186  ;;  %v937_v63 = vunpack.c.h.b16 %v3771_v60  ;;  %v939_v0 = vunpack.c.h.b16 %v3773_v61  ;;  %v936_v55 = vunpack.c.l.b16 %v3771_v60 }
  0x73   :  { %v212_v48 = vsel %vm198_vm0, 0, %v3775_v62 }
  0x74   :  { %v3779_v1 = vpack.c.b16 %v939_v0, %v937_v63  ;;  %v938_v0 = vunpack.c.l.b16 %v3773_v61 }
  0x77   :  { %700 = vrot.lane.b32.xlu0 %v3645_v16, %s3506_s20  ;;  %702 = vrot.lane.b32.xlu1 %v3655_v19, %s3506_s20 }
  0x78   :  { %512 = vrot.lane.b32.xlu2 %v3675_v24, %s3505_s18 }
  0x79   :  { %v379_v3 = vpop.permute.xlu1 %378  ;;  %v195_v5 = vpop.permute.xlu0 %194 }
  0x7a   :  { %v3787_v8 = vpop.permute.xlu2 %372  ;;  %v402_v10 = vsel %vm382_vm1, 0, %v379_v3  ;;  %v218_v12 = vsel %vm198_vm0, 0, %v195_v5 }
  0x7b   :  { %v428_v17 = vunpack.c.l.bf16 %v402_v10  ;;  %v244_v18 = vunpack.c.l.bf16 %v218_v12  ;;  %v246_v20 = vunpack.c.h.bf16 %v218_v12  ;;  %v430_v26 = vunpack.c.h.bf16 %v402_v10 }
  0x7d   :  { %v446_v38 = vmul.f32 %v3795_v15, %v428_v17  ;;  %v262_v39 = vmul.f32 %v3756_v50, %v244_v18  ;;  %v264_v40 = vmul.f32 %v3756_v50, %v246_v20  ;;  %v448_v47 = vmul.f32 %v3795_v15, %v430_v26 }
  0x7e   :  { %v238_v17 = vunpack.c.h.bf16 %v212_v48 }
  0x7f   :  { %514 = vrot.lane.b32.xlu0 %v3677_v25, %s3505_s18  ;;  %696 = vrot.lane.b32.xlu1 %v3675_v24, %s3506_s20 }
  0x80   :  { %698 = vrot.lane.b32.xlu2 %v3677_v25, %s3506_s20  ;;  %s3513_s20 = smov 126  }
  0x81   :  { %v381_v22 = vpop.permute.xlu1 %380  ;;  %v197_v23 = vpop.permute.xlu0 %196 }
  0x82   :  { %v386_v29 = vsel %vm382_vm1, %v379_v3, %v381_v22  ;;  %v202_v30 = vsel %vm198_vm0, %v195_v5, %v197_v23  ;;  %v3803_v37 = vpop.permute.xlu2 %366  ;;  %v236_v5 = vunpack.c.l.bf16 %v212_v48 }
  0x83   :  { %v429_v31 = vunpack.c.l.bf16 %v386_v29  ;;  %v431_v32 = vunpack.c.h.bf16 %v386_v29  ;;  %v245_v35 = vunpack.c.l.bf16 %v202_v30  ;;  %v247_v36 = vunpack.c.h.bf16 %v202_v30 }
  0x84   :  { %v254_v29 = vmul.f32 %v3756_v50, %v236_v5  ;;  %v948_v30 = vpack.c.b16 %v938_v0, %v936_v55 }
  0x85   :  { %v447_v41 = vmul.f32 %v3797_v21, %v429_v31  ;;  %v449_v42 = vmul.f32 %v3797_v21, %v431_v32  ;;  %v263_v43 = vmul.f32 %v3758_v51, %v245_v35  ;;  %v265_v44 = vmul.f32 %v3758_v51, %v247_v36 }
  0x87   :  { %616 = vrot.lane.b32.xlu0 %v3597_v4, %s3507_s25  ;;  %618 = vrot.lane.b32.xlu1 %v3622_v11, %s3507_s25  ;;  %v272_v49 = vpack.c.bf16 %v263_v43, %v262_v39  ;;  %v273_v52 = vpack.c.bf16 %v265_v44, %v264_v40  ;;  %v456_v53 = vpack.c.bf16 %v447_v41, %v446_v38  ;;  %v3839_v41 = vsel %vm382_vm1, 0, %v3803_v37 }
  0x88   :  { %v457_v54 = vpack.c.bf16 %v449_v42, %v448_v47  ;;  %612 = vrot.lane.b32.xlu2 %v3609_v7, %s3507_s25  ;;  %v256_v40 = vmul.f32 %v3756_v50, %v238_v17  ;;  %v134_v42 = vpack.i.b16 %v3702_v27, %v3702_v27  ;;  %v416_v17 = vunpack.c.l.bf16 %v3839_v41 }
  0x89   :  { %v375_v56 = vpop.permute.xlu0 %374  ;;  %v377_v57 = vpop.permute.xlu1 %376  ;;  %v940_v58 = vunpack.c.l.b16 %v272_v49  ;;  %v942_v59 = vunpack.c.l.b16 %v273_v52  ;;  %v1020_v63 = vunpack.c.l.b16 %v456_v53  ;;  %v941_v31 = vunpack.c.h.b16 %v272_v49 }
  0x8a   :  { %v399_v2 = vsel %vm382_vm1, 0, %v375_v56  ;;  %v385_v3 = vsel %vm382_vm1, %v375_v56, %v377_v57  ;;  %v1022_v6 = vunpack.c.l.b16 %v457_v54  ;;  %v3825_v14 = vpop.permute.xlu2 %104  ;;  %v943_v32 = vunpack.c.h.b16 %v273_v52 }
  0x8b   :  { %v424_v9 = vunpack.c.l.bf16 %v399_v2  ;;  %v426_v10 = vunpack.c.h.bf16 %v399_v2  ;;  %v425_v12 = vunpack.c.l.bf16 %v385_v3  ;;  %v427_v60 = vunpack.c.h.bf16 %v385_v3 }
  0x8c   :  { %v950_v18 = vpack.c.b16 %v942_v59, %v940_v58  ;;  %v1030_v20 = vpack.c.b16 %v1022_v6, %v1020_v63  ;;  %v1021_v38 = vunpack.c.h.b16 %v456_v53  ;;  %v1023_v39 = vunpack.c.h.b16 %v457_v54 }
  0x8d   :  { %v442_v61 = vmul.f32 %v3795_v15, %v424_v9  ;;  %v444_v22 = vmul.f32 %v3795_v15, %v426_v10  ;;  %v443_v23 = vmul.f32 %v3797_v21, %v425_v12  ;;  %v445_v26 = vmul.f32 %v3797_v21, %v427_v60 }
  0x8e   :  { %1425 = vmatpush.bf16.msra.mxu0 %v950_v18  ;;  %1454 = vmatpush.bf16.msra.mxu1 %v1030_v20  ;;  %v3843_v43 = vpack.c.b16 %v943_v32, %v941_v31  ;;  %v3847_v52 = vpack.c.b16 %v1023_v39, %v1021_v38  ;;  %v137_v6 = vpack.i.b16 %v3704_v28, %v3704_v28  ;;  %v418_v28 = vunpack.c.h.bf16 %v3839_v41 }
  0x8f   :  { %614 = vrot.lane.b32.xlu0 %v3631_v13, %s3507_s25  ;;  %608 = vrot.lane.b32.xlu1 %v3645_v16, %s3507_s25  ;;  %v454_v35 = vpack.c.bf16 %v443_v23, %v442_v61  ;;  %v455_v36 = vpack.c.bf16 %v445_v26, %v444_v22  ;;  %v136_v26 = vperm.slane %v134_v42, 0 }
  0x90   :  { %610 = vrot.lane.b32.xlu2 %v3655_v19, %s3507_s25 }
  0x91   :  { %v371_v44 = vpop.permute.xlu1 %370  ;;  %v189_v47 = vpop.permute.xlu0 %188  ;;  %v1016_v48 = vunpack.c.l.b16 %v454_v35  ;;  %v1018_v49 = vunpack.c.l.b16 %v455_v36  ;;  %v1017_v53 = vunpack.c.h.b16 %v454_v35  ;;  %v1019_v56 = vunpack.c.h.b16 %v455_v36 }
  0x92   :  { %1426 = vmatpush.bf16.msra.mxu0 %v948_v30  ;;  %v396_v54 = vsel %vm382_vm1, 0, %v371_v44  ;;  %v384_v55 = vsel %vm382_vm1, %v371_v44, %v3787_v8  ;;  %v200_v27 = vsel %vm198_vm0, %v3775_v62, %v189_v47  ;;  %v3854_v0 = vpop.permute.xlu2 %98  ;;  %v139_v30 = vperm.slane %v137_v6, 0 }
  0x93   :  { %v420_v57 = vunpack.c.l.bf16 %v396_v54  ;;  %v422_v58 = vunpack.c.h.bf16 %v396_v54  ;;  %v421_v59 = vunpack.c.l.bf16 %v384_v55  ;;  %v423_v63 = vunpack.c.h.bf16 %v384_v55 }
  0x94   :  { %v237_v2 = vunpack.c.l.bf16 %v200_v27  ;;  %v239_v3 = vunpack.c.h.bf16 %v200_v27  ;;  %v1028_v5 = vpack.c.b16 %v1018_v49, %v1016_v48  ;;  %v3870_v61 = vpack.c.b16 %v1019_v56, %v1017_v53 }
  0x95   :  { %v438_v9 = vmul.f32 %v3795_v15, %v420_v57  ;;  %v440_v8 = vmul.f32 %v3795_v15, %v422_v58  ;;  %v439_v10 = vmul.f32 %v3797_v21, %v421_v59  ;;  %v441_v62 = vmul.f32 %v3797_v21, %v423_v63 }
  0x96   :  { %v255_v12 = vmul.f32 %v3758_v51, %v237_v2  ;;  %v257_v60 = vmul.f32 %v3758_v51, %v239_v3  ;;  %1455 = vmatpush.bf16.msra.mxu1 %v1028_v5  ;;  %v318_v59 = vpack.i.b16 %v3720_v33, %v3720_v33  ;;  %v436_v5 = vmul.f32 %v3795_v15, %v418_v28 }
  0x97   :  { %800 = vrot.lane.b32.xlu0 %v3597_v4, %s3508_s26  ;;  %802 = vrot.lane.b32.xlu1 %v3622_v11, %s3508_s26  ;;  %v452_v18 = vpack.c.bf16 %v439_v10, %v438_v9  ;;  %v453_v20 = vpack.c.bf16 %v441_v62, %v440_v8  ;;  %v321_v33 = vpack.i.b16 %v3722_v34, %v3722_v34  ;;  %v3900_v9 = vunpack.c.l.bf16 %v136_v26  ;;  %v3917_v26 = vld [vmem:[#allocation1 + $0x9] sm:$0xff] }
  0x98   :  { %v268_v22 = vpack.c.bf16 %v255_v12, %v254_v29  ;;  %v269_v23 = vpack.c.bf16 %v257_v60, %v256_v40  ;;  %604 = vrot.lane.b32.xlu2 %v3675_v24, %s3507_s25  ;;  %v3902_v8 = vunpack.c.l.bf16 %v139_v30  ;;  %v320_v60 = vperm.slane %v318_v59, 0 }
  0x99   :  { %v183_v31 = vpop.permute.xlu0 %182  ;;  %v185_v32 = vpop.permute.xlu1 %184  ;;  %v1012_v35 = vunpack.c.l.b16 %v452_v18  ;;  %v1014_v36 = vunpack.c.l.b16 %v453_v20  ;;  %v1013_v4 = vunpack.c.h.b16 %v452_v18  ;;  %v1015_v38 = vunpack.c.h.b16 %v453_v20 }
  0x9a   :  { %v209_v11 = vsel %vm198_vm0, 0, %v183_v31  ;;  %v199_v39 = vsel %vm198_vm0, %v183_v31, %v185_v32  ;;  %v932_v41 = vunpack.c.l.b16 %v268_v22  ;;  %v934_v44 = vunpack.c.l.b16 %v269_v23  ;;  %v3876_v48 = vpop.permute.xlu2 %284 }
  0x9b   :  { %v232_v47 = vunpack.c.l.bf16 %v209_v11  ;;  %v234_v29 = vunpack.c.h.bf16 %v209_v11  ;;  %v233_v40 = vunpack.c.l.bf16 %v199_v39  ;;  %v235_v42 = vunpack.c.h.bf16 %v199_v39 }
  0x9c   :  { %v946_v49 = vpack.c.b16 %v934_v44, %v932_v41  ;;  %v1026_v53 = vpack.c.b16 %v1014_v36, %v1012_v35  ;;  %v933_v54 = vunpack.c.h.b16 %v268_v22  ;;  %v935_v55 = vunpack.c.h.b16 %v269_v23  ;;  %v3915_v23 = vld [vmem:[#allocation1] sm:$0xff] }
  0x9d   :  { %v250_v27 = vmul.f32 %v3756_v50, %v232_v47  ;;  %v252_v56 = vmul.f32 %v3756_v50, %v234_v29  ;;  %v251_v57 = vmul.f32 %v3758_v51, %v233_v40  ;;  %v253_v58 = vmul.f32 %v3758_v51, %v235_v42 }
  0x9e   :  { %1427 = vmatpush.bf16.msra.mxu0 %v946_v49  ;;  %1456 = vmatpush.bf16.msra.mxu1 %v1026_v53  ;;  %v3884_v63 = vpack.c.b16 %v935_v55, %v933_v54  ;;  %v3886_v2 = vpack.c.b16 %v1015_v38, %v1013_v4  ;;  %v434_v51 = vmul.f32 %v3795_v15, %v416_v17  ;;  %v323_v31 = vperm.slane %v321_v33, 0 }
  0x9f   :  { %606 = vrot.lane.b32.xlu0 %v3677_v25, %s3507_s25  ;;  %796 = vrot.lane.b32.xlu1 %v3609_v7, %s3508_s26  ;;  %v3892_v50 = vpack.c.bf16 %v251_v57, %v250_v27  ;;  %v3894_v3 = vpack.c.bf16 %v253_v58, %v252_v56  ;;  %v3934_v44 = vunpack.c.l.bf16 %v320_v60  ;;  %v124_v40 = vsel %vm106_vm2, 0, %v3854_v0 }
  0xa0   :  { %798 = vrot.lane.b32.xlu2 %v3631_v13, %s3508_s26  ;;  %v3130_v13 = vld [vmem:[%s5903_s3 + $0xc] sm:$0x3]  ;;  %v3936_v47 = vunpack.c.l.bf16 %v323_v31  ;;  %vm2528_vm0 = vcmask 564224  }
  0xa1   :  { %v369_v6 = vpop.permute.xlu0 %368  ;;  %v103_v10 = vpop.permute.xlu1 %102  ;;  %v928_v62 = vunpack.c.l.b16 %v3892_v50  ;;  %v930_v7 = vunpack.c.l.b16 %v3894_v3  ;;  %645 = vst [vmem:[#allocation1] ss:$9 sm:$0xff] %v3130_v13 }
  0xa2   :  { %v383_v12 = vsel %vm382_vm1, %v3803_v37, %v369_v6  ;;  %v110_v15 = vsel %vm106_vm2, %v103_v10, %v3825_v14  ;;  %v127_v34 = vsel %vm106_vm2, 0, %v103_v10  ;;  %v3913_v22 = vpop.permute.xlu2 %278  ;;  %v148_v6 = vunpack.c.l.bf16 %v124_v40 }
  0xa3   :  { %v417_v17 = vunpack.c.l.bf16 %v383_v12  ;;  %v419_v28 = vunpack.c.h.bf16 %v383_v12  ;;  %v152_v18 = vunpack.c.l.bf16 %v127_v34  ;;  %v153_v20 = vunpack.c.l.bf16 %v110_v15 }
  0xa4   :  { %v154_v37 = vunpack.c.h.bf16 %v127_v34  ;;  %v155_v30 = vunpack.c.h.bf16 %v110_v15  ;;  %v944_v14 = vpack.c.b16 %v930_v7, %v928_v62  ;;  %v166_v13 = vmul.f32 %v3900_v9, %v148_v6 }
  0xa5   :  { %v435_v32 = vmul.f32 %v3797_v21, %v417_v17  ;;  %v437_v35 = vmul.f32 %v3797_v21, %v419_v28  ;;  %v170_v36 = vmul.f32 %v3900_v9, %v152_v18  ;;  %v171_v4 = vmul.f32 %v3902_v8, %v153_v20 }
  0xa6   :  { %v172_v38 = vmul.f32 %v3900_v9, %v154_v37  ;;  %v173_v11 = vmul.f32 %v3902_v8, %v155_v30  ;;  %1428 = vmatpush.bf16.msra.mxu0 %v944_v14  ;;  %v150_v17 = vunpack.c.h.bf16 %v124_v40 }
  0xa7   :  { %792 = vrot.lane.b32.xlu0 %v3645_v16, %s3508_s26  ;;  %794 = vrot.lane.b32.xlu1 %v3655_v19, %s3508_s26  ;;  %v3932_v39 = vpack.c.bf16 %v171_v4, %v170_v36  ;;  %v450_v41 = vpack.c.bf16 %v435_v32, %v434_v51  ;;  %v451_v21 = vpack.c.bf16 %v437_v35, %v436_v5 }
  0xa8   :  { %v3938_v29 = vpack.c.bf16 %v173_v11, %v172_v38  ;;  %788 = vrot.lane.b32.xlu2 %v3675_v24, %s3508_s26  ;;  %v3950_v5 = vld [vmem:[#allocation1] sm:$0xff]  ;;  %v3952_v33 = vld [vmem:[#allocation1 + $0x9] sm:$0xff]  ;;  %v168_v35 = vmul.f32 %v3900_v9, %v150_v17 }
  0xa9   :  { %v287_v42 = vpop.permute.xlu0 %286  ;;  %v289_v49 = vpop.permute.xlu1 %288  ;;  %v900_v16 = vunpack.c.l.b16 %v3932_v39  ;;  %v1008_v53 = vunpack.c.l.b16 %v450_v41  ;;  %v1010_v54 = vunpack.c.l.b16 %v451_v21  ;;  %v3131_v24 = vld [vmem:[%s5903_s3 + $0xe] sm:$0x3]  ;;  %v1009_v7 = vunpack.c.h.b16 %v450_v41 }
  0xaa   :  { %v310_v19 = vsel %vm290_vm3, 0, %v287_v42  ;;  %v294_v55 = vsel %vm290_vm3, %v287_v42, %v289_v49  ;;  %v902_v27 = vunpack.c.l.b16 %v3938_v29  ;;  %v3948_v51 = vpop.permute.xlu2 %92  ;;  %737 = vst [vmem:[#allocation1] ss:$9 sm:$0xff] %v3131_v24  ;;  %v1011_v20 = vunpack.c.h.b16 %v451_v21 }
  0xab   :  { %v336_v56 = vunpack.c.l.bf16 %v310_v19  ;;  %v338_v57 = vunpack.c.h.bf16 %v310_v19  ;;  %v337_v58 = vunpack.c.l.bf16 %v294_v55  ;;  %v339_v59 = vunpack.c.h.bf16 %v294_v55 }
  0xac   :  { %v910_v10 = vpack.c.b16 %v902_v27, %v900_v16  ;;  %v1024_v62 = vpack.c.b16 %v1010_v54, %v1008_v53  ;;  %v3970_v32 = vpack.c.b16 %v1011_v20, %v1009_v7  ;;  %v304_v53 = vsel %vm290_vm3, 0, %v3913_v22 }
  0xad   :  { %v354_v12 = vmul.f32 %v3934_v44, %v336_v56  ;;  %v356_v15 = vmul.f32 %v3934_v44, %v338_v57  ;;  %v355_v34 = vmul.f32 %v3936_v47, %v337_v58  ;;  %v357_v60 = vmul.f32 %v3936_v47, %v339_v59 }
  0xae   :  { %1429 = vmatpush.bf16.msra.mxu0 %v910_v10  ;;  %1457 = vmatpush.bf16.msra.mxu1 %v1024_v62  ;;  %v328_v59 = vunpack.c.l.bf16 %v304_v53  ;;  %v330_v6 = vunpack.c.h.bf16 %v304_v53  ;;  %v556_v20 = vpack.i.b16 %v3915_v23, %v3915_v23 }
  0xaf   :  { %790 = vrot.lane.b32.xlu0 %v3677_v25, %s3508_s26  ;;  %v3963_v28 = vpack.c.bf16 %v355_v34, %v354_v12  ;;  %v3965_v18 = vpack.c.bf16 %v357_v60, %v356_v15 }
  0xb0   :  { %v346_v53 = vmul.f32 %v3934_v44, %v328_v59  ;;  %v558_v59 = vperm.slane %v556_v20, 0 }
  0xb1   :  { %v101_v37 = vpop.permute.xlu0 %100  ;;  %v283_v30 = vpop.permute.xlu1 %282  ;;  %v980_v14 = vunpack.c.l.b16 %v3963_v28  ;;  %v982_v31 = vunpack.c.l.b16 %v3965_v18 }
  0xb2   :  { %v109_v25 = vsel %vm106_vm2, %v3854_v0, %v101_v37  ;;  %v293_v36 = vsel %vm290_vm3, %v283_v30, %v3876_v48  ;;  %v307_v4 = vsel %vm290_vm3, 0, %v283_v30  ;;  %v3978_v40 = vpop.permute.xlu2 %524 }
  0xb3   :  { %v149_v38 = vunpack.c.l.bf16 %v109_v25  ;;  %v151_v11 = vunpack.c.h.bf16 %v109_v25  ;;  %v332_v41 = vunpack.c.l.bf16 %v307_v4  ;;  %v333_v21 = vunpack.c.l.bf16 %v293_v36 }
  0xb4   :  { %v334_v42 = vunpack.c.h.bf16 %v307_v4  ;;  %v335_v49 = vunpack.c.h.bf16 %v293_v36  ;;  %v990_v16 = vpack.c.b16 %v982_v31, %v980_v14  ;;  %v739_v31 = vld [vmem:[#allocation1 + $0x9] sm:$0xff]  ;;  %v559_v4 = vpack.i.b16 %v3917_v26, %v3917_v26 }
  0xb5   :  { %v167_v54 = vmul.f32 %v3902_v8, %v149_v38  ;;  %v169_v0 = vmul.f32 %v3902_v8, %v151_v11  ;;  %v350_v48 = vmul.f32 %v3934_v44, %v332_v41  ;;  %v351_v19 = vmul.f32 %v3936_v47, %v333_v21 }
  0xb6   :  { %v352_v55 = vmul.f32 %v3934_v44, %v334_v42  ;;  %v353_v27 = vmul.f32 %v3936_v47, %v335_v49  ;;  %1458 = vmatpush.bf16.msra.mxu1 %v990_v16  ;;  %v981_v38 = vunpack.c.h.b16 %v3963_v28  ;;  %v743_v42 = vpack.i.b16 %v739_v31, %v739_v31 }
  0xb7   :  { %v3988_v56 = vpack.c.bf16 %v167_v54, %v166_v13  ;;  %v3990_v57 = vpack.c.bf16 %v169_v0, %v168_v35  ;;  %v3992_v58 = vpack.c.bf16 %v351_v19, %v350_v48  ;;  %v929_v49 = vunpack.c.h.b16 %v3892_v50 }
  0xb8   :  { %v3994_v24 = vpack.c.bf16 %v353_v27, %v352_v55  ;;  %v983_v16 = vunpack.c.h.b16 %v3965_v18  ;;  %v931_v54 = vunpack.c.h.b16 %v3894_v3  ;;  %v348_v0 = vmul.f32 %v3934_v44, %v330_v6 }
  0xb9   :  { %v95_v10 = vpop.permute.xlu0 %94  ;;  %v97_v62 = vpop.permute.xlu1 %96  ;;  %v896_v7 = vunpack.c.l.b16 %v3988_v56  ;;  %v898_v12 = vunpack.c.l.b16 %v3990_v57  ;;  %v976_v15 = vunpack.c.l.b16 %v3992_v58  ;;  %v901_v48 = vunpack.c.h.b16 %v3932_v39 }
  0xba   :  { %v121_v34 = vsel %vm106_vm2, 0, %v95_v10  ;;  %v108_v60 = vsel %vm106_vm2, %v95_v10, %v97_v62  ;;  %v978_v17 = vunpack.c.l.b16 %v3994_v24  ;;  %v4004_v35 = vpop.permute.xlu2 %710  ;;  %v4023_v19 = vpack.c.b16 %v983_v16, %v981_v38 }
  0xbb   :  { %v144_v13 = vunpack.c.l.bf16 %v121_v34  ;;  %v146_v37 = vunpack.c.h.bf16 %v121_v34  ;;  %v145_v30 = vunpack.c.l.bf16 %v108_v60  ;;  %v147_v14 = vunpack.c.h.bf16 %v108_v60 }
  0xbc   :  { %v908_v25 = vpack.c.b16 %v898_v12, %v896_v7  ;;  %v988_v36 = vpack.c.b16 %v978_v17, %v976_v15  ;;  %v561_v62 = vperm.slane %v559_v4, 0  ;;  %v738_v7 = vld [vmem:[#allocation1] sm:$0xff]  ;;  %v745_v34 = vperm.slane %v743_v42, 0 }
  0xbd   :  { %v162_v11 = vmul.f32 %v3900_v9, %v144_v13  ;;  %v164_v41 = vmul.f32 %v3900_v9, %v146_v37  ;;  %v163_v23 = vmul.f32 %v3902_v8, %v145_v30  ;;  %v165_v21 = vmul.f32 %v3902_v8, %v147_v14 }
  0xbe   :  { %1430 = vmatpush.bf16.msra.mxu0 %v908_v25  ;;  %1459 = vmatpush.bf16.msra.mxu1 %v988_v36  ;;  %v740_v25 = vpack.i.b16 %v738_v7, %v738_v7  ;;  %v732_v16 = vsel %vm721_vm4, %v4004_v35, 0 }
  0xbf   :  { %v4016_v26 = vpack.c.bf16 %v163_v23, %v162_v11  ;;  %v4018_v28 = vpack.c.bf16 %v165_v21, %v164_v41 }
  0xc1   :  { %v281_v55 = vpop.permute.xlu0 %280  ;;  %v91_v27 = vpop.permute.xlu1 %90  ;;  %v892_v10 = vunpack.c.l.b16 %v4016_v26  ;;  %v894_v18 = vunpack.c.l.b16 %v4018_v28 }
  0xc2   :  { %v292_v12 = vsel %vm290_vm3, %v3913_v22, %v281_v55  ;;  %v107_v6 = vsel %vm106_vm2, %v91_v27, %v3948_v51  ;;  %v118_v15 = vsel %vm106_vm2, 0, %v91_v27  ;;  %v4032_v30 = vpop.permute.xlu2 %704  ;;  %v4051_v27 = vunpack.c.l.bf16 %v745_v34 }
  0xc3   :  { %v329_v60 = vunpack.c.l.bf16 %v292_v12  ;;  %v331_v17 = vunpack.c.h.bf16 %v292_v12  ;;  %v140_v13 = vunpack.c.l.bf16 %v118_v15  ;;  %v141_v37 = vunpack.c.l.bf16 %v107_v6 }
  0xc4   :  { %v142_v14 = vunpack.c.h.bf16 %v118_v15  ;;  %v143_v31 = vunpack.c.h.bf16 %v107_v6  ;;  %v906_v20 = vpack.c.b16 %v894_v18, %v892_v10  ;;  %v742_v12 = vperm.slane %v740_v25, 0 }
  0xc5   :  { %v347_v36 = vmul.f32 %v3936_v47, %v329_v60  ;;  %v349_v22 = vmul.f32 %v3936_v47, %v331_v17  ;;  %v158_v4 = vmul.f32 %v3900_v9, %v140_v13  ;;  %v159_v51 = vmul.f32 %v3902_v8, %v141_v37 }
  0xc6   :  { %v160_v38 = vmul.f32 %v3900_v9, %v142_v14  ;;  %v161_v11 = vmul.f32 %v3902_v8, %v143_v31  ;;  %1431 = vmatpush.bf16.msra.mxu0 %v906_v20  ;;  %v4053_v9 = vunpack.c.l.bf16 %v558_v59  ;;  %v4055_v8 = vunpack.c.l.bf16 %v561_v62  ;;  %v3135_v59 = vld [vmem:[%s5901_s1] sm:$0xf]  ;;  %v3431_v62 = vld [vmem:[%s5901_s1 + $0x10] sm:$0xf0] }
  0xc7   :  { %v4041_v23 = vpack.c.bf16 %v159_v51, %v158_v4  ;;  %v4043_v21 = vpack.c.bf16 %v347_v36, %v346_v53  ;;  %v4045_v42 = vpack.c.bf16 %v349_v22, %v348_v0  ;;  %v759_v60 = vunpack.c.l.bf16 %v732_v16 }
  0xc8   :  { %v4049_v55 = vpack.c.bf16 %v161_v11, %v160_v38  ;;  %v761_v36 = vunpack.c.h.bf16 %v732_v16  ;;  %v4071_v22 = vor.u32 %v3431_v62, %v3135_v59  ;;  %v897_v16 = vunpack.c.h.b16 %v3988_v56 }
  0xc9   :  { %v275_v10 = vpop.permute.xlu0 %274  ;;  %v277_v18 = vpop.permute.xlu1 %276  ;;  %v888_v7 = vunpack.c.l.b16 %v4041_v23  ;;  %v972_v53 = vunpack.c.l.b16 %v4043_v21  ;;  %v974_v0 = vunpack.c.l.b16 %v4045_v42  ;;  %vm3002_vm2 = vcmask 1040384  }
  0xca   :  { %v301_v6 = vsel %vm290_vm3, 0, %v275_v10  ;;  %v291_v15 = vsel %vm290_vm3, %v275_v10, %v277_v18  ;;  %v890_v34 = vunpack.c.l.b16 %v4049_v55  ;;  %v4069_v31 = vpop.permute.xlu2 %518  ;;  %v4077_v10 = vunpack.c.l.bf16 %v742_v12 }
  0xcb   :  { %v324_v17 = vunpack.c.l.bf16 %v301_v6  ;;  %v326_v13 = vunpack.c.h.bf16 %v301_v6  ;;  %v325_v37 = vunpack.c.l.bf16 %v291_v15  ;;  %v327_v14 = vunpack.c.h.bf16 %v291_v15 }
  0xcc   :  { %v904_v20 = vpack.c.b16 %v890_v34, %v888_v7  ;;  %v986_v25 = vpack.c.b16 %v974_v0, %v972_v53  ;;  %v542_v18 = vsel %vm537_vm5, %v4069_v31, 0  ;;  %v777_v7 = vmul.f32 %v4051_v27, %v759_v60 }
  0xcd   :  { %v342_v4 = vmul.f32 %v3934_v44, %v324_v17  ;;  %v344_v51 = vmul.f32 %v3934_v44, %v326_v13  ;;  %v343_v38 = vmul.f32 %v3936_v47, %v325_v37  ;;  %v345_v11 = vmul.f32 %v3936_v47, %v327_v14 }
  0xce   :  { %1432 = vmatpush.bf16.msra.mxu0 %v904_v20  ;;  %1460 = vmatpush.bf16.msra.mxu1 %v986_v25  ;;  %v899_v44 = vunpack.c.h.b16 %v3990_v57  ;;  %v779_v47 = vmul.f32 %v4051_v27, %v761_v36  ;;  %v893_v6 = vunpack.c.h.b16 %v4016_v26  ;;  %v895_v12 = vunpack.c.h.b16 %v4018_v28  ;;  %v3429_v57 = vld [vmem:[%s5901_s1 + $0x4] sm:$0xf]  ;;  %v3137_v26 = vld [vmem:[%s5901_s1 + $0x14] sm:$0xf0] }
  0xcf   :  { %v4083_v53 = vpack.c.bf16 %v343_v38, %v342_v4  ;;  %v4085_v0 = vpack.c.bf16 %v345_v11, %v344_v51  ;;  %v889_v15 = vunpack.c.h.b16 %v4041_v23  ;;  %v567_v62 = vunpack.c.l.bf16 %v542_v18 }
  0xd0   :  { %v891_v28 = vunpack.c.h.b16 %v4049_v55  ;;  %v569_v37 = vunpack.c.h.bf16 %v542_v18  ;;  %v4109_v41 = vor.u32 %v3429_v57, %v3137_v26 }
  0xd1   :  { %v527_v34 = vpop.permute.xlu0 %526  ;;  %v709_v59 = vpop.permute.xlu1 %708  ;;  %v968_v56 = vunpack.c.l.b16 %v4083_v53  ;;  %v970_v60 = vunpack.c.l.b16 %v4085_v0  ;;  %1433 = vmatmul.bf16.vlgmr.msra.gmra.mxu0 %v4071_v22  ;;  %v4143_v39 = vmul.f32 %v4055_v8, %v567_v62 }
  0xd2   :  { %v532_v23 = vsel %vm528_vm6, %v3978_v40, %v527_v34  ;;  %v548_v17 = vsel %vm537_vm5, %v527_v34, 0  ;;  %v716_v13 = vsel %vm712_vm7, %v709_v59, %v4004_v35  ;;  %v4107_v4 = vpop.permute.xlu2 %512  ;;  %5927 = vst [vmem:[#allocation7_spill] sm:$0xff] %v4109_v41 }
  0xd3   :  { %v574_v14 = vunpack.c.l.bf16 %v532_v23  ;;  %v575_v20 = vunpack.c.l.bf16 %v548_v17  ;;  %v576_v25 = vunpack.c.h.bf16 %v532_v23  ;;  %v577_v36 = vunpack.c.h.bf16 %v548_v17 }
  0xd4   :  { %v758_v51 = vunpack.c.l.bf16 %v716_v13  ;;  %v760_v38 = vunpack.c.h.bf16 %v716_v13  ;;  %v984_v11 = vpack.c.b16 %v970_v60, %v968_v56  ;;  %v4121_v56 = vpack.c.b16 %v931_v54, %v929_v49 }
  0xd5   :  { %v592_v55 = vmul.f32 %v4053_v9, %v574_v14  ;;  %v593_v40 = vmul.f32 %v4055_v8, %v575_v20  ;;  %v594_v34 = vmul.f32 %v4053_v9, %v576_v25  ;;  %v595_v35 = vmul.f32 %v4055_v8, %v577_v36 }
  0xd6   :  { %v776_v18 = vmul.f32 %v4077_v10, %v758_v51  ;;  %v778_v59 = vmul.f32 %v4077_v10, %v760_v38  ;;  %1461 = vmatpush.bf16.msra.mxu1 %v984_v11  ;;  %v5928_v60 = vunpack.c.h.b16 %v3938_v29  ;;  %v4134_v17 = vpack.c.b16 %v899_v44, %v897_v16  ;;  %v3436_v51 = vld [vmem:[%s5901_s1 + $0x38] sm:$0xf0] }
  0xd7   :  { %v4130_v26 = vpack.c.bf16 %v593_v40, %v592_v55  ;;  %v4132_v23 = vpack.c.bf16 %v595_v35, %v594_v34  ;;  %v4136_v13 = vpack.c.b16 %v895_v12, %v893_v6  ;;  %v4145_v29 = vpack.c.b16 %v891_v28, %v889_v15 }
  0xd8   :  { %v4127_v57 = vpack.c.b16 %v5928_v60, %v901_v48  ;;  %v4138_v50 = vpack.c.bf16 %v777_v7, %v776_v18  ;;  %v4140_v3 = vpack.c.bf16 %v779_v47, %v778_v59  ;;  %v4150_v16 = vmul.f32 %v4055_v8, %v569_v37 }
  0xd9   :  { %v521_v49 = vpop.permute.xlu0 %520  ;;  %v523_v54 = vpop.permute.xlu1 %522  ;;  %v1102_v48 = vunpack.c.l.b16 %v4132_v23  ;;  %1462 = vmatmul.bf16.vlgmr.msra.gmra.mxu1 %v4109_v41  ;;  %v464_v7 = vpack.i.b16 %v3750_v45, %v3750_v45  ;;  %v467_v12 = vpack.i.b16 %v3752_v46, %v3752_v46  ;;  %v3155_v46 = vld [vmem:[%s5901_s1 + $0x28] sm:$0xf]  ;;  %v648_v18 = vpack.i.b16 %v3950_v5, %v3950_v5 }
  0xda   :  { %1570 = vmatpush.bf16.msrb.mxu1 %v3843_v43  ;;  %v1100_v43 = vunpack.c.l.b16 %v4130_v26  ;;  %v531_v44 = vsel %vm528_vm6, %v521_v49, %v523_v54  ;;  %v545_v47 = vsel %vm537_vm5, %v523_v54, 0  ;;  %v1180_v6 = vunpack.c.l.b16 %v4138_v50  ;;  %v4161_v37 = vpop.permute.xlu2 %698 }
  0xdb   :  { %v570_v15 = vunpack.c.l.bf16 %v531_v44  ;;  %v571_v62 = vunpack.c.l.bf16 %v545_v47  ;;  %v572_v28 = vunpack.c.h.bf16 %v531_v44  ;;  %v573_v14 = vunpack.c.h.bf16 %v545_v47 }
  0xdc   :  { %v1110_v20 = vpack.c.b16 %v1102_v48, %v1100_v43  ;;  %v1182_v25 = vunpack.c.l.b16 %v4140_v3  ;;  %v723_v36 = vsel %vm721_vm4, %v4161_v37, 0  ;;  %v651_v49 = vpack.i.b16 %v3952_v33, %v3952_v33 }
  0xdd   :  { %v589_v38 = vmul.f32 %v4055_v8, %v571_v62  ;;  %v590_v11 = vmul.f32 %v4053_v9, %v572_v28  ;;  %v591_v55 = vmul.f32 %v4055_v8, %v573_v14  ;;  %v747_v34 = vunpack.c.l.bf16 %v723_v36 }
  0xde   :  { %1571 = vmatpush.bf16.msrb.mxu1 %v3779_v1  ;;  %v588_v1 = vmul.f32 %v4053_v9, %v570_v15  ;;  %1483 = vmatpush.bf16.msra.mxu2 %v1110_v20  ;;  %v1190_v40 = vpack.c.b16 %v1182_v25, %v1180_v6  ;;  %v749_v35 = vunpack.c.h.bf16 %v723_v36  ;;  %v4186_v54 = vor.u32 %v3436_v51, %v3155_v46 }
  0xdf   :  { %v4182_v60 = vpack.c.bf16 %v591_v55, %v590_v11  ;;  %v4189_v43 = vmul.f32 %v4051_v27, %v747_v34  ;;  %v650_v44 = vperm.slane %v648_v18, 0  ;;  %v466_v5 = vperm.slane %v464_v7, 0 }
  0xe0   :  { %v4180_v59 = vpack.c.bf16 %v589_v38, %v588_v1  ;;  %5929 = vst [vmem:[#allocation8_spill] sm:$0xff] %v4186_v54  ;;  %1512 = vmatpush.bf16.msra.mxu3 %v1190_v40  ;;  %v4192_v48 = vmul.f32 %v4051_v27, %v749_v35  ;;  %v653_v62 = vperm.slane %v651_v49, 0  ;;  %v469_v33 = vperm.slane %v467_v12, 0 }
  0xe1   :  { %v707_v47 = vpop.permute.xlu0 %706  ;;  %v1098_v15 = vunpack.c.l.b16 %v4182_v60  ;;  %1438 = vmatmul.bf16.gmra.mxu0 %v4186_v54  ;;  %v4202_v25 = vunpack.c.l.bf16 %v650_v44 }
  0xe2   :  { %1572 = vmatpush.bf16.msrb.mxu1 %v3884_v63  ;;  %v517_v63 = vpop.permute.xlu1 %516  ;;  %v1096_v6 = vunpack.c.l.b16 %v4180_v59  ;;  %v715_v28 = vsel %vm712_vm7, %v4032_v30, %v707_v47  ;;  %v729_v14 = vsel %vm721_vm4, %v707_v47, 0  ;;  %v4205_v1 = vpop.permute.xlu2 %612  ;;  %v4210_v30 = vld [vmem:[%s5900_s0 + $0x30] sm:$0xff]  ;;  %v4215_v55 = vunpack.c.l.bf16 %v653_v62 }
  0xe3   :  { %v530_v20 = vsel %vm528_vm6, %v517_v63, %v4069_v31  ;;  %v754_v7 = vunpack.c.l.bf16 %v715_v28  ;;  %v755_v36 = vunpack.c.l.bf16 %v729_v14  ;;  %v756_v46 = vunpack.c.h.bf16 %v715_v28  ;;  %v3132_v31 = vld [vmem:[%s5903_s3 + $0x10] sm:$0x3] }
  0xe4   :  { %v757_v51 = vunpack.c.h.bf16 %v729_v14  ;;  %v566_v12 = vunpack.c.l.bf16 %v530_v20  ;;  %v568_v38 = vunpack.c.h.bf16 %v530_v20  ;;  %v1108_v11 = vpack.c.b16 %v1098_v15, %v1096_v6  ;;  %829 = vst [vmem:[#allocation1] ss:$9 sm:$0xff] %v3132_v31  ;;  %v3434_v6 = vld [vmem:[%s5901_s1 + $0x2c] sm:$0xf]  ;;  %v3157_v15 = vld [vmem:[%s5901_s1 + $0x3c] sm:$0xf0] }
  0xe5   :  { %v772_v40 = vmul.f32 %v4077_v10, %v754_v7  ;;  %v773_v34 = vmul.f32 %v4051_v27, %v755_v36  ;;  %v774_v35 = vmul.f32 %v4077_v10, %v756_v46  ;;  %v482_v47 = vunpack.c.l.bf16 %v4210_v30 }
  0xe6   :  { %1573 = vmatpush.bf16.msrb.mxu1 %v4121_v56  ;;  %v4220_v56 = vld [vmem:[%s5900_s0 + $0x38] sm:$0xff]  ;;  %v775_v18 = vmul.f32 %v4051_v27, %v757_v51  ;;  %v584_v49 = vmul.f32 %v4053_v9, %v566_v12  ;;  %v586_v44 = vmul.f32 %v4053_v9, %v568_v38  ;;  %1484 = vmatpush.bf16.msra.mxu2 %v1108_v11  ;;  %v483_v63 = vunpack.c.h.bf16 %v4210_v30 }
  0xe7   :  { %v4237_v62 = vpack.c.bf16 %v773_v34, %v772_v40  ;;  %v484_v14 = vunpack.c.l.bf16 %v4220_v56  ;;  %v485_v20 = vunpack.c.h.bf16 %v4220_v56  ;;  %v4249_v46 = vunpack.c.l.bf16 %v466_v5 }
  0xe8   :  { %v4239_v28 = vpack.c.bf16 %v775_v18, %v774_v35  ;;  %v4244_v7 = vpack.c.bf16 %v4143_v39, %v584_v49  ;;  %v4247_v36 = vpack.c.bf16 %v4150_v16, %v586_v44  ;;  %v4251_v51 = vunpack.c.l.bf16 %v469_v33 }
  0xe9   :  { %v701_v30 = vpop.permute.xlu0 %700  ;;  %v1176_v12 = vunpack.c.l.b16 %v4237_v62  ;;  %v4258_v11 = vor.u32 %v3434_v6, %v3157_v15  ;;  %v3509_v56 = vmov 0  }
  0xea   :  { %1574 = vmatpush.bf16.msrb.mxu1 %v4127_v57  ;;  %v1264_v57 = vld [vmem:[%s5902_s2] sm:$0xff]  ;;  %v703_v31 = vpop.permute.xlu1 %702  ;;  %v1178_v38 = vunpack.c.l.b16 %v4239_v28  ;;  %v1092_v5 = vunpack.c.l.b16 %v4244_v7  ;;  %v1094_v33 = vunpack.c.l.b16 %v4247_v36  ;;  %3463 = vset.pattern.permute.xlu1 %v3509_v56  ;;  %v4265_v49 = vpop.permute.xlu2 %610 }
  0xeb   :  { %5930 = vst [vmem:[#allocation9_spill] sm:$0xff] %v4258_v11  ;;  %v714_v39 = vsel %vm712_vm7, %v701_v30, %v703_v31  ;;  %v726_v16 = vsel %vm721_vm4, %v703_v31, 0  ;;  %3465 = vset.pattern.permute.xlu0 %v3509_v56  ;;  %1274 = vperm.xlu1 %3463, %v1264_v57   ;;  %v634_v15 = vsel %vm629_vm8, %v4265_v49, 0  ;;  %v500_v30 = vmul.f32 %v4249_v46, %v482_v47  ;;  %v54_v31 = vld [vmem:[%s5900_s0 + $0x20] sm:$0xff] }
  0xec   :  { %v750_v40 = vunpack.c.l.bf16 %v714_v39  ;;  %v751_v34 = vunpack.c.l.bf16 %v726_v16  ;;  %v752_v35 = vunpack.c.h.bf16 %v714_v39  ;;  %v753_v18 = vunpack.c.h.bf16 %v726_v16  ;;  %1467 = vmatmul.bf16.gmra.mxu1 %v4258_v11  ;;  %3464 = vset.pattern.permute.xlu2 %v3509_v56 }
  0xed   :  { %v1106_v44 = vpack.c.b16 %v1094_v33, %v1092_v5  ;;  %v1188_v6 = vpack.c.b16 %v1178_v38, %v1176_v12  ;;  %v659_v38 = vunpack.c.l.bf16 %v634_v15  ;;  %v661_v16 = vunpack.c.h.bf16 %v634_v15  ;;  %v55_v33 = vld [vmem:[%s5900_s0 + $0x28] sm:$0xff] }
  0xee   :  { %1575 = vmatpush.bf16.msrb.mxu1 %v4134_v17  ;;  %v768_v39 = vmul.f32 %v4077_v10, %v750_v40  ;;  %v769_v17 = vmul.f32 %v4051_v27, %v751_v34  ;;  %v770_v57 = vmul.f32 %v4077_v10, %v752_v35  ;;  %v771_v12 = vmul.f32 %v4051_v27, %v753_v18 }
  0xef   :  { %1485 = vmatpush.bf16.msra.mxu2 %v1106_v44  ;;  %1513 = vmatpush.bf16.msra.mxu3 %v1188_v6  ;;  %v501_v47 = vmul.f32 %v4251_v51, %v483_v63  ;;  %v502_v5 = vmul.f32 %v4249_v46, %v484_v14  ;;  %v503_v27 = vmul.f32 %v4251_v51, %v485_v20  ;;  %v478_v34 = vunpack.c.l.bf16 %v54_v31 }
  0xf0   :  { %v4284_v56 = vpack.c.bf16 %v769_v17, %v768_v39  ;;  %v4286_v40 = vpack.c.bf16 %v771_v12, %v770_v57  ;;  %v4290_v35 = vmul.f32 %v4215_v55, %v659_v38  ;;  %v4293_v63 = vmul.f32 %v4215_v55, %v661_v16 }
  0xf1   :  { %v4295_v14 = vpack.c.bf16 %v501_v47, %v500_v30  ;;  %v479_v18 = vunpack.c.h.bf16 %v54_v31  ;;  %v515_v44 = vpop.permute.xlu0 %514  ;;  %v4299_v39 = vpack.c.bf16 %v503_v27, %v502_v5  ;;  %v480_v17 = vunpack.c.l.bf16 %v55_v33  ;;  %v1266_v5 = vld [vmem:[%s5902_s2 + $0x10] sm:$0xff] }
  0xf2   :  { %1576 = vmatpush.bf16.msrb.mxu1 %v4136_v13  ;;  %v697_v6 = vpop.permute.xlu1 %696  ;;  %v1172_v13 = vunpack.c.l.b16 %v4284_v56  ;;  %v1174_v15 = vunpack.c.l.b16 %v4286_v40  ;;  %v529_v20 = vsel %vm528_vm6, %v4107_v4, %v515_v44  ;;  %v539_v57 = vsel %vm537_vm5, %v515_v44, 0  ;;  %1284 = vperm.xlu0 %3465, %v1266_v5   ;;  %v52_v5 = vld [vmem:[%s5900_s0 + $0x10] sm:$0xff] }
  0xf3   :  { %5931 = vst [vmem:[#allocation10_spill] sm:$0xff] %v4295_v14  ;;  %v713_v12 = vsel %vm712_vm7, %v697_v6, %v4161_v37  ;;  %v1060_v30 = vunpack.c.l.b16 %v4295_v14  ;;  %v562_v31 = vunpack.c.l.bf16 %v529_v20  ;;  %v563_v38 = vunpack.c.l.bf16 %v539_v57  ;;  %v1267_v37 = vld [vmem:[%s5902_s2 + $0x18] sm:$0xff] }
  0xf4   :  { %5932 = vst [vmem:[#allocation11_spill] sm:$0xff] %v4299_v39  ;;  %v564_v16 = vunpack.c.h.bf16 %v529_v20  ;;  %v565_v47 = vunpack.c.h.bf16 %v539_v57  ;;  %v746_v27 = vunpack.c.l.bf16 %v713_v12  ;;  %v748_v45 = vunpack.c.h.bf16 %v713_v12  ;;  %1289 = vperm.xlu1 %3463, %v1267_v37  }
  0xf5   :  { %v1186_v4 = vpack.c.b16 %v1174_v15, %v1172_v13  ;;  %v1062_v44 = vunpack.c.l.b16 %v4299_v39  ;;  %v580_v6 = vmul.f32 %v4053_v9, %v562_v31  ;;  %v581_v20 = vmul.f32 %v4055_v8, %v563_v38 }
  0xf6   :  { %1577 = vmatpush.bf16.msrb.mxu1 %v4145_v29  ;;  %v582_v29 = vmul.f32 %v4053_v9, %v564_v16  ;;  %v583_v57 = vmul.f32 %v4055_v8, %v565_v47  ;;  %v764_v11 = vmul.f32 %v4077_v10, %v746_v27  ;;  %v766_v13 = vmul.f32 %v4077_v10, %v748_v45 }
  0xf7   :  { %1514 = vmatpush.bf16.msra.mxu3 %v1186_v4  ;;  %v1070_v15 = vpack.c.b16 %v1062_v44, %v1060_v30  ;;  %v481_v12 = vunpack.c.h.bf16 %v55_v33  ;;  %v4324_v41 = vpack.c.bf16 %v581_v20, %v580_v6  ;;  %v496_v9 = vmul.f32 %v4249_v46, %v478_v34  ;;  %v53_v20 = vld [vmem:[%s5900_s0 + $0x18] sm:$0xff] }
  0xf8   :  { %v4326_v31 = vpack.c.bf16 %v583_v57, %v582_v29  ;;  %v497_v8 = vmul.f32 %v4251_v51, %v479_v18  ;;  %v4331_v38 = vpack.c.bf16 %v4189_v43, %v764_v11  ;;  %v4334_v10 = vpack.c.bf16 %v4192_v48, %v766_v13  ;;  %v1265_v29 = vld [vmem:[%s5902_s2 + $0x8] sm:$0xff] }
  0xf9   :  { %v498_v45 = vmul.f32 %v4249_v46, %v480_v17  ;;  %v499_v33 = vmul.f32 %v4251_v51, %v481_v12  ;;  %v617_v30 = vpop.permute.xlu0 %616  ;;  %v1088_v47 = vunpack.c.l.b16 %v4324_v41  ;;  %v474_v34 = vunpack.c.l.bf16 %v52_v5  ;;  %1279 = vperm.xlu2 %3464, %v1265_v29  }
  0xfa   :  { %5933 = vst [vmem:[#allocation12_spill] sm:$0xff] %v4331_v38  ;;  %v619_v16 = vpop.permute.xlu1 %618  ;;  %v1090_v27 = vunpack.c.l.b16 %v4326_v31  ;;  %v4340_v4 = vpack.c.bf16 %v497_v8, %v496_v9  ;;  %v1168_v48 = vunpack.c.l.b16 %v4331_v38  ;;  %v1170_v11 = vunpack.c.l.b16 %v4334_v10 }
  0xfb   :  { %5934 = vst [vmem:[#allocation13_spill] sm:$0xff] %v4334_v10  ;;  %v624_v18 = vsel %vm620_vm9, %v617_v30, %v619_v16  ;;  %v640_v43 = vsel %vm629_vm8, %v619_v16, 0  ;;  %v4352_v12 = vpack.c.bf16 %v499_v33, %v498_v45  ;;  %v475_v54 = vunpack.c.h.bf16 %v52_v5  ;;  %v830_v45 = vld [vmem:[#allocation1] sm:$0xff] }
  0xfc   :  { %5935 = vst [vmem:[#allocation14_spill] sm:$0xff] %v4340_v4  ;;  %v666_v17 = vunpack.c.l.bf16 %v624_v18  ;;  %v667_v44 = vunpack.c.l.bf16 %v640_v43  ;;  %v668_v37 = vunpack.c.h.bf16 %v624_v18  ;;  %v669_v6 = vunpack.c.h.bf16 %v640_v43 }
  0xfd   :  { %v1104_v57 = vpack.c.b16 %v1090_v27, %v1088_v47  ;;  %v1184_v13 = vpack.c.b16 %v1170_v11, %v1168_v48  ;;  %5936 = vst [vmem:[#allocation15_spill] sm:$0xff] %v4352_v12  ;;  %v1056_v9 = vunpack.c.l.b16 %v4340_v4  ;;  %v1058_v43 = vunpack.c.l.b16 %v4352_v12 }
  0xfe   :  { %v684_v8 = vmul.f32 %v4202_v25, %v666_v17  ;;  %v685_v30 = vmul.f32 %v4215_v55, %v667_v44  ;;  %v686_v16 = vmul.f32 %v4202_v25, %v668_v37  ;;  %v687_v18 = vmul.f32 %v4215_v55, %v669_v6 }
  0xff   :  { %1486 = vmatpush.bf16.msra.mxu2 %v1104_v57  ;;  %1515 = vmatpush.bf16.msra.mxu3 %v1184_v13  ;;  %v476_v47 = vunpack.c.l.bf16 %v53_v20  ;;  %v477_v27 = vunpack.c.h.bf16 %v53_v20  ;;  %v492_v11 = vmul.f32 %v4249_v46, %v474_v34  ;;  %v1068_v17 = vpack.c.b16 %v1058_v43, %v1056_v9 }
 0x100   :  { %v4360_v33 = vpack.c.bf16 %v685_v30, %v684_v8  ;;  %v4362_v48 = vpack.c.bf16 %v687_v18, %v686_v16  ;;  %v493_v44 = vmul.f32 %v4251_v51, %v475_v54  ;;  %v832_v13 = vpack.i.b16 %v830_v45, %v830_v45  ;;  %v831_v45 = vld [vmem:[#allocation1 + $0x9] sm:$0xff] }
 0x101   :  { %v494_v37 = vmul.f32 %v4249_v46, %v476_v47  ;;  %v495_v6 = vmul.f32 %v4251_v51, %v477_v27  ;;  %v615_v29 = vpop.permute.xlu0 %614  ;;  %vm3004_vm4 = vcmask 1041408   ;;  %vm3018_vm6 = vcmask 1043456  }
 0x102   :  { %v609_v57 = vpop.permute.xlu1 %608  ;;  %v1140_v5 = vunpack.c.l.b16 %v4360_v33  ;;  %v1142_v20 = vunpack.c.l.b16 %v4362_v48  ;;  %v623_v8 = vsel %vm620_vm9, %v4205_v1, %v615_v29  ;;  %v637_v34 = vsel %vm629_vm8, %v615_v29, 0  ;;  %v50_v1 = vld [vmem:[%s5900_s0] sm:$0xff] }
 0x103   :  { %1487 = vmatpush.bf16.msra.mxu2 %v1070_v15  ;;  %v622_v54 = vsel %vm620_vm9, %v609_v57, %v4265_v49  ;;  %v4375_v9 = vpack.c.bf16 %v493_v44, %v492_v11  ;;  %v662_v30 = vunpack.c.l.bf16 %v623_v8  ;;  %v663_v16 = vunpack.c.l.bf16 %v637_v34  ;;  %v4382_v15 = vpop.permute.xlu2 %604 }
 0x104   :  { %v664_v18 = vunpack.c.h.bf16 %v623_v8  ;;  %v665_v43 = vunpack.c.h.bf16 %v637_v34  ;;  %v658_v47 = vunpack.c.l.bf16 %v622_v54  ;;  %v660_v27 = vunpack.c.h.bf16 %v622_v54 }
 0x105   :  { %5937 = vst [vmem:[#allocation16_spill] sm:$0xff] %v4375_v9  ;;  %v1150_v12 = vpack.c.b16 %v1142_v20, %v1140_v5  ;;  %v4377_v4 = vpack.c.bf16 %v495_v6, %v494_v37  ;;  %v680_v49 = vmul.f32 %v4202_v25, %v662_v30  ;;  %v681_v11 = vmul.f32 %v4215_v55, %v663_v16  ;;  %v51_v37 = vld [vmem:[%s5900_s0 + $0x8] sm:$0xff] }
 0x106   :  { %v682_v44 = vmul.f32 %v4202_v25, %v664_v18  ;;  %v683_v29 = vmul.f32 %v4215_v55, %v665_v43  ;;  %v676_v6 = vmul.f32 %v4202_v25, %v658_v47  ;;  %v678_v57 = vmul.f32 %v4202_v25, %v660_v27  ;;  %v1269_v16 = vld [vmem:[%s5902_s2 + $0x28] sm:$0xff] }
 0x107   :  { %5938 = vst [vmem:[#allocation17_spill] sm:$0xff] %v4377_v4  ;;  %1488 = vmatpush.bf16.msra.mxu2 %v1068_v17  ;;  %1516 = vmatpush.bf16.msra.mxu3 %v1150_v12  ;;  %v1052_v5 = vunpack.c.l.b16 %v4375_v9  ;;  %v1054_v20 = vunpack.c.l.b16 %v4377_v4  ;;  %v834_v8 = vperm.slane %v832_v13, 0  ;;  %v835_v34 = vpack.i.b16 %v831_v45, %v831_v45 }
 0x108   :  { %v470_v54 = vunpack.c.l.bf16 %v50_v1  ;;  %v471_v30 = vunpack.c.h.bf16 %v50_v1  ;;  %v472_v43 = vunpack.c.l.bf16 %v51_v37  ;;  %v473_v39 = vunpack.c.h.bf16 %v51_v37  ;;  %1299 = vperm.xlu1 %3463, %v1269_v16  }
 0x109   :  { %v1066_v18 = vpack.c.b16 %v1054_v20, %v1052_v5  ;;  %v4398_v47 = vpack.c.bf16 %v681_v11, %v680_v49  ;;  %v801_v17 = vpop.permute.xlu0 %800  ;;  %v837_v12 = vperm.slane %v835_v34, 0  ;;  %v4400_v27 = vunpack.c.l.bf16 %v834_v8  ;;  %v3175_v34 = vld [vmem:[%s5901_s1 + $0x50] sm:$0xf] }
 0x10a   :  { %v803_v9 = vpop.permute.xlu1 %802  ;;  %v488_v13 = vmul.f32 %v4249_v46, %v470_v54  ;;  %v489_v45 = vmul.f32 %v4251_v51, %v471_v30  ;;  %v490_v5 = vmul.f32 %v4249_v46, %v472_v43  ;;  %v491_v49 = vmul.f32 %v4251_v51, %v473_v39  ;;  %v3441_v46 = vld [vmem:[%s5901_s1 + $0x60] sm:$0xf0]  ;;  %v3143_v51 = vld [vmem:[%s5901_s1 + $0x8] sm:$0xf]  ;;  %v3432_v39 = vld [vmem:[%s5901_s1 + $0x18] sm:$0xf0] }
 0x10b   :  { %1489 = vmatpush.bf16.msra.mxu2 %v1066_v18  ;;  %v808_v1 = vsel %vm804_vm10, %v801_v17, %v803_v9  ;;  %v824_v4 = vsel %vm813_vm11, %v803_v9, 0  ;;  %v4408_v11 = vunpack.c.l.bf16 %v837_v12  ;;  %v4417_v18 = vpack.c.bf16 %v683_v29, %v682_v44  ;;  %v3439_v29 = vld [vmem:[%s5901_s1 + $0x54] sm:$0xf]  ;;  %v3177_v17 = vld [vmem:[%s5901_s1 + $0x64] sm:$0xf0] }
 0x10c   :  { %v850_v37 = vunpack.c.l.bf16 %v808_v1  ;;  %v851_v20 = vunpack.c.l.bf16 %v824_v4  ;;  %v852_v8 = vunpack.c.h.bf16 %v808_v1  ;;  %v853_v54 = vunpack.c.h.bf16 %v824_v4 }
 0x10d   :  { %v4413_v30 = vpack.c.bf16 %v489_v45, %v488_v13  ;;  %v4415_v16 = vpack.c.bf16 %v491_v49, %v490_v5  ;;  %v1136_v44 = vunpack.c.l.b16 %v4398_v47  ;;  %v1138_v1 = vunpack.c.l.b16 %v4417_v18  ;;  %v799_v5 = vpop.permute.xlu2 %798 }
 0x10e   :  { %v868_v4 = vmul.f32 %v4400_v27, %v850_v37  ;;  %v869_v9 = vmul.f32 %v4408_v11, %v851_v20  ;;  %v870_v43 = vmul.f32 %v4400_v27, %v852_v8  ;;  %v871_v12 = vmul.f32 %v4408_v11, %v853_v54 }
 0x10f   :  { %5939 = vst [vmem:[#allocation18_spill] sm:$0xff] %v4413_v30  ;;  %v1048_v13 = vunpack.c.l.b16 %v4413_v30  ;;  %v1050_v45 = vunpack.c.l.b16 %v4415_v16  ;;  %v4442_v49 = vor.u32 %v3441_v46, %v3175_v34  ;;  %v4444_v37 = vor.u32 %v3432_v39, %v3143_v51 }
 0x110   :  { %5940 = vst [vmem:[#allocation19_spill] sm:$0xff] %v4415_v16  ;;  %v4447_v20 = vpack.c.bf16 %v4290_v35, %v676_v6  ;;  %v4450_v8 = vpack.c.bf16 %v4293_v63, %v678_v57  ;;  %v1148_v10 = vpack.c.b16 %v1138_v1, %v1136_v44  ;;  %v4452_v54 = vor.u32 %v3439_v29, %v3177_v17 }
 0x111   :  { %v1064_v14 = vpack.c.b16 %v1050_v45, %v1048_v13  ;;  %v878_v30 = vpack.c.bf16 %v869_v9, %v868_v4  ;;  %1443 = vmatmul.bf16.gmra.mxu0 %v4442_v49  ;;  %v607_v16 = vpop.permute.xlu0 %606  ;;  %v879_v46 = vpack.c.bf16 %v871_v12, %v870_v43  ;;  %v821_v35 = vsel %vm813_vm11, %v799_v5, 0 }
 0x112   :  { %v1132_v38 = vunpack.c.l.b16 %v4447_v20  ;;  %v1134_v34 = vunpack.c.l.b16 %v4450_v8  ;;  %v797_v51 = vpop.permute.xlu1 %796  ;;  %1517 = vmatpush.bf16.msra.mxu3 %v1148_v10  ;;  %v621_v63 = vsel %vm620_vm9, %v4382_v15, %v607_v16  ;;  %v631_v6 = vsel %vm629_vm8, %v607_v16, 0  ;;  %1472 = vmatmul.bf16.gmra.mxu1 %v4452_v54 }
 0x113   :  { %1490 = vmatpush.bf16.msra.mxu2 %v1064_v14  ;;  %v1220_v57 = vunpack.c.l.b16 %v878_v30  ;;  %v1221_v39 = vunpack.c.h.b16 %v878_v30  ;;  %v654_v4 = vunpack.c.l.bf16 %v621_v63  ;;  %v655_v9 = vunpack.c.l.bf16 %v631_v6 }
 0x114   :  { %v656_v44 = vunpack.c.h.bf16 %v621_v63  ;;  %v657_v29 = vunpack.c.h.bf16 %v631_v6  ;;  %v1146_v43 = vpack.c.b16 %v1134_v34, %v1132_v38  ;;  %v1222_v17 = vunpack.c.l.b16 %v879_v46  ;;  %v1271_v38 = vld [vmem:[%s5902_s2 + $0x38] sm:$0xff] }
 0x115   :  { %v1223_v12 = vunpack.c.h.b16 %v879_v46  ;;  %v807_v14 = vsel %vm804_vm10, %v797_v51, %v799_v5  ;;  %v672_v10 = vmul.f32 %v4202_v25, %v654_v4  ;;  %v673_v15 = vmul.f32 %v4215_v55, %v655_v9  ;;  %1309 = vperm.xlu0 %3465, %v1271_v38   ;;  %v1268_v38 = vld [vmem:[%s5902_s2 + $0x20] sm:$0xff] }
 0x116   :  { %1491 = vmatmul.bf16.vlgmr.msra.gmra.mxu2 %v4444_v37  ;;  %v674_v30 = vmul.f32 %v4202_v25, %v656_v44  ;;  %1518 = vmatpush.bf16.msra.mxu3 %v1146_v43  ;;  %v1230_v16 = vpack.c.b16 %v1222_v17, %v1220_v57  ;;  %v846_v45 = vunpack.c.l.bf16 %v807_v14  ;;  %v847_v1 = vunpack.c.l.bf16 %v821_v35  ;;  %v3163_v57 = vld [vmem:[%s5901_s1 + $0x30] sm:$0xf]  ;;  %v3430_v43 = vld [vmem:[%s5901_s1 + $0xc] sm:$0xf]  ;;  %v3145_v17 = vld [vmem:[%s5901_s1 + $0x1c] sm:$0xf0] }
 0x117   :  { %1599 = vmatpush.bf16.msrb.mxu2 %v3847_v52  ;;  %v675_v52 = vmul.f32 %v4215_v55, %v657_v29  ;;  %v1231_v13 = vpack.c.b16 %v1223_v12, %v1221_v39  ;;  %v848_v5 = vunpack.c.h.bf16 %v807_v14  ;;  %v849_v34 = vunpack.c.h.bf16 %v821_v35  ;;  %v3446_v35 = vld [vmem:[%s5901_s1 + $0x88] sm:$0xf0]  ;;  %v3437_v29 = vld [vmem:[%s5901_s1 + $0x40] sm:$0xf0]  ;;  %1294 = vperm.xlu2 %3464, %v1268_v38  }
 0x118   :  { %v4473_v46 = vpack.c.bf16 %v673_v15, %v672_v10  ;;  %v1183_v25 = vunpack.c.h.b16 %v4140_v3  ;;  %1545 = vmatpush.bf16.msrb.mxu0 %v1230_v16  ;;  %v864_v55 = vmul.f32 %v4400_v27, %v846_v45  ;;  %v1101_v63 = vunpack.c.h.b16 %v4130_v26  ;;  %v3433_v3 = vld [vmem:[%s5901_s1 + $0x20] sm:$0xf0] }
 0x119   :  { %v4475_v51 = vpack.c.bf16 %v675_v52, %v674_v30  ;;  %1690 = vmatpush.bf16.msra.mxu1 %v1231_v13  ;;  %v1103_v6 = vunpack.c.h.b16 %v4132_v23  ;;  %v865_v39 = vmul.f32 %v4408_v11, %v847_v1  ;;  %v866_v4 = vmul.f32 %v4400_v27, %v848_v5  ;;  %v793_v9 = vpop.permute.xlu0 %792  ;;  %v3444_v30 = vld [vmem:[%s5901_s1 + $0x7c] sm:$0xf]  ;;  %v3197_v52 = vld [vmem:[%s5901_s1 + $0x8c] sm:$0xf0] }
 0x11a   :  { %v1128_v26 = vunpack.c.l.b16 %v4473_v46  ;;  %v795_v44 = vpop.permute.xlu1 %794  ;;  %v867_v12 = vmul.f32 %v4408_v11, %v849_v34  ;;  %vm3051_vm7 = vcmask 64512  }
 0x11b   :  { %1600 = vmatpush.bf16.msrb.mxu2 %v3870_v61  ;;  %v3195_v61 = vld [vmem:[%s5901_s1 + $0x78] sm:$0xf]  ;;  %v1130_v23 = vunpack.c.l.b16 %v4475_v51  ;;  %v806_v14 = vsel %vm804_vm10, %v793_v9, %v795_v44  ;;  %v818_v10 = vsel %vm813_vm11, %v795_v44, 0  ;;  %v1111_v15 = vpack.c.b16 %v1103_v6, %v1101_v63 }
 0x11c   :  { %v842_v13 = vunpack.c.l.bf16 %v806_v14  ;;  %v843_v45 = vunpack.c.l.bf16 %v818_v10  ;;  %v844_v1 = vunpack.c.h.bf16 %v806_v14  ;;  %v845_v5 = vunpack.c.h.bf16 %v818_v10 }
 0x11d   :  { %v1144_v16 = vpack.c.b16 %v1130_v23, %v1128_v26  ;;  %v4516_v34 = vor.u32 %v3446_v35, %v3195_v61  ;;  %v4518_v63 = vor.u32 %v3437_v29, %v3163_v57  ;;  %v4520_v6 = vor.u32 %v3430_v43, %v3145_v17  ;;  %v789_v43 = vpop.permute.xlu2 %788 }
 0x11e   :  { %v860_v9 = vmul.f32 %v4400_v27, %v842_v13  ;;  %v862_v26 = vmul.f32 %v4400_v27, %v844_v1  ;;  %v4525_v23 = vor.u32 %v3444_v30, %v3197_v52  ;;  %v977_v44 = vunpack.c.h.b16 %v3992_v58 }
 0x11f   :  { %1601 = vmatpush.bf16.msrb.mxu2 %v3886_v2  ;;  %1519 = vmatpush.bf16.msra.mxu3 %v1144_v16  ;;  %v861_v2 = vmul.f32 %v4408_v11, %v843_v45  ;;  %v979_v61 = vunpack.c.h.b16 %v3994_v24  ;;  %v1097_v35 = vunpack.c.h.b16 %v4180_v59  ;;  %v1099_v57 = vunpack.c.h.b16 %v4182_v60 }
 0x120   :  { %v863_v29 = vmul.f32 %v4408_v11, %v845_v5  ;;  %v876_v17 = vpack.c.bf16 %v865_v39, %v864_v55  ;;  %v877_v14 = vpack.c.bf16 %v867_v12, %v866_v4  ;;  %v973_v10 = vunpack.c.h.b16 %v4043_v21 }
 0x121   :  { %v975_v58 = vunpack.c.h.b16 %v4045_v42  ;;  %v1093_v24 = vunpack.c.h.b16 %v4244_v7  ;;  %v1095_v59 = vunpack.c.h.b16 %v4247_v36  ;;  %1448 = vmatmul.bf16.gmra.mxu0 %v4516_v34  ;;  %v791_v60 = vpop.permute.xlu0 %790  ;;  %v989_v39 = vpack.c.b16 %v979_v61, %v977_v44 }
 0x122   :  { %1520 = vmatmul.bf16.vlgmr.msra.gmra.mxu3 %v4520_v6  ;;  %v1218_v30 = vunpack.c.l.b16 %v877_v14  ;;  %v1217_v52 = vunpack.c.h.b16 %v876_v17  ;;  %v1219_v16 = vunpack.c.h.b16 %v877_v14  ;;  %v805_v55 = vsel %vm804_vm10, %v789_v43, %v791_v60  ;;  %1477 = vmatmul.bf16.gmra.mxu1 %v4525_v23 }
 0x123   :  { %1628 = vmatpush.bf16.msrb.mxu3 %v1111_v15  ;;  %1602 = vmatpush.bf16.msrb.mxu2 %v3970_v32  ;;  %v1109_v15 = vpack.c.b16 %v1099_v57, %v1097_v35  ;;  %v1216_v32 = vunpack.c.l.b16 %v876_v17  ;;  %v815_v21 = vsel %vm813_vm11, %v791_v60, 0  ;;  %v1107_v4 = vpack.c.b16 %v1095_v59, %v1093_v24 }
 0x124   :  { %v838_v42 = vunpack.c.l.bf16 %v805_v55  ;;  %v839_v7 = vunpack.c.l.bf16 %v815_v21  ;;  %v840_v12 = vunpack.c.h.bf16 %v805_v55  ;;  %v841_v36 = vunpack.c.h.bf16 %v815_v21 }
 0x125   :  { %v1228_v13 = vpack.c.b16 %v1218_v30, %v1216_v32  ;;  %v1229_v45 = vpack.c.b16 %v1219_v16, %v1217_v52  ;;  %v874_v1 = vpack.c.bf16 %v861_v2, %v860_v9  ;;  %v875_v38 = vpack.c.bf16 %v863_v29, %v862_v26  ;;  %v1270_v30 = vld [vmem:[%s5902_s2 + $0x30] sm:$0xff]  ;;  %s3512_s2 = smov 2  }
 0x126   :  { %1496 = vmatmul.bf16.gmra.mxu2 %v4518_v63  ;;  %v856_v5 = vmul.f32 %v4400_v27, %v838_v42  ;;  %v857_v44 = vmul.f32 %v4408_v11, %v839_v7  ;;  %v858_v61 = vmul.f32 %v4400_v27, %v840_v12  ;;  %v969_v43 = vunpack.c.h.b16 %v4083_v53  ;;  %v3435_v53 = vld [vmem:[%s5901_s1 + $0x34] sm:$0xf]  ;;  %1304 = vperm.xlu2 %3464, %v1270_v30   ;;  %v3183_v12 = vld [vmem:[%s5901_s1 + $0x58] sm:$0xf]  ;;  %v3203_v30 = vld [vmem:[%s5901_s1 + $0x80] sm:$0xf] }
 0x127   :  { %1629 = vmatpush.bf16.msrb.mxu3 %v1109_v15  ;;  %1603 = vmatpush.bf16.msrb.mxu2 %v4023_v19  ;;  %v859_v19 = vmul.f32 %v4408_v11, %v841_v36  ;;  %v1212_v35 = vunpack.c.l.b16 %v874_v1  ;;  %v1214_v57 = vunpack.c.l.b16 %v875_v38  ;;  %v971_v17 = vunpack.c.h.b16 %v4085_v0 }
 0x128   :  { %1546 = vmatpush.bf16.msrb.mxu0 %v1228_v13  ;;  %1691 = vmatpush.bf16.msra.mxu1 %v1229_v45  ;;  %v1089_v9 = vunpack.c.h.b16 %v4324_v41  ;;  %v1091_v2 = vunpack.c.h.b16 %v4326_v31  ;;  %v872_v26 = vpack.c.bf16 %v857_v44, %v856_v5  ;;  %v987_v14 = vpack.c.b16 %v975_v58, %v973_v10  ;;  %v3165_v41 = vld [vmem:[%s5901_s1 + $0x44] sm:$0xf0] }
 0x129   :  { %v873_v29 = vpack.c.bf16 %v859_v19, %v858_v61  ;;  %v1226_v27 = vpack.c.b16 %v1214_v57, %v1212_v35  ;;  %v5941_v11 = vunpack.c.h.b16 %v4138_v50  ;;  %v1213_v24 = vunpack.c.h.b16 %v874_v1  ;;  %v3151_v50 = vld [vmem:[%s5901_s1 + $0x10] sm:$0xf]  ;;  %v5944_v57 = vld [vmem:[#allocation10_spill] sm:$0xff] }
 0x12a   :  { %v1105_v0 = vpack.c.b16 %v1091_v2, %v1089_v9  ;;  %v1208_v31 = vunpack.c.l.b16 %v872_v26  ;;  %v1215_v60 = vunpack.c.h.b16 %v875_v38  ;;  %v985_v10 = vpack.c.b16 %v971_v17, %v969_v43  ;;  %v5945_v17 = vld [vmem:[#allocation11_spill] sm:$0xff]  ;;  %v5946_v2 = vld [vmem:[#allocation14_spill] sm:$0xff] }
 0x12b   :  { %1604 = vmatpush.bf16.msrb.mxu2 %v989_v39  ;;  %1630 = vmatpush.bf16.msrb.mxu3 %v1107_v4  ;;  %v1191_v15 = vpack.c.b16 %v1183_v25, %v5941_v11  ;;  %v1210_v59 = vunpack.c.l.b16 %v873_v29  ;;  %v4568_v32 = vor.u32 %v3435_v53, %v3165_v41  ;;  %v1173_v52 = vunpack.c.h.b16 %v4284_v56  ;;  %v3442_v56 = vld [vmem:[%s5901_s1 + $0x68] sm:$0xf0]  ;;  %v5949_v53 = vld [vmem:[#allocation17_spill] sm:$0xff] }
 0x12c   :  { %1547 = vmatpush.bf16.msrb.mxu0 %v1226_v27  ;;  %v1227_v58 = vpack.c.b16 %v1215_v60, %v1213_v24  ;;  %v1175_v16 = vunpack.c.h.b16 %v4286_v40  ;;  %v1209_v55 = vunpack.c.h.b16 %v872_v26  ;;  %v1211_v21 = vunpack.c.h.b16 %v873_v29  ;;  %v5947_v26 = vld [vmem:[#allocation15_spill] sm:$0xff] }
 0x12d   :  { %v1224_v25 = vpack.c.b16 %v1210_v59, %v1208_v31  ;;  %v4575_v39 = vor.u32 %v3433_v3, %v3151_v50  ;;  %v1177_v4 = vunpack.c.h.b16 %v4237_v62  ;;  %v1179_v42 = vunpack.c.h.b16 %v4239_v28  ;;  %v3185_v27 = vld [vmem:[%s5901_s1 + $0x6c] sm:$0xf0]  ;;  %v3438_v31 = vld [vmem:[%s5901_s1 + $0x48] sm:$0xf0]  ;;  %v5950_v50 = vld [vmem:[#allocation18_spill] sm:$0xff] }
 0x12e   :  { %1692 = vmatpush.bf16.msra.mxu1 %v1227_v58  ;;  %v1141_v7 = vunpack.c.h.b16 %v4360_v33  ;;  %v1187_v40 = vpack.c.b16 %v1175_v16, %v1173_v52  ;;  %v1225_v36 = vpack.c.b16 %v1211_v21, %v1209_v55  ;;  %v1143_v13 = vunpack.c.h.b16 %v4362_v48  ;;  %v3447_v52 = vld [vmem:[%s5901_s1 + $0x90] sm:$0xf0] }
 0x12f   :  { %1605 = vmatpush.bf16.msrb.mxu2 %v987_v14  ;;  %1631 = vmatpush.bf16.msrb.mxu3 %v1105_v0  ;;  %v1137_v62 = vunpack.c.h.b16 %v4398_v47  ;;  %v1139_v33 = vunpack.c.h.b16 %v4417_v18  ;;  %v1133_v45 = vunpack.c.h.b16 %v4447_v20  ;;  %v1135_v1 = vunpack.c.h.b16 %v4450_v8  ;;  %v5942_v20 = vld [vmem:[#allocation12_spill] sm:$0xff]  ;;  %v5943_v8 = vld [vmem:[#allocation13_spill] sm:$0xff] }
 0x130   :  { %1548 = vmatpush.bf16.msrb.mxu0 %v1224_v25  ;;  %v1151_v28 = vpack.c.b16 %v1143_v13, %v1141_v7  ;;  %v4592_v38 = vor.u32 %v3442_v56, %v3183_v12  ;;  %v1189_v5 = vpack.c.b16 %v1179_v42, %v1177_v4  ;;  %v1129_v48 = vunpack.c.h.b16 %v4473_v46  ;;  %v3171_v0 = vld [vmem:[%s5901_s1 + $0x38] sm:$0xf]  ;;  %v5951_v25 = vld [vmem:[#allocation19_spill] sm:$0xff]  ;;  %v3445_v4 = vld [vmem:[%s5901_s1 + $0x84] sm:$0xf] }
 0x131   :  { %v1131_v47 = vunpack.c.h.b16 %v4475_v51  ;;  %v1149_v44 = vpack.c.b16 %v1139_v33, %v1137_v62  ;;  %v1147_v61 = vpack.c.b16 %v1135_v1, %v1133_v45  ;;  %v1169_v19 = vunpack.c.h.b16 %v5942_v20  ;;  %v5952_v21 = vld [vmem:[#allocation8_spill] sm:$0xff]  ;;  %v3191_v7 = vld [vmem:[%s5901_s1 + $0x60] sm:$0xf]  ;;  %v3211_v13 = vld [vmem:[%s5901_s1 + $0x88] sm:$0xf] }
 0x132   :  { %1525 = vmatmul.bf16.gmra.mxu3 %v4568_v32  ;;  %1693 = vmatpush.bf16.msra.mxu1 %v1225_v36  ;;  %v1171_v35 = vunpack.c.h.b16 %v5943_v8  ;;  %v1061_v43 = vunpack.c.h.b16 %v5944_v57  ;;  %v1063_v9 = vunpack.c.h.b16 %v5945_v17  ;;  %v1057_v46 = vunpack.c.h.b16 %v5946_v2  ;;  %v3205_v42 = vld [vmem:[%s5901_s1 + $0x94] sm:$0xf0]  ;;  %v3443_v12 = vld [vmem:[%s5901_s1 + $0x70] sm:$0xf0]  ;;  %v5953_v36 = vld [vmem:[#allocation7_spill] sm:$0xff] }
 0x133   :  { %1606 = vmatpush.bf16.msrb.mxu2 %v985_v10  ;;  %3213 = vmatmul.msk.bf16.vlgmr.msrb.gmra.mxu0 %vm1412_vm12, %v4575_v39  ;;  %v1145_v18 = vpack.c.b16 %v1131_v47, %v1129_v48  ;;  %v1059_v51 = vunpack.c.h.b16 %v5947_v26  ;;  %v1055_v41 = vunpack.c.h.b16 %v5949_v53  ;;  %v4622_v60 = vor.u32 %v3438_v31, %v3171_v0  ;;  %v3448_v62 = vld [vmem:[%s5901_s1 + $0x98] sm:$0xf0]  ;;  %v1744_v48 = vld [vmem:[%s5904_s4 + $0x68] sm:$0xff]  ;;  %v3240_v20 = vld [vmem:[%s5904_s4 + $0x120] sm:$0xff] }
 0x134   :  { %1657 = vmatpush.bf16.msra.mxu0 %v1191_v15  ;;  %1578 = vmatmul.bf16.vlgmr.msrb.gmra.mxu1 %v4071_v22  ;;  %v1071_v29 = vpack.c.b16 %v1063_v9, %v1061_v43  ;;  %v1185_v14 = vpack.c.b16 %v1171_v35, %v1169_v19  ;;  %v3440_v22 = vld [vmem:[%s5901_s1 + $0x5c] sm:$0xf]  ;;  %v5948_v15 = vld [vmem:[#allocation16_spill] sm:$0xff]  ;;  %v1049_v3 = vunpack.c.h.b16 %v5950_v50  ;;  %v1051_v58 = vunpack.c.h.b16 %v5951_v25  ;;  %v1739_v57 = vld [vmem:[%s5904_s4 + $0x40] sm:$0xff] }
 0x135   :  { %v1069_v11 = vpack.c.b16 %v1059_v51, %v1057_v46  ;;  %v1053_v24 = vunpack.c.h.b16 %v5948_v15  ;;  %v4620_v59 = vor.u32 %v3440_v22, %v3185_v27  ;;  %v4633_v16 = vor.u32 %v3447_v52, %v3203_v30  ;;  %v1741_v19 = vld [vmem:[%s5904_s4 + $0x50] sm:$0xff]  ;;  %v3237_v17 = vld [vmem:[%s5904_s4 + $0x108] sm:$0xff]  ;;  %v3236_v9 = vld [vmem:[%s5904_s4 + $0x100] sm:$0xff] }
 0x136   :  { %1501 = vmatmul.bf16.gmra.mxu2 %v4592_v38  ;;  %1632 = vmatpush.bf16.msrb.mxu3 %v1071_v29  ;;  %v1065_v55 = vpack.c.b16 %v1051_v58, %v1049_v3  ;;  %v4651_v56 = vor.u32 %v3445_v4, %v3205_v42  ;;  %v3238_v35 = vld [vmem:[%s5904_s4 + $0x110] sm:$0xff]  ;;  %v3235_v46 = vld [vmem:[%s5904_s4 + $0xf8] sm:$0xff]  ;;  %v1736_v26 = vld [vmem:[%s5904_s4 + $0x28] sm:$0xff] }
 0x137   :  { %v1067_v10 = vpack.c.b16 %v1055_v41, %v1053_v24  ;;  %v1737_v2 = vld [vmem:[%s5904_s4 + $0x30] sm:$0xff]  ;;  %v3233_v22 = vld [vmem:[%s5904_s4 + $0xe8] sm:$0xff]  ;;  %v3232_v15 = vld [vmem:[%s5904_s4 + $0xe0] sm:$0xff] }
 0x138   :  { %1658 = vmatpush.bf16.msra.mxu0 %v1189_v5  ;;  %v3234_v51 = vld [vmem:[%s5904_s4 + $0xf0] sm:$0xff]  ;;  %v3231_v53 = vld [vmem:[%s5904_s4 + $0xd8] sm:$0xff]  ;;  %v1732_v41 = vld [vmem:[%s5904_s4 + $0x8] sm:$0xff] }
 0x139   :  { %v1733_v24 = vld [vmem:[%s5904_s4 + $0x10] sm:$0xff] }
 0x13a   :  { %1633 = vmatpush.bf16.msrb.mxu3 %v1069_v11  ;;  %v1734_v11 = vld [vmem:[%s5904_s4 + $0x18] sm:$0xff]  ;;  %v3230_v0 = vld [vmem:[%s5904_s4 + $0xd0] sm:$0xff] }
 0x13c   :  { %1659 = vmatpush.bf16.msra.mxu0 %v1187_v40  ;;  %v4653_v40 = vor.u32 %v3443_v12, %v3191_v7 }
 0x13e   :  { %1634 = vmatpush.bf16.msrb.mxu3 %v1067_v10 }
 0x140   :  { %1660 = vmatpush.bf16.msra.mxu0 %v1185_v14  ;;  %v1735_v14 = vld [vmem:[%s5904_s4 + $0x20] sm:$0xff] }
 0x142   :  { %1530 = vmatmul.bf16.gmra.mxu3 %v4620_v59 }
 0x143   :  { %3214 = vmatmul.msk.bf16.gmra.mxu0 %vm1412_vm12, %v4622_v60  ;;  %1635 = vmatpush.bf16.msrb.mxu3 %v1065_v55 }
 0x144   :  { %1661 = vmatpush.bf16.msra.mxu0 %v1151_v28  ;;  %1583 = vmatmul.bf16.gmra.mxu1 %v5952_v21  ;;  %v4666_v28 = vor.u32 %v3448_v62, %v3211_v13 }
 0x146   :  { %1506 = vmatmul.bf16.gmra.mxu2 %v4633_v16 }
 0x148   :  { %1662 = vmatpush.bf16.msra.mxu0 %v1149_v44  ;;  %v1743_v44 = vld [vmem:[%s5904_s4 + $0x60] sm:$0xff] }
 0x14c   :  { %1663 = vmatpush.bf16.msra.mxu0 %v1147_v61  ;;  %v3241_v61 = vld [vmem:[%s5904_s4 + $0x128] sm:$0xff] }
 0x14e   :  { %v4673_v33 = vpop.f32.mrf.mxu0 }
 0x150   :  { %1664 = vmatpush.bf16.msra.mxu0 %v1145_v18  ;;  %v1742_v18 = vld [vmem:[%s5904_s4 + $0x58] sm:$0xff] }
 0x152   :  { %1535 = vmatmul.bf16.gmra.mxu3 %v4651_v56 }
 0x153   :  { %3215 = vmatmul.msk.bf16.gmra.mxu0 %vm1412_vm12, %v4653_v40  ;;  %v4823_v7 = vpop.permute.xlu2 %1279 }
 0x154   :  { %1588 = vmatmul.bf16.gmra.mxu1 %v4442_v49  ;;  %v5954_v49 = vld [vmem:[#allocation9_spill] sm:$0xff] }
 0x156   :  { %1607 = vmatmul.bf16.vlgmr.msrb.gmra.mxu2 %v5953_v36  ;;  %v4675_v45 = vpop.f32.mrf.mxu1  ;;  %v4678_v1 = vpop.f32.mrf.mxu0 }
 0x15d   :  { %v4812_v30 = vpop.permute.xlu1 %1274 }
 0x15e   :  { %v4681_v5 = vpop.f32.mrf.mxu1 }
 0x162   :  { %1636 = vmatmul.bf16.vlgmr.msrb.gmra.mxu3 %v4444_v37  ;;  %v1746_v37 = vld [vmem:[%s5904_s4 + $0x78] sm:$0xff] }
 0x163   :  { %3216 = vmatmul.msk.bf16.gmra.mxu0 %vm1412_vm12, %v4666_v28  ;;  %1781 = vmatpush.msra.mxu2 %v1746_v37 }
 0x164   :  { %1593 = vmatmul.bf16.gmra.mxu1 %v4516_v34  ;;  %v3244_v34 = vld [vmem:[%s5904_s4 + $0x140] sm:$0xff] }
 0x165   :  { %1889 = vmatpush.msrb.mxu0 %v3244_v34  ;;  %v4832_v34 = vpop.permute.xlu0 %1284 }
 0x166   :  { %1612 = vmatmul.bf16.gmra.mxu2 %v5954_v49 }
 0x169   :  { %v4706_v47 = vpop.f32.mrf.mxu1 }
 0x171   :  { %v4742_v43 = vpop.f32.mrf.mxu1 }
 0x172   :  { %1641 = vmatmul.bf16.gmra.mxu3 %v4518_v63  ;;  %v1745_v63 = vld [vmem:[%s5904_s4 + $0x70] sm:$0xff] }
 0x173   :  { %1665 = vmatmul.bf16.vlgmr.msra.gmra.mxu0 %v4520_v6  ;;  %v4695_v6 = vpop.f32.mrf.mxu0  ;;  %1782 = vmatpush.msra.mxu2 %v1745_v63 }
 0x174   :  { %3217 = vmatmul.msk.bf16.vlgmr.msra.gmra.mxu1 %vm1412_vm12, %v4575_v39  ;;  %v3242_v39 = vld [vmem:[%s5904_s4 + $0x130] sm:$0xff] }
 0x175   :  { %1783 = vmatpush.msra.mxu2 %v1744_v48 }
 0x176   :  { %1617 = vmatmul.bf16.gmra.mxu2 %v4452_v54  ;;  %v3243_v54 = vld [vmem:[%s5904_s4 + $0x138] sm:$0xff] }
 0x177   :  { %1890 = vmatpush.msrb.mxu0 %v3243_v54  ;;  %1784 = vmatpush.msra.mxu2 %v1743_v44 }
 0x179   :  { %1891 = vmatpush.msrb.mxu0 %v3242_v39  ;;  %1785 = vmatpush.msra.mxu2 %v1742_v18 }
 0x17b   :  { %1892 = vmatpush.msrb.mxu0 %v3241_v61  ;;  %v4733_v8 = vpop.f32.mrf.mxu0  ;;  %1786 = vmatpush.msra.mxu2 %v1741_v19  ;;  %v3310_v19 = vld [vmem:[%s5904_s4 + $0x2d0] sm:$0xff] }
 0x17d   :  { %1893 = vmatpush.msrb.mxu0 %v3240_v20  ;;  %v3277_v20 = vld [vmem:[%s5904_s4 + $0x208] sm:$0xff] }
 0x182   :  { %1646 = vmatmul.bf16.gmra.mxu3 %v4592_v38  ;;  %v1740_v38 = vld [vmem:[%s5904_s4 + $0x48] sm:$0xff] }
 0x183   :  { %1670 = vmatmul.bf16.gmra.mxu0 %v4568_v32  ;;  %v3239_v32 = vld [vmem:[%s5904_s4 + $0x118] sm:$0xff]  ;;  %1787 = vmatpush.msra.mxu2 %v1740_v38 }
 0x184   :  { %3218 = vmatmul.msk.bf16.gmra.mxu1 %vm1412_vm12, %v4622_v60  ;;  %1894 = vmatpush.msrb.mxu0 %v3239_v32  ;;  %v3229_v60 = vld [vmem:[%s5904_s4 + $0xc8] sm:$0xff]  ;;  %v4854_v32 = vpop.permute.xlu1 %1289 }
 0x185   :  { %1788 = vmatpush.msra.mxu2 %v1739_v57  ;;  %v3275_v57 = vld [vmem:[%s5904_s4 + $0x1f8] sm:$0xff] }
 0x186   :  { %1622 = vmatmul.bf16.gmra.mxu2 %v4525_v23  ;;  %1895 = vmatpush.msrb.mxu0 %v3238_v35  ;;  %v1738_v23 = vld [vmem:[%s5904_s4 + $0x38] sm:$0xff] }
 0x187   :  { %1789 = vmatpush.msra.mxu2 %v1738_v23  ;;  %v1755_v23 = vld [vmem:[%s5904_s4 + $0xc0] sm:$0xff] }
 0x188   :  { %1896 = vmatpush.msrb.mxu0 %v3237_v17  ;;  %v3308_v17 = vld [vmem:[%s5904_s4 + $0x2c0] sm:$0xff]  ;;  %1829 = vmatpush.msra.mxu3 %v1755_v23  ;;  %v3299_v23 = vld [vmem:[%s5904_s4 + $0x278] sm:$0xff] }
 0x189   :  { %1790 = vmatpush.msra.mxu2 %v1737_v2 }
 0x18a   :  { %1897 = vmatpush.msrb.mxu0 %v3236_v9  ;;  %v1442_v9 = vadd.f32 %v4733_v8, %v4854_v32 }
 0x18b   :  { %1791 = vmatpush.msra.mxu2 %v1736_v26  ;;  %v3307_v26 = vld [vmem:[%s5904_s4 + $0x2b8] sm:$0xff] }
 0x18c   :  { %1898 = vmatpush.msrb.mxu0 %v3235_v46  ;;  %v3274_v46 = vld [vmem:[%s5904_s4 + $0x1f0] sm:$0xff]  ;;  %v1471_v8 = vadd.f32 %v4742_v43, %v1442_v9  ;;  %v3305_v43 = vld [vmem:[%s5904_s4 + $0x2a8] sm:$0xff] }
 0x18d   :  { %1792 = vmatpush.msra.mxu2 %v1735_v14 }
 0x18e   :  { %v4765_v29 = vpop.f32.mrf.mxu0  ;;  %1899 = vmatpush.msrb.mxu0 %v3234_v51 }
 0x18f   :  { %v4773_v27 = vpop.f32.mrf.mxu1  ;;  %1793 = vmatpush.msra.mxu2 %v1734_v11 }
 0x190   :  { %1900 = vmatpush.msrb.mxu0 %v3233_v22 }
 0x191   :  { %1794 = vmatpush.msra.mxu2 %v1733_v24  ;;  %v3273_v24 = vld [vmem:[%s5904_s4 + $0x1e8] sm:$0xff] }
 0x192   :  { %1651 = vmatmul.bf16.gmra.mxu3 %v4633_v16  ;;  %1901 = vmatpush.msrb.mxu0 %v3232_v15  ;;  %v1435_v16 = vadd.f32 %v4673_v33, %v4812_v30 }
 0x193   :  { %1675 = vmatmul.bf16.gmra.mxu0 %v4620_v59  ;;  %v1731_v59 = vld [vmem:[%s5904_s4] sm:$0xff]  ;;  %1795 = vmatpush.msra.mxu2 %v1732_v41 }
 0x194   :  { %3219 = vmatmul.msk.bf16.gmra.mxu1 %vm1412_vm12, %v4653_v40  ;;  %1902 = vmatpush.msrb.mxu0 %v3231_v53  ;;  %v1464_v42 = vadd.f32 %v4675_v45, %v1435_v16  ;;  %v1437_v40 = vadd.f32 %v4678_v1, %v4823_v7  ;;  %v1440_v1 = vadd.f32 %v4695_v6, %v4832_v34  ;;  %v3276_v6 = vld [vmem:[%s5904_s4 + $0x200] sm:$0xff]  ;;  %v3306_v53 = vld [vmem:[%s5904_s4 + $0x2b0] sm:$0xff]  ;;  %v3253_v16 = vld [vmem:[%s5904_s4 + $0x188] sm:$0xff] }
 0x195   :  { %1796 = vmatpush.msra.mxu2 %v1731_v59  ;;  %v3272_v41 = vld [vmem:[%s5904_s4 + $0x1e0] sm:$0xff]  ;;  %v3271_v59 = vld [vmem:[%s5904_s4 + $0x1d8] sm:$0xff]  ;;  %1937 = vmatpush.msrb.mxu1 %v3253_v16 }
 0x196   :  { %v4797_v31 = vpop.f32.mrf.mxu0  ;;  %1903 = vmatpush.msrb.mxu0 %v3230_v0  ;;  %v1466_v33 = vadd.f32 %v4681_v5, %v1437_v40  ;;  %v1469_v5 = vadd.f32 %v4706_v47, %v1440_v1  ;;  %v3309_v47 = vld [vmem:[%s5904_s4 + $0x2c8] sm:$0xff]  ;;  %v4894_v0 = vpop.permute.xlu2 %1294 }
 0x197   :  { %v4805_v50 = vpop.f32.mrf.mxu1  ;;  %2005 = vmatpush.msrb.mxu2 %v3277_v20  ;;  %v4937_v1 = vpop.permute.xlu1 %1299  ;;  %v3251_v20 = vld [vmem:[%s5904_s4 + $0x178] sm:$0xff] }
 0x198   :  { %1904 = vmatpush.msrb.mxu0 %v3229_v60 }
 0x199   :  { %v1492_v10 = vpop.f32.mrf.mxu2  ;;  %2006 = vmatpush.msrb.mxu2 %v3276_v6  ;;  %v3300_v6 = vld [vmem:[%s5904_s4 + $0x280] sm:$0xff] }
 0x19a   :  { %v1493_v12 = vadd.f32 %v1492_v10, %v1464_v42  ;;  %2121 = vmatpush.msra.mxu0 %v3310_v19  ;;  %v3267_v19 = vld [vmem:[%s5904_s4 + $0x1b8] sm:$0xff] }
 0x19b   :  { %2007 = vmatpush.msrb.mxu2 %v3275_v57  ;;  %v3266_v57 = vld [vmem:[%s5904_s4 + $0x1b0] sm:$0xff] }
 0x19c   :  { %2122 = vmatpush.msra.mxu0 %v3309_v47  ;;  %v1447_v47 = vadd.f32 %v4797_v31, %v4937_v1 }
 0x19d   :  { %2008 = vmatpush.msrb.mxu2 %v3274_v46 }
 0x19e   :  { %v4807_v3 = vpop.f32.mrf.mxu0  ;;  %2123 = vmatpush.msra.mxu0 %v3308_v17  ;;  %v1476_v46 = vadd.f32 %v4805_v50, %v1447_v47  ;;  %v3298_v50 = vld [vmem:[%s5904_s4 + $0x270] sm:$0xff] }
 0x19f   :  { %v4809_v58 = vpop.f32.mrf.mxu1  ;;  %2009 = vmatpush.msrb.mxu2 %v3273_v24  ;;  %v4990_v24 = vpop.permute.xlu2 %1304 }
 0x1a0   :  { %2124 = vmatpush.msra.mxu0 %v3307_v26 }
 0x1a1   :  { %v1494_v25 = vpop.f32.mrf.mxu2  ;;  %2010 = vmatpush.msrb.mxu2 %v3272_v41  ;;  %v3248_v41 = vld [vmem:[%s5904_s4 + $0x160] sm:$0xff] }
 0x1a2   :  { %v1495_v45 = vadd.f32 %v1494_v25, %v1466_v33  ;;  %2125 = vmatpush.msra.mxu0 %v3306_v53  ;;  %v3304_v25 = vld [vmem:[%s5904_s4 + $0x2a0] sm:$0xff]  ;;  %v3269_v33 = vld [vmem:[%s5904_s4 + $0x1c8] sm:$0xff]  ;;  %v1750_v53 = vld [vmem:[%s5904_s4 + $0x98] sm:$0xff] }
 0x1a3   :  { %1680 = vmatmul.bf16.gmra.mxu0 %v4651_v56  ;;  %2011 = vmatpush.msrb.mxu2 %v3271_v59 }
 0x1a4   :  { %3220 = vmatmul.msk.bf16.gmra.mxu1 %vm1412_vm12, %v4666_v28  ;;  %2126 = vmatpush.msra.mxu0 %v3305_v43 }
 0x1a5   :  { %v1521_v52 = vpop.f32.mrf.mxu3 }
 0x1a6   :  { %v4818_v55 = vpop.f32.mrf.mxu0  ;;  %v1522_v36 = vadd.f32 %v1521_v52, %v1493_v12  ;;  %v1754_v52 = vld [vmem:[%s5904_s4 + $0xb8] sm:$0xff]  ;;  %v3270_v12 = vld [vmem:[%s5904_s4 + $0x1d0] sm:$0xff]  ;;  %2127 = vmatpush.msra.mxu0 %v3304_v25 }
 0x1a7   :  { %v4820_v4 = vpop.f32.mrf.mxu1  ;;  %1830 = vmatpush.msra.mxu3 %v1754_v52  ;;  %2012 = vmatpush.msrb.mxu2 %v3270_v12  ;;  %v1749_v25 = vld [vmem:[%s5904_s4 + $0x90] sm:$0xff]  ;;  %v1450_v52 = vadd.f32 %v4807_v3, %v4990_v24 }
 0x1a8   :  { %v3246_v3 = vld [vmem:[%s5904_s4 + $0x150] sm:$0xff] }
 0x1a9   :  { %v1497_v21 = vpop.f32.mrf.mxu2  ;;  %2013 = vmatpush.msrb.mxu2 %v3269_v33 }
 0x1aa   :  { %v1498_v38 = vadd.f32 %v1497_v21, %v1469_v5  ;;  %v1445_v21 = vadd.f32 %v4765_v29, %v4894_v0 }
 0x1ac   :  { %v1474_v29 = vadd.f32 %v4773_v27, %v1445_v21  ;;  %v3268_v27 = vld [vmem:[%s5904_s4 + $0x1c0] sm:$0xff]  ;;  %v3263_v21 = vld [vmem:[%s5904_s4 + $0x198] sm:$0xff] }
 0x1ad   :  { %v1523_v56 = vpop.f32.mrf.mxu3  ;;  %2014 = vmatpush.msrb.mxu2 %v3268_v27  ;;  %v1747_v27 = vld [vmem:[%s5904_s4 + $0x80] sm:$0xff] }
 0x1ae   :  { %v1524_v54 = vadd.f32 %v1523_v56, %v1495_v45  ;;  %v3303_v56 = vld [vmem:[%s5904_s4 + $0x298] sm:$0xff]  ;;  %v3302_v45 = vld [vmem:[%s5904_s4 + $0x290] sm:$0xff] }
 0x1af   :  { %2128 = vmatpush.msra.mxu0 %v3303_v56  ;;  %2015 = vmatpush.msrb.mxu2 %v3267_v19  ;;  %v1748_v56 = vld [vmem:[%s5904_s4 + $0x88] sm:$0xff] }
 0x1b0   :  { %v1550_v13 = vpop.f32.mrf.mxu0 }
 0x1b1   :  { %v1551_v62 = vadd.f32 %v1550_v13, %v1522_v36  ;;  %v1499_v28 = vpop.f32.mrf.mxu2  ;;  %v4827_v49 = vpop.f32.mrf.mxu1  ;;  %2129 = vmatpush.msra.mxu0 %v3302_v45  ;;  %2016 = vmatpush.msrb.mxu2 %v3266_v57  ;;  %v1479_v45 = vadd.f32 %v4809_v58, %v1450_v52 }
 0x1b2   :  { %v1500_v60 = vadd.f32 %v1499_v28, %v1471_v8  ;;  %v3265_v8 = vld [vmem:[%s5904_s4 + $0x1a8] sm:$0xff] }
 0x1b3   :  { %v4830_v37 = vmax.f32 %v1551_v62, 0.0  ;;  %2017 = vmatpush.msrb.mxu2 %v3265_v8 }
 0x1b5   :  { %1797 = vmatmul.f32.vlgmr.msra.gmra.mxu2 %v4830_v37  ;;  %1905 = vmatmul.f32.vlgmr.msrb.gmra.mxu0 %v4830_v37  ;;  %v1526_v63 = vpop.f32.mrf.mxu3 }
 0x1b6   :  { %v1527_v2 = vadd.f32 %v1526_v63, %v1498_v38  ;;  %v3252_v63 = vld [vmem:[%s5904_s4 + $0x180] sm:$0xff] }
 0x1b7   :  { %1938 = vmatpush.msrb.mxu1 %v3252_v63 }
 0x1b8   :  { %v1552_v39 = vpop.f32.mrf.mxu0 }
 0x1b9   :  { %v1553_v48 = vadd.f32 %v1552_v39, %v1524_v54  ;;  %v4838_v44 = vpop.f32.mrf.mxu2  ;;  %v4840_v61 = vpop.f32.mrf.mxu1  ;;  %v3301_v54 = vld [vmem:[%s5904_s4 + $0x288] sm:$0xff]  ;;  %v1753_v39 = vld [vmem:[%s5904_s4 + $0xb0] sm:$0xff]  ;;  %1939 = vmatpush.msrb.mxu1 %v3251_v20 }
 0x1ba   :  { %2130 = vmatpush.msra.mxu0 %v3301_v54  ;;  %1831 = vmatpush.msra.mxu3 %v1753_v39  ;;  %v3245_v54 = vld [vmem:[%s5904_s4 + $0x148] sm:$0xff]  ;;  %v5047_v39 = vpop.permute.xlu0 %1309 }
 0x1bb   :  { %v4843_v18 = vmax.f32 %v1553_v48, 0.0  ;;  %v1503_v48 = vadd.f32 %v4838_v44, %v1474_v29  ;;  %v1752_v44 = vld [vmem:[%s5904_s4 + $0xa8] sm:$0xff]  ;;  %v3295_v29 = vld [vmem:[%s5904_s4 + $0x258] sm:$0xff]  ;;  %v1452_v20 = vadd.f32 %v4818_v55, %v5047_v39 }
 0x1bc   :  { %2131 = vmatpush.msra.mxu0 %v3300_v6  ;;  %1832 = vmatpush.msra.mxu3 %v1752_v44 }
 0x1bd   :  { %1800 = vmatmul.f32.gmra.mxu2 %v4843_v18  ;;  %1908 = vmatmul.f32.gmra.mxu0 %v4843_v18  ;;  %v1528_v35 = vpop.f32.mrf.mxu3 }
 0x1be   :  { %v1529_v42 = vadd.f32 %v1528_v35, %v1500_v60  ;;  %v3250_v35 = vld [vmem:[%s5904_s4 + $0x170] sm:$0xff]  ;;  %2132 = vmatpush.msra.mxu0 %v3299_v23  ;;  %v3264_v60 = vld [vmem:[%s5904_s4 + $0x1a0] sm:$0xff] }
 0x1bf   :  { %1940 = vmatpush.msrb.mxu1 %v3250_v35  ;;  %2018 = vmatpush.msrb.mxu2 %v3264_v60 }
 0x1c0   :  { %v1555_v51 = vpop.f32.mrf.mxu0  ;;  %2133 = vmatpush.msra.mxu0 %v3298_v50 }
 0x1c1   :  { %v1556_v14 = vadd.f32 %v1555_v51, %v1527_v2  ;;  %v4878_v22 = vpop.f32.mrf.mxu2  ;;  %v4880_v11 = vpop.f32.mrf.mxu1  ;;  %v1751_v51 = vld [vmem:[%s5904_s4 + $0xa0] sm:$0xff]  ;;  %2019 = vmatpush.msrb.mxu2 %v3263_v21 }
 0x1c2   :  { %1833 = vmatpush.msra.mxu3 %v1751_v51  ;;  %v1505_v43 = vadd.f32 %v4878_v22, %v1476_v46  ;;  %v3247_v22 = vld [vmem:[%s5904_s4 + $0x158] sm:$0xff]  ;;  %v1580_v51 = vadd.f32 %v4827_v49, %v4812_v30 }
 0x1c3   :  { %v4883_v15 = vmax.f32 %v1556_v14, 0.0  ;;  %v3249_v14 = vld [vmem:[%s5904_s4 + $0x168] sm:$0xff] }
 0x1c4   :  { %1941 = vmatpush.msrb.mxu1 %v3249_v14  ;;  %1834 = vmatpush.msra.mxu3 %v1750_v53 }
 0x1c5   :  { %1803 = vmatmul.f32.gmra.mxu2 %v4883_v15  ;;  %1911 = vmatmul.f32.gmra.mxu0 %v4883_v15  ;;  %v1531_v10 = vpop.f32.mrf.mxu3 }
 0x1c6   :  { %v1532_v38 = vadd.f32 %v1531_v10, %v1503_v48  ;;  %v3297_v10 = vld [vmem:[%s5904_s4 + $0x268] sm:$0xff]  ;;  %1942 = vmatpush.msrb.mxu1 %v3248_v41  ;;  %1835 = vmatpush.msra.mxu3 %v1749_v25 }
 0x1c7   :  { %2134 = vmatpush.msra.mxu0 %v3297_v10 }
 0x1c8   :  { %v1557_v40 = vpop.f32.mrf.mxu0  ;;  %1943 = vmatpush.msrb.mxu1 %v3247_v22  ;;  %1836 = vmatpush.msra.mxu3 %v1748_v56  ;;  %v3286_v56 = vld [vmem:[%s5904_s4 + $0x250] sm:$0xff] }
 0x1c9   :  { %v1558_v36 = vadd.f32 %v1557_v40, %v1529_v42  ;;  %v4921_v13 = vpop.f32.mrf.mxu2  ;;  %v4923_v62 = vpop.f32.mrf.mxu1  ;;  %v3296_v42 = vld [vmem:[%s5904_s4 + $0x260] sm:$0xff] }
 0x1ca   :  { %2135 = vmatpush.msra.mxu0 %v3296_v42  ;;  %1944 = vmatpush.msrb.mxu1 %v3246_v3 }
 0x1cb   :  { %v4926_v28 = vmax.f32 %v1558_v36, 0.0  ;;  %v3262_v36 = vld [vmem:[%s5904_s4 + $0x190] sm:$0xff]  ;;  %1837 = vmatpush.msra.mxu3 %v1747_v27 }
 0x1cc   :  { %2020 = vmatpush.msrb.mxu2 %v3262_v36  ;;  %2136 = vmatpush.msra.mxu0 %v3295_v29  ;;  %v1587_v36 = vadd.f32 %v4923_v62, %v4854_v32 }
 0x1cd   :  { %1806 = vmatmul.f32.gmra.mxu2 %v4926_v28  ;;  %1914 = vmatmul.f32.gmra.mxu0 %v4926_v28  ;;  %v1533_v5 = vpop.f32.mrf.mxu3 }
 0x1ce   :  { %v1534_v16 = vadd.f32 %v1533_v5, %v1505_v43  ;;  %v1508_v5 = vadd.f32 %v4921_v13, %v1479_v45  ;;  %1945 = vmatpush.msrb.mxu1 %v3245_v54  ;;  %2053 = vmatpush.msrb.mxu3 %v3286_v56  ;;  %v3285_v54 = vld [vmem:[%s5904_s4 + $0x248] sm:$0xff] }
 0x1d0   :  { %v1560_v17 = vpop.f32.mrf.mxu0  ;;  %2054 = vmatpush.msrb.mxu3 %v3285_v54 }
 0x1d1   :  { %v1561_v9 = vadd.f32 %v1560_v17, %v1532_v38  ;;  %v4974_v31 = vpop.f32.mrf.mxu2  ;;  %v4976_v2 = vpop.f32.mrf.mxu1  ;;  %v1481_v38 = vadd.f32 %v4820_v4, %v1452_v20 }
 0x1d3   :  { %v4979_v26 = vmax.f32 %v1561_v9, 0.0  ;;  %v1510_v13 = vadd.f32 %v4974_v31, %v1481_v38 }
 0x1d5   :  { %1809 = vmatmul.f32.gmra.mxu2 %v4979_v26  ;;  %1917 = vmatmul.f32.gmra.mxu0 %v4979_v26  ;;  %v1536_v59 = vpop.f32.mrf.mxu3 }
 0x1d6   :  { %v1537_v19 = vadd.f32 %v1536_v59, %v1508_v5  ;;  %v1582_v59 = vadd.f32 %v4840_v61, %v4823_v7 }
 0x1d8   :  { %v1562_v12 = vpop.f32.mrf.mxu0 }
 0x1d9   :  { %v1563_v40 = vadd.f32 %v1562_v12, %v1534_v16  ;;  %v5036_v33 = vpop.f32.mrf.mxu1  ;;  %v1608_v48 = vpop.f32.mrf.mxu2  ;;  %v1585_v16 = vadd.f32 %v4880_v11, %v4832_v34 }
 0x1da   :  { %v1609_v4 = vadd.f32 %v1608_v48, %v1580_v51  ;;  %v3319_v48 = vld [vmem:[%s5904_s4 + $0x318] sm:$0xff] }
 0x1db   :  { %v5039_v63 = vmax.f32 %v1563_v40, 0.0  ;;  %2169 = vmatpush.msra.mxu1 %v3319_v48 }
 0x1dd   :  { %1812 = vmatmul.f32.gmra.mxu2 %v5039_v63  ;;  %1920 = vmatmul.f32.gmra.mxu0 %v5039_v63  ;;  %v1538_v58 = vpop.f32.mrf.mxu3 }
 0x1de   :  { %v1539_v23 = vadd.f32 %v1538_v58, %v1510_v13  ;;  %v3318_v58 = vld [vmem:[%s5904_s4 + $0x310] sm:$0xff]  ;;  %v3284_v13 = vld [vmem:[%s5904_s4 + $0x240] sm:$0xff] }
 0x1df   :  { %2170 = vmatpush.msra.mxu1 %v3318_v58  ;;  %2055 = vmatpush.msrb.mxu3 %v3284_v13 }
 0x1e0   :  { %v1565_v6 = vpop.f32.mrf.mxu0 }
 0x1e1   :  { %v1566_v44 = vadd.f32 %v1565_v6, %v1537_v19  ;;  %v5054_v47 = vpop.f32.mrf.mxu1  ;;  %v1610_v17 = vpop.f32.mrf.mxu2  ;;  %v1590_v19 = vadd.f32 %v4976_v2, %v4894_v0  ;;  %v3283_v0 = vld [vmem:[%s5904_s4 + $0x238] sm:$0xff] }
 0x1e2   :  { %v1611_v10 = vadd.f32 %v1610_v17, %v1582_v59  ;;  %v3316_v17 = vld [vmem:[%s5904_s4 + $0x300] sm:$0xff]  ;;  %2056 = vmatpush.msrb.mxu3 %v3283_v0  ;;  %v3313_v59 = vld [vmem:[%s5904_s4 + $0x2e8] sm:$0xff] }
 0x1e3   :  { %v5057_v35 = vmax.f32 %v1566_v44, 0.0 }
 0x1e5   :  { %1815 = vmatmul.f32.gmra.mxu2 %v5057_v35  ;;  %1923 = vmatmul.f32.gmra.mxu0 %v5057_v35  ;;  %v1637_v57 = vpop.f32.mrf.mxu3 }
 0x1e6   :  { %v1638_v8 = vadd.f32 %v1637_v57, %v1609_v4  ;;  %v3317_v57 = vld [vmem:[%s5904_s4 + $0x308] sm:$0xff] }
 0x1e7   :  { %2171 = vmatpush.msra.mxu1 %v3317_v57 }
 0x1e8   :  { %v1567_v9 = vpop.f32.mrf.mxu0 }
 0x1e9   :  { %v1568_v55 = vadd.f32 %v1567_v9, %v1539_v23  ;;  %v5062_v46 = vpop.f32.mrf.mxu1  ;;  %v1613_v50 = vpop.f32.mrf.mxu2  ;;  %v3282_v23 = vld [vmem:[%s5904_s4 + $0x230] sm:$0xff]  ;;  %v3315_v9 = vld [vmem:[%s5904_s4 + $0x2f8] sm:$0xff]  ;;  %2172 = vmatpush.msra.mxu1 %v3316_v17 }
 0x1ea   :  { %v1614_v42 = vadd.f32 %v1613_v50, %v1585_v16  ;;  %2057 = vmatpush.msrb.mxu3 %v3282_v23 }
 0x1eb   :  { %v5066_v14 = vmax.f32 %v1568_v55, 0.0  ;;  %2173 = vmatpush.msra.mxu1 %v3315_v9 }
 0x1ed   :  { %1818 = vmatmul.f32.gmra.mxu2 %v5066_v14  ;;  %1926 = vmatmul.f32.gmra.mxu0 %v5066_v14  ;;  %v1639_v31 = vpop.f32.mrf.mxu3 }
 0x1ee   :  { %v1640_v25 = vadd.f32 %v1639_v31, %v1611_v10  ;;  %v3281_v31 = vld [vmem:[%s5904_s4 + $0x228] sm:$0xff] }
 0x1ef   :  { %2058 = vmatpush.msrb.mxu3 %v3281_v31 }
 0x1f0   :  { %v1666_v53 = vpop.f32.mrf.mxu0 }
 0x1f1   :  { %v1667_v41 = vadd.f32 %v1666_v53, %v1638_v8  ;;  %v1695_v43 = vpop.f32.mrf.mxu1  ;;  %v1615_v7 = vpop.f32.mrf.mxu2  ;;  %v3314_v8 = vld [vmem:[%s5904_s4 + $0x2f0] sm:$0xff]  ;;  %v1592_v53 = vadd.f32 %v5036_v33, %v4937_v1  ;;  %v3279_v1 = vld [vmem:[%s5904_s4 + $0x218] sm:$0xff]  ;;  %v3312_v33 = vld [vmem:[%s5904_s4 + $0x2e0] sm:$0xff] }
 0x1f2   :  { %v1616_v45 = vadd.f32 %v1615_v7, %v1587_v36  ;;  %2174 = vmatpush.msra.mxu1 %v3314_v8 }
 0x1f3   :  { %v1696_v60 = vadd.f32 %v1695_v43, %v1667_v41  ;;  %v3280_v43 = vld [vmem:[%s5904_s4 + $0x220] sm:$0xff] }
 0x1f4   :  { %2059 = vmatpush.msrb.mxu3 %v3280_v43  ;;  %2175 = vmatpush.msra.mxu1 %v3313_v59 }
 0x1f5   :  { %v5072_v30 = vmax.f32 %v1696_v60, 0.0  ;;  %2021 = vmatmul.f32.vlgmr.msrb.gmra.mxu2 %v4830_v37  ;;  %2137 = vmatmul.f32.vlgmr.msra.gmra.mxu0 %v4830_v37  ;;  %v1642_v49 = vpop.f32.mrf.mxu3 }
 0x1f6   :  { %v1643_v3 = vadd.f32 %v1642_v49, %v1614_v42  ;;  %2060 = vmatpush.msrb.mxu3 %v3279_v1  ;;  %2176 = vmatpush.msra.mxu1 %v3312_v33 }
 0x1f7   :  { %3221 = vmatmul.msk.f32.vlgmr.msra.gmra.mxu3 %vm1756_vm13, %v5072_v30  ;;  %3254 = vmatmul.msk.f32.vlgmr.msrb.gmra.mxu1 %vm1756_vm13, %v5072_v30 }
 0x1f8   :  { %v1668_v22 = vpop.f32.mrf.mxu0 }
 0x1f9   :  { %v1669_v52 = vadd.f32 %v1668_v22, %v1640_v25  ;;  %v1697_v61 = vpop.f32.mrf.mxu1  ;;  %v1618_v29 = vpop.f32.mrf.mxu2  ;;  %v3278_v25 = vld [vmem:[%s5904_s4 + $0x210] sm:$0xff] }
 0x1fa   :  { %v1619_v44 = vadd.f32 %v1618_v29, %v1590_v19  ;;  %2061 = vmatpush.msrb.mxu3 %v3278_v25 }
 0x1fb   :  { %v1698_v21 = vadd.f32 %v1697_v61, %v1669_v52 }
 0x1fd   :  { %v5082_v12 = vmax.f32 %v1698_v21, 0.0  ;;  %2024 = vmatmul.f32.gmra.mxu2 %v4843_v18  ;;  %2140 = vmatmul.f32.gmra.mxu0 %v4843_v18  ;;  %v1644_v37 = vpop.f32.mrf.mxu3  ;;  %v1595_v21 = vadd.f32 %v5054_v47, %v4990_v24 }
 0x1fe   :  { %v1645_v32 = vadd.f32 %v1644_v37, %v1616_v45 }
 0x1ff   :  { %3222 = vmatmul.msk.f32.gmra.mxu3 %vm1756_vm13, %v5082_v12  ;;  %3255 = vmatmul.msk.f32.gmra.mxu1 %vm1756_vm13, %v5082_v12 }
 0x200   :  { %v1671_v34 = vpop.f32.mrf.mxu0 }
 0x201   :  { %v1672_v11 = vadd.f32 %v1671_v34, %v1643_v3  ;;  %v1700_v40 = vpop.f32.mrf.mxu1  ;;  %v1620_v2 = vpop.f32.mrf.mxu2 }
 0x202   :  { %v1621_v60 = vadd.f32 %v1620_v2, %v1592_v53 }
 0x203   :  { %v1701_v18 = vadd.f32 %v1700_v40, %v1672_v11 }
 0x205   :  { %v5095_v27 = vmax.f32 %v1701_v18, 0.0  ;;  %2027 = vmatmul.f32.gmra.mxu2 %v4883_v15  ;;  %2143 = vmatmul.f32.gmra.mxu0 %v4883_v15  ;;  %v1647_v5 = vpop.f32.mrf.mxu3  ;;  %v1597_v18 = vadd.f32 %v5062_v46, %v5047_v39 }
 0x207   :  { %3223 = vmatmul.msk.f32.gmra.mxu3 %vm1756_vm13, %v5095_v27  ;;  %3256 = vmatmul.msk.f32.gmra.mxu1 %vm1756_vm13, %v5095_v27 }
 0x208   :  { %v1673_v62 = vpop.f32.mrf.mxu0 }
 0x209   :  { %v1674_v15 = vadd.f32 %v1673_v62, %v1645_v32  ;;  %v1702_v20 = vpop.f32.mrf.mxu1  ;;  %v1623_v22 = vpop.f32.mrf.mxu2 }
 0x20a   :  { %v1624_v37 = vadd.f32 %v1623_v22, %v1595_v21 }
 0x20b   :  { %v1703_v6 = vadd.f32 %v1702_v20, %v1674_v15 }
 0x20d   :  { %v5114_v38 = vmax.f32 %v1703_v6, 0.0  ;;  %2030 = vmatmul.f32.gmra.mxu2 %v4926_v28  ;;  %2146 = vmatmul.f32.gmra.mxu0 %v4926_v28  ;;  %v1648_v28 = vadd.f32 %v1647_v5, %v1619_v44  ;;  %v1649_v55 = vpop.f32.mrf.mxu3 }
 0x20e   :  { %v1650_v49 = vadd.f32 %v1649_v55, %v1621_v60 }
 0x20f   :  { %3224 = vmatmul.msk.f32.gmra.mxu3 %vm1756_vm13, %v5114_v38  ;;  %3257 = vmatmul.msk.f32.gmra.mxu1 %vm1756_vm13, %v5114_v38 }
 0x210   :  { %v1676_v51 = vpop.f32.mrf.mxu0 }
 0x211   :  { %v1677_v4 = vadd.f32 %v1676_v51, %v1648_v28  ;;  %v1705_v50 = vpop.f32.mrf.mxu1  ;;  %v1625_v40 = vpop.f32.mrf.mxu2 }
 0x212   :  { %v1626_v29 = vadd.f32 %v1625_v40, %v1597_v18 }
 0x213   :  { %v1706_v41 = vadd.f32 %v1705_v50, %v1677_v4 }
 0x215   :  { %v1724_v10 = vmax.f32 %v1706_v41, 0.0  ;;  %2033 = vmatmul.f32.gmra.mxu2 %v4979_v26  ;;  %2149 = vmatmul.f32.gmra.mxu0 %v4979_v26  ;;  %v3311_v26 = vld [vmem:[%s5904_s4 + $0x2d8] sm:$0xff]  ;;  %v1652_v61 = vpop.f32.mrf.mxu3  ;;  %s3510_s4 = smov 3  }
 0x216   :  { %2177 = vmatpush.msra.mxu1 %v3311_v26  ;;  %v1653_v3 = vadd.f32 %v1652_v61, %v1624_v37 }
 0x217   :  { %3225 = vmatmul.msk.f32.gmra.mxu3 %vm1756_vm13, %v1724_v10  ;;  %3258 = vmatmul.msk.f32.gmra.mxu1 %vm1756_vm13, %v1724_v10 }
 0x218   :  { %v1678_v52 = vpop.f32.mrf.mxu0 }
 0x219   :  { %v1679_v7 = vadd.f32 %v1678_v52, %v1650_v49  ;;  %v1707_v16 = vpop.f32.mrf.mxu1 }
 0x21b   :  { %v1708_v42 = vadd.f32 %v1707_v16, %v1679_v7 }
 0x21d   :  { %v1726_v56 = vmax.f32 %v1708_v42, 0.0  ;;  %2036 = vmatmul.f32.gmra.mxu2 %v5039_v63  ;;  %2152 = vmatmul.f32.gmra.mxu0 %v5039_v63  ;;  %v1654_v47 = vpop.f32.mrf.mxu3 }
 0x21e   :  { %v1655_v63 = vadd.f32 %v1654_v47, %v1626_v29 }
 0x21f   :  { %3226 = vmatmul.msk.f32.gmra.mxu3 %vm1756_vm13, %v1726_v56  ;;  %3259 = vmatmul.msk.f32.gmra.mxu1 %vm1756_vm13, %v1726_v56 }
 0x220   :  { %v1681_v34 = vpop.f32.mrf.mxu0 }
 0x221   :  { %v1682_v11 = vadd.f32 %v1681_v34, %v1653_v3  ;;  %v1710_v36 = vpop.f32.mrf.mxu1 }
 0x223   :  { %v1711_v24 = vadd.f32 %v1710_v36, %v1682_v11 }
 0x225   :  { %v1728_v45 = vmax.f32 %v1711_v24, 0.0  ;;  %2039 = vmatmul.f32.gmra.mxu2 %v5057_v35  ;;  %2155 = vmatmul.f32.gmra.mxu0 %v5057_v35 }
 0x227   :  { %3227 = vmatmul.msk.f32.gmra.mxu3 %vm1756_vm13, %v1728_v45  ;;  %3260 = vmatmul.msk.f32.gmra.mxu1 %vm1756_vm13, %v1728_v45 }
 0x228   :  { %v1683_v54 = vpop.f32.mrf.mxu0 }
 0x229   :  { %v1684_v48 = vadd.f32 %v1683_v54, %v1655_v63  ;;  %v1712_v5 = vpop.f32.mrf.mxu1 }
 0x22b   :  { %v1713_v32 = vadd.f32 %v1712_v5, %v1684_v48 }
 0x22d   :  { %v1730_v62 = vmax.f32 %v1713_v32, 0.0  ;;  %2042 = vmatmul.f32.gmra.mxu2 %v5066_v14  ;;  %2158 = vmatmul.f32.gmra.mxu0 %v5066_v14 }
 0x22f   :  { %3228 = vmatmul.msk.f32.gmra.mxu3 %vm1756_vm13, %v1730_v62  ;;  %3261 = vmatmul.msk.f32.gmra.mxu1 %vm1756_vm13, %v1730_v62 }
 0x232   :  { %v1906_v39 = vpop.f32.mrf.mxu0 }
 0x237   :  { %3287 = vmatmul.msk.f32.vlgmr.msrb.gmra.mxu3 %vm1756_vm13, %v5072_v30  ;;  %3320 = vmatmul.msk.f32.vlgmr.msra.gmra.mxu1 %vm1756_vm13, %v5072_v30 }
 0x238   :  { %v1798_v35 = vpop.f32.mrf.mxu2 }
 0x23a   :  { %v1909_v46 = vpop.f32.mrf.mxu0 }
 0x23f   :  { %3288 = vmatmul.msk.f32.gmra.mxu3 %vm1756_vm13, %v5082_v12  ;;  %3321 = vmatmul.msk.f32.gmra.mxu1 %vm1756_vm13, %v5082_v12 }
 0x240   :  { %v1801_v14 = vpop.f32.mrf.mxu2 }
 0x242   :  { %v1912_v12 = vpop.f32.mrf.mxu0 }
 0x247   :  { %3289 = vmatmul.msk.f32.gmra.mxu3 %vm1756_vm13, %v5095_v27  ;;  %3322 = vmatmul.msk.f32.gmra.mxu1 %vm1756_vm13, %v5095_v27 }
 0x248   :  { %v1804_v15 = vpop.f32.mrf.mxu2 }
 0x24a   :  { %v1915_v19 = vpop.f32.mrf.mxu0 }
 0x24f   :  { %3290 = vmatmul.msk.f32.gmra.mxu3 %vm1756_vm13, %v5114_v38  ;;  %3323 = vmatmul.msk.f32.gmra.mxu1 %vm1756_vm13, %v5114_v38 }
 0x250   :  { %v1807_v44 = vpop.f32.mrf.mxu2 }
 0x252   :  { %v1918_v28 = vpop.f32.mrf.mxu0 }
 0x257   :  { %3291 = vmatmul.msk.f32.gmra.mxu3 %vm1756_vm13, %v1724_v10  ;;  %3324 = vmatmul.msk.f32.gmra.mxu1 %vm1756_vm13, %v1724_v10 }
 0x258   :  { %v1810_v23 = vpop.f32.mrf.mxu2 }
 0x25a   :  { %v1921_v8 = vpop.f32.mrf.mxu0 }
 0x25f   :  { %3292 = vmatmul.msk.f32.gmra.mxu3 %vm1756_vm13, %v1726_v56  ;;  %3325 = vmatmul.msk.f32.gmra.mxu1 %vm1756_vm13, %v1726_v56 }
 0x260   :  { %v1813_v50 = vpop.f32.mrf.mxu2 }
 0x262   :  { %v1924_v10 = vpop.f32.mrf.mxu0 }
 0x267   :  { %3293 = vmatmul.msk.f32.gmra.mxu3 %vm1756_vm13, %v1728_v45  ;;  %3326 = vmatmul.msk.f32.gmra.mxu1 %vm1756_vm13, %v1728_v45 }
 0x268   :  { %v1816_v33 = vpop.f32.mrf.mxu2 }
 0x26a   :  { %v1927_v61 = vpop.f32.mrf.mxu0 }
 0x26f   :  { %3294 = vmatmul.msk.f32.gmra.mxu3 %vm1756_vm13, %v1730_v62  ;;  %3327 = vmatmul.msk.f32.gmra.mxu1 %vm1756_vm13, %v1730_v62 }
 0x270   :  { %v1819_v21 = vpop.f32.mrf.mxu2 }
 0x272   :  { %v2138_v24 = vpop.f32.mrf.mxu0 }
 0x274   :  { %v1947_v30 = vpop.f32.mrf.mxu1 }
 0x275   :  { %v1948_v18 = vadd.f32 %v1947_v30, %v1906_v39 }
 0x278   :  { %v2022_v11 = vpop.f32.mrf.mxu2 }
 0x27a   :  { %v1839_v27 = vpop.f32.mrf.mxu3 }
 0x27b   :  { %v1840_v40 = vadd.f32 %v1839_v27, %v1798_v35  ;;  %v2141_v27 = vpop.f32.mrf.mxu0 }
 0x27c   :  { %v1950_v58 = vpop.f32.mrf.mxu1 }
 0x27d   :  { %v1971_v29 = vmax.f32 %v1840_v40, %v1948_v18  ;;  %v1951_v32 = vadd.f32 %v1950_v58, %v1909_v46 }
 0x280   :  { %v2025_v62 = vpop.f32.mrf.mxu2 }
 0x282   :  { %v1842_v20 = vpop.f32.mrf.mxu3 }
 0x283   :  { %v1843_v48 = vadd.f32 %v1842_v20, %v1801_v14 }
 0x284   :  { %v1953_v6 = vpop.f32.mrf.mxu1 }
 0x285   :  { %v5210_v38 = vadd.f32 %v1953_v6, %v1912_v12  ;;  %v1972_v30 = vmax.f32 %v1843_v48, %v1951_v32 }
 0x288   :  { %v2028_v58 = vpop.f32.mrf.mxu2 }
 0x28a   :  { %v1845_v13 = vpop.f32.mrf.mxu3 }
 0x28b   :  { %v5212_v57 = vadd.f32 %v1845_v13, %v1804_v15  ;;  %v2144_v13 = vpop.f32.mrf.mxu0 }
 0x28c   :  { %v1956_v0 = vpop.f32.mrf.mxu1 }
 0x28d   :  { %v1973_v2 = vmax.f32 %v5212_v57, %v5210_v38  ;;  %v5216_v17 = vadd.f32 %v1956_v0, %v1915_v19 }
 0x292   :  { %v1848_v9 = vpop.f32.mrf.mxu3 }
 0x293   :  { %v5218_v55 = vadd.f32 %v1848_v9, %v1807_v44  ;;  %v2031_v9 = vpop.f32.mrf.mxu2 }
 0x294   :  { %v1959_v51 = vpop.f32.mrf.mxu1 }
 0x295   :  { %v1974_v4 = vmax.f32 %v5218_v55, %v5216_v17  ;;  %v5222_v31 = vadd.f32 %v1959_v51, %v1918_v28 }
 0x29a   :  { %v1851_v53 = vpop.f32.mrf.mxu3 }
 0x29b   :  { %v5224_v41 = vadd.f32 %v1851_v53, %v1810_v23 }
 0x29c   :  { %v1962_v43 = vpop.f32.mrf.mxu1 }
 0x29d   :  { %v1975_v59 = vmax.f32 %v5224_v41, %v5222_v31  ;;  %v5228_v60 = vadd.f32 %v1962_v43, %v1921_v8  ;;  %v2034_v43 = vpop.f32.mrf.mxu2 }
 0x2a2   :  { %v1854_v1 = vpop.f32.mrf.mxu3 }
 0x2a3   :  { %v5230_v49 = vadd.f32 %v1854_v1, %v1813_v50 }
 0x2a4   :  { %v1965_v25 = vpop.f32.mrf.mxu1 }
 0x2a5   :  { %v1976_v26 = vmax.f32 %v5230_v49, %v5228_v60  ;;  %v5234_v22 = vadd.f32 %v1965_v25, %v1924_v10 }
 0x2aa   :  { %v1857_v52 = vpop.f32.mrf.mxu3 }
 0x2ab   :  { %v5236_v7 = vadd.f32 %v1857_v52, %v1816_v33  ;;  %v2037_v52 = vpop.f32.mrf.mxu2 }
 0x2ac   :  { %v1968_v16 = vpop.f32.mrf.mxu1 }
 0x2ad   :  { %v1977_v42 = vmax.f32 %v5236_v7, %v5234_v22  ;;  %v5240_v37 = vadd.f32 %v1968_v16, %v1927_v61 }
 0x2b2   :  { %v1860_v56 = vpop.f32.mrf.mxu3 }
 0x2b3   :  { %v5242_v3 = vadd.f32 %v1860_v56, %v1819_v21 }
 0x2b4   :  { %v2179_v36 = vpop.f32.mrf.mxu1 }
 0x2b5   :  { %v1978_v34 = vmax.f32 %v5242_v3, %v5240_v37  ;;  %v2180_v63 = vadd.f32 %v2179_v36, %v2138_v24 }
 0x2ba   :  { %v2063_v47 = vpop.f32.mrf.mxu3 }
 0x2bb   :  { %v2064_v45 = vadd.f32 %v2063_v47, %v2022_v11  ;;  %v2040_v11 = vpop.f32.mrf.mxu2 }
 0x2bc   :  { %v2182_v35 = vpop.f32.mrf.mxu1 }
 0x2bd   :  { %v2087_v54 = vmax.f32 %v1971_v29, %v2064_v45  ;;  %v2183_v14 = vadd.f32 %v2182_v35, %v2141_v27 }
 0x2bf   :  { %v5246_v5 = vmax.f32 %v2087_v54, %v2180_v63 }
 0x2c1   :  { %2219 = vrot.lane.b32.xlu2 %v5246_v5, %s3504_s28  ;;  %2355 = vrot.lane.b32.xlu1 %v5246_v5, %s3501_s12 }
 0x2c2   :  { %2263 = vrot.lane.b32.xlu0 %v5246_v5, %s3510_s4  ;;  %v2066_v39 = vpop.f32.mrf.mxu3 }
 0x2c3   :  { %v2067_v12 = vadd.f32 %v2066_v39, %v2025_v62 }
 0x2c4   :  { %v2185_v6 = vpop.f32.mrf.mxu1 }
 0x2c5   :  { %v2088_v15 = vmax.f32 %v1972_v30, %v2067_v12  ;;  %v2186_v0 = vadd.f32 %v2185_v6, %v2144_v13 }
 0x2c7   :  { %v5254_v20 = vmax.f32 %v2088_v15, %v2183_v14 }
 0x2c9   :  { %2504 = vrot.lane.b32.xlu1 %v5246_v5, %s3511_s6  ;;  %2415 = vrot.lane.b32.xlu2 %v5254_v20, %s3505_s18 }
 0x2ca   :  { %2413 = vrot.lane.b32.xlu0 %v5246_v5, %s3505_s18  ;;  %v2069_v46 = vpop.f32.mrf.mxu3 }
 0x2cb   :  { %v2070_v19 = vadd.f32 %v2069_v46, %v2028_v58 }
 0x2cc   :  { %v2188_v38 = vpop.f32.mrf.mxu1 }
 0x2cd   :  { %v2089_v44 = vmax.f32 %v1973_v2, %v2070_v19  ;;  %v2147_v2 = vpop.f32.mrf.mxu0 }
 0x2ce   :  { %v2189_v8 = vadd.f32 %v2188_v38, %v2147_v2  ;;  %v2596_v38 = vld [vmem:[#allocation2] sm:$0x1] }
 0x2cf   :  { %v5271_v28 = vmax.f32 %v2089_v44, %v2186_v0 }
 0x2d1   :  { %2506 = vrot.lane.b32.xlu1 %v5254_v20, %s3511_s6  ;;  %2221 = vrot.lane.b32.xlu2 %v5254_v20, %s3504_s28 }
 0x2d2   :  { %2265 = vrot.lane.b32.xlu0 %v5254_v20, %s3510_s4  ;;  %v2072_v23 = vpop.f32.mrf.mxu3 }
 0x2d3   :  { %v2073_v51 = vadd.f32 %v2072_v23, %v2031_v9 }
 0x2d4   :  { %v2191_v17 = vpop.f32.mrf.mxu1 }
 0x2d5   :  { %v2090_v57 = vmax.f32 %v1974_v4, %v2073_v51  ;;  %v2150_v4 = vpop.f32.mrf.mxu0 }
 0x2d6   :  { %v2192_v1 = vadd.f32 %v2191_v17, %v2150_v4 }
 0x2d7   :  { %v5288_v50 = vmax.f32 %v2090_v57, %v2189_v8  ;;  %v3009_v57 = vld [vmem:[%s5910_s10] sm:$0xff] }
 0x2d9   :  { %2311 = vrot.lane.b32.xlu2 %v5254_v20, %s3512_s2  ;;  %2417 = vrot.lane.b32.xlu1 %v5271_v28, %s3505_s18 }
 0x2da   :  { %2357 = vrot.lane.b32.xlu0 %v5254_v20, %s3501_s12  ;;  %v2075_v53 = vpop.f32.mrf.mxu3 }
 0x2db   :  { %v2076_v10 = vadd.f32 %v2075_v53, %v2034_v43  ;;  %v3044_v43 = vld [vmem:[#allocation3] sm:$0x1] }
 0x2dc   :  { %v2194_v31 = vpop.f32.mrf.mxu1 }
 0x2dd   :  { %v2091_v55 = vmax.f32 %v1975_v59, %v2076_v10  ;;  %v2153_v59 = vpop.f32.mrf.mxu0 }
 0x2de   :  { %v2195_v16 = vadd.f32 %v2194_v31, %v2153_v59 }
 0x2df   :  { %v5305_v33 = vmax.f32 %v2091_v55, %v2192_v1 }
 0x2e1   :  { %2508 = vrot.lane.b32.xlu1 %v5271_v28, %s3511_s6  ;;  %2359 = vrot.lane.b32.xlu2 %v5271_v28, %s3501_s12 }
 0x2e2   :  { %2267 = vrot.lane.b32.xlu0 %v5271_v28, %s3510_s4  ;;  %v2078_v25 = vpop.f32.mrf.mxu3 }
 0x2e3   :  { %v2079_v61 = vadd.f32 %v2078_v25, %v2037_v52 }
 0x2e4   :  { %v2197_v60 = vpop.f32.mrf.mxu1 }
 0x2e5   :  { %v2092_v41 = vmax.f32 %v1976_v26, %v2079_v61  ;;  %v2156_v26 = vpop.f32.mrf.mxu0 }
 0x2e6   :  { %v2198_v36 = vadd.f32 %v2197_v60, %v2156_v26 }
 0x2e7   :  { %v5322_v21 = vmax.f32 %v2092_v41, %v2195_v16  ;;  %v3468_v41 = vld [vmem:[%s5907_s7 + $0x3] ss:$0 sm:$0xff] }
 0x2e9   :  { %2223 = vrot.lane.b32.xlu2 %v5271_v28, %s3504_s28  ;;  %2361 = vrot.lane.b32.xlu1 %v5288_v50, %s3501_s12 }
 0x2ea   :  { %2269 = vrot.lane.b32.xlu0 %v5288_v50, %s3510_s4  ;;  %v2081_v56 = vpop.f32.mrf.mxu3 }
 0x2eb   :  { %v2082_v40 = vadd.f32 %v2081_v56, %v2040_v11 }
 0x2ec   :  { %v2200_v29 = vpop.f32.mrf.mxu1 }
 0x2ed   :  { %v2093_v49 = vmax.f32 %v1977_v42, %v2082_v40  ;;  %v2043_v42 = vpop.f32.mrf.mxu2  ;;  %v2159_v54 = vpop.f32.mrf.mxu0 }
 0x2ee   :  { %v2201_v48 = vadd.f32 %v2200_v29, %v2159_v54 }
 0x2ef   :  { %v5339_v18 = vmax.f32 %v2093_v49, %v2198_v36 }
 0x2f1   :  { %2313 = vrot.lane.b32.xlu2 %v5271_v28, %s3512_s2  ;;  %2510 = vrot.lane.b32.xlu1 %v5288_v50, %s3511_s6 }
 0x2f2   :  { %2419 = vrot.lane.b32.xlu0 %v5288_v50, %s3505_s18  ;;  %v2084_v7 = vpop.f32.mrf.mxu3 }
 0x2f3   :  { %v2085_v47 = vadd.f32 %v2084_v7, %v2043_v42 }
 0x2f5   :  { %v2094_v45 = vmax.f32 %v1978_v34, %v2085_v47 }
 0x2f7   :  { %v5368_v32 = vmax.f32 %v2094_v45, %v2201_v48 }
 0x2f9   :  { %2225 = vrot.lane.b32.xlu2 %v5288_v50, %s3504_s28  ;;  %2271 = vrot.lane.b32.xlu1 %v5305_v33, %s3510_s4 }
 0x2fa   :  { %2315 = vrot.lane.b32.xlu0 %v5288_v50, %s3512_s2 }
 0x301   :  { %2421 = vrot.lane.b32.xlu2 %v5305_v33, %s3505_s18  ;;  %2363 = vrot.lane.b32.xlu1 %v5305_v33, %s3501_s12 }
 0x302   :  { %2512 = vrot.lane.b32.xlu0 %v5305_v33, %s3511_s6 }
 0x309   :  { %2227 = vrot.lane.b32.xlu1 %v5305_v33, %s3504_s28  ;;  %2423 = vrot.lane.b32.xlu2 %v5322_v21, %s3505_s18 }
 0x30a   :  { %2317 = vrot.lane.b32.xlu0 %v5305_v33, %s3512_s2 }
 0x311   :  { %2514 = vrot.lane.b32.xlu2 %v5322_v21, %s3511_s6  ;;  %2365 = vrot.lane.b32.xlu1 %v5322_v21, %s3501_s12 }
 0x312   :  { %2273 = vrot.lane.b32.xlu0 %v5322_v21, %s3510_s4 }
 0x319   :  { %2367 = vrot.lane.b32.xlu1 %v5339_v18, %s3501_s12  ;;  %2275 = vrot.lane.b32.xlu2 %v5339_v18, %s3510_s4 }
 0x31a   :  { %2229 = vrot.lane.b32.xlu0 %v5322_v21, %s3504_s28 }
 0x31b   :  { %v5347_v24 = vpop.permute.xlu2 %2219 }
 0x321   :  { %2516 = vrot.lane.b32.xlu1 %v5339_v18, %s3511_s6  ;;  %2425 = vrot.lane.b32.xlu2 %v5339_v18, %s3505_s18 }
 0x322   :  { %2319 = vrot.lane.b32.xlu0 %v5322_v21, %s3512_s2 }
 0x323   :  { %v5355_v22 = vpop.permute.xlu2 %2415 }
 0x329   :  { %2562 = vrot.lane.b32.xlu1 %v5339_v18, %s3507_s25  ;;  %2231 = vrot.lane.b32.xlu2 %v5339_v18, %s3504_s28 }
 0x32a   :  { %2468 = vrot.lane.b32.xlu0 %v5322_v21, %s3513_s20 }
 0x32b   :  { %v5366_v63 = vpop.permute.xlu2 %2221 }
 0x331   :  { %2369 = vrot.lane.b32.xlu2 %v5368_v32, %s3501_s12  ;;  %2277 = vrot.lane.b32.xlu1 %v5368_v32, %s3510_s4 }
 0x332   :  { %2321 = vrot.lane.b32.xlu0 %v5339_v18, %s3512_s2 }
 0x333   :  { %v5376_v62 = vpop.permute.xlu1 %2355  ;;  %v5378_v35 = vpop.permute.xlu2 %2311 }
 0x334   :  { %v5380_v37 = vpop.permute.xlu0 %2263 }
 0x339   :  { %2427 = vrot.lane.b32.xlu2 %v5368_v32, %s3505_s18  ;;  %2560 = vrot.lane.b32.xlu1 %v5322_v21, %s3507_s25 }
 0x33a   :  { %2470 = vrot.lane.b32.xlu0 %v5339_v18, %s3513_s20 }
 0x33b   :  { %v5388_v3 = vpop.permute.xlu1 %2504  ;;  %v5390_v34 = vpop.permute.xlu2 %2359 }
 0x33c   :  { %v5392_v39 = vpop.permute.xlu0 %2413  ;;  %v2381_v54 = vsel %vm382_vm1, 0.0, %v5390_v34  ;;  %v3469_v34 = vld [vmem:[%s5907_s7 + $0x1] ss:$0 sm:$0xff] }
 0x341   :  { %2309 = vrot.lane.b32.xlu2 %v5246_v5, %s3512_s2  ;;  %2233 = vrot.lane.b32.xlu1 %v5368_v32, %s3504_s28  ;;  %s3084_s28 = sshll.u32 %s5912_s13, 4  ;;  %s3085_s28 = int_to_ptr.hbm [resolvable:$true] %s3084_s28 }
 0x342   :  { %2518 = vrot.lane.b32.xlu0 %v5368_v32, %s3511_s6 }
 0x343   :  { %v5400_v30 = vpop.permute.xlu1 %2506  ;;  %v5402_v12 = vpop.permute.xlu2 %2223 }
 0x344   :  { %v5404_v27 = vpop.permute.xlu0 %2265 }
 0x349   :  { %2323 = vrot.lane.b32.xlu2 %v5368_v32, %s3512_s2  ;;  %2462 = vrot.lane.b32.xlu1 %v5271_v28, %s3513_s20  ;;  %s3514_s2 = smov [#allocation4]  }
 0x34a   :  { %2466 = vrot.lane.b32.xlu0 %v5305_v33, %s3513_s20 }
 0x34b   :  { %v5412_v14 = vpop.permute.xlu1 %2417  ;;  %v5414_v15 = vpop.permute.xlu2 %2313 }
 0x34c   :  { %v2358_v46 = vpop.permute.xlu0 %2357 }
 0x351   :  { %2464 = vrot.lane.b32.xlu2 %v5288_v50, %s3513_s20  ;;  %2472 = vrot.lane.b32.xlu1 %v5368_v32, %s3513_s20 }
 0x352   :  { %2558 = vrot.lane.b32.xlu0 %v5305_v33, %s3507_s25 }
 0x353   :  { %v5422_v58 = vpop.permute.xlu1 %2508  ;;  %v5424_v19 = vpop.permute.xlu2 %2225 }
 0x354   :  { %v5426_v6 = vpop.permute.xlu0 %2267 }
 0x359   :  { %2556 = vrot.lane.b32.xlu2 %v5288_v50, %s3507_s25  ;;  %2564 = vrot.lane.b32.xlu1 %v5368_v32, %s3507_s25 }
 0x35a   :  { %2460 = vrot.lane.b32.xlu0 %v5254_v20, %s3513_s20 }
 0x35b   :  { %v2362_v44 = vpop.permute.xlu1 %2361  ;;  %v5434_v13 = vpop.permute.xlu2 %2421 }
 0x35c   :  { %v5436_v0 = vpop.permute.xlu0 %2269  ;;  %v2382_v42 = vsel %vm382_vm1, 0.0, %v2362_v44 }
 0x361   :  { %2458 = vrot.lane.b32.xlu2 %v5246_v5, %s3513_s20  ;;  %2554 = vrot.lane.b32.xlu1 %v5271_v28, %s3507_s25  ;;  %s3082_s20 = sshll.u32 %s3514_s2, 4  ;;  %s3083_s20 = int_to_ptr.vmem [resolvable:$true] %s3082_s20 }
 0x362   :  { %2552 = vrot.lane.b32.xlu0 %v5254_v20, %s3507_s25 }
 0x363   :  { %v5444_v23 = vpop.permute.xlu1 %2510  ;;  %v5446_v9 = vpop.permute.xlu2 %2423 }
 0x364   :  { %v5448_v51 = vpop.permute.xlu0 %2419 }
 0x369   :  { %2599 = vperm.xlu2 %3464, %v2596_v38   ;;  %2550 = vrot.lane.b32.xlu1 %v5246_v5, %s3507_s25  ;;  %v2395_v38 = vmul.f32 %v3468_v41, %v2382_v42 }
 0x36a   :  { %3012 = vperm.xlu0 %3465, %v3009_v57   ;;  %v2380_v57 = vsel %vm382_vm1, 0.0, %v2358_v46 }
 0x36b   :  { %v5455_v2 = vpop.permute.xlu1 %2271  ;;  %v5457_v8 = vpop.permute.xlu2 %2514  ;;  %v2393_v44 = vmul.f32 %v3468_v41, %v2380_v57 }
 0x36c   :  { %v5459_v53 = vpop.permute.xlu0 %2315 }
 0x371   :  { %3047 = vperm.xlu1 %3463, %v3044_v43   ;;  %v2394_v43 = vmul.f32 %v3468_v41, %v2381_v54 }
 0x373   :  { %v2364_v10 = vpop.permute.xlu1 %2363  ;;  %v2276_v17 = vpop.permute.xlu2 %2275 }
 0x374   :  { %v5461_v55 = vpop.permute.xlu0 %2512  ;;  %v2383_v36 = vsel %vm382_vm1, 0.0, %v2364_v10  ;;  %v2379_v10 = vsel %vm382_vm1, 0.0, %v5376_v62  ;;  %v3470_v62 = vld [vmem:[%s5907_s7 + $0x2] ss:$0 sm:$0xff] }
 0x375   :  { %v2396_v47 = vmul.f32 %v3468_v41, %v2383_v36 }
 0x37b   :  { %v5463_v4 = vpop.permute.xlu1 %2227  ;;  %v5465_v1 = vpop.permute.xlu2 %2425 }
 0x37c   :  { %v2318_v25 = vpop.permute.xlu0 %2317 }
 0x383   :  { %v2366_v52 = vpop.permute.xlu1 %2365  ;;  %v5467_v61 = vpop.permute.xlu2 %2231 }
 0x384   :  { %v2274_v31 = vpop.permute.xlu0 %2273  ;;  %v2384_v49 = vsel %vm382_vm1, 0.0, %v2366_v52  ;;  %v2392_v52 = vmul.f32 %v3468_v41, %v2379_v10 }
 0x385   :  { %v2397_v7 = vmul.f32 %v3468_v41, %v2384_v49 }
 0x38b   :  { %v2368_v59 = vpop.permute.xlu1 %2367  ;;  %v2370_v16 = vpop.permute.xlu2 %2369 }
 0x38c   :  { %v5472_v56 = vpop.permute.xlu0 %2229  ;;  %v2385_v11 = vsel %vm382_vm1, 0.0, %v2368_v59  ;;  %v2386_v40 = vsel %vm382_vm1, 0.0, %v2370_v16  ;;  %vm2482_vm1 = vcmask 572416  }
 0x38d   :  { %v2399_v60 = vmul.f32 %v3468_v41, %v2386_v40  ;;  %v2398_v26 = vmul.f32 %v3468_v41, %v2385_v11  ;;  %v2294_v41 = vsel %vm2287_vm14, 0.0, %v2276_v17  ;;  %v2292_v17 = vsel %vm2287_vm14, 0.0, %v5455_v2 }
 0x38e   :  { %v2336_v2 = vsel %vm2333_vm15, 0.0, %v5414_v15  ;;  %v2288_v15 = vsel %vm2287_vm14, 0.0, %v5380_v37 }
 0x38f   :  { %2635 = vmatpush.msra.mxu3 %v2399_v60 }
 0x391   :  { %2636 = vmatpush.msra.mxu3 %v2398_v26 }
 0x393   :  { %v5479_v29 = vpop.permute.xlu1 %2516  ;;  %2637 = vmatpush.msra.mxu3 %v2397_v7  ;;  %v5481_v45 = vpop.permute.xlu2 %2427 }
 0x394   :  { %v2320_v48 = vpop.permute.xlu0 %2319 }
 0x395   :  { %2638 = vmatpush.msra.mxu3 %v2396_v47  ;;  %v2293_v47 = vsel %vm2287_vm14, 0.0, %v2274_v31  ;;  %v2339_v54 = vsel %vm2333_vm15, 0.0, %v2320_v48  ;;  %v2337_v31 = vsel %vm2333_vm15, 0.0, %v5459_v53  ;;  %v2305_v48 = vmul.f32 %v3469_v34, %v2292_v17 }
 0x396   :  { %v2306_v10 = vmul.f32 %v3469_v34, %v2293_v47  ;;  %v2289_v53 = vsel %vm2287_vm14, 0.0, %v5404_v27  ;;  %v3466_v47 = vld [vmem:[%s5907_s7] ss:$0 sm:$0xff] }
 0x397   :  { %2639 = vmatpush.msra.mxu3 %v2395_v38  ;;  %v2307_v38 = vmul.f32 %v3469_v34, %v2294_v41 }
 0x399   :  { %2640 = vmatpush.msra.mxu3 %v2394_v43  ;;  %v2338_v43 = vsel %vm2333_vm15, 0.0, %v2318_v25  ;;  %v2290_v25 = vsel %vm2287_vm14, 0.0, %v5426_v6 }
 0x39b   :  { %v5488_v59 = vpop.permute.xlu1 %2562  ;;  %2641 = vmatpush.msra.mxu3 %v2393_v44  ;;  %v2310_v16 = vpop.permute.xlu2 %2309  ;;  %v2352_v44 = vmul.f32 %v3470_v62, %v2339_v54  ;;  %v2301_v54 = vmul.f32 %v3469_v34, %v2288_v15 }
 0x39c   :  { %v5490_v11 = vpop.permute.xlu0 %2468  ;;  %v2334_v6 = vsel %vm2333_vm15, 0.0, %v2310_v16  ;;  %v3471_v16 = vld [vmem:[%s5907_s7 + $0x7] ss:$0 sm:$0xff] }
 0x39d   :  { %2642 = vmatpush.msra.mxu3 %v2392_v52  ;;  %v2291_v52 = vsel %vm2287_vm14, 0.0, %v5436_v0  ;;  %v2335_v0 = vsel %vm2333_vm15, 0.0, %v5378_v35  ;;  %v5529_v35 = vld [vmem:[%s5905_s5] sm:$0x1f] }
 0x39e   :  { %v2605_v27 = vperm.slane %v5529_v35, 1 }
 0x3a3   :  { %v2324_v46 = vpop.permute.xlu2 %2323  ;;  %v2278_v40 = vpop.permute.xlu1 %2277 }
 0x3a4   :  { %v2322_v60 = vpop.permute.xlu0 %2321  ;;  %v2341_v49 = vsel %vm2333_vm15, 0.0, %v2324_v46  ;;  %v2295_v26 = vsel %vm2287_vm14, 0.0, %v2278_v40  ;;  %v2351_v46 = vmul.f32 %v3470_v62, %v2338_v43 }
 0x3a5   :  { %v2340_v36 = vsel %vm2333_vm15, 0.0, %v2322_v60  ;;  %v2354_v7 = vmul.f32 %v3470_v62, %v2341_v49  ;;  %v2308_v42 = vmul.f32 %v3469_v34, %v2295_v26  ;;  %v2304_v60 = vmul.f32 %v3469_v34, %v2291_v52 }
 0x3a6   :  { %v2353_v57 = vmul.f32 %v3470_v62, %v2340_v36  ;;  %v2350_v49 = vmul.f32 %v3470_v62, %v2337_v31  ;;  %v2349_v26 = vmul.f32 %v3470_v62, %v2336_v2  ;;  %v2303_v36 = vmul.f32 %v3469_v34, %v2290_v25 }
 0x3a7   :  { %2615 = vmatpush.msra.mxu2 %v2308_v42  ;;  %2643 = vmatpush.msra.mxu3 %v2354_v7  ;;  %v2348_v7 = vmul.f32 %v3470_v62, %v2335_v0  ;;  %v2302_v42 = vmul.f32 %v3469_v34, %v2289_v53  ;;  %v2534_v31 = vsel %vm2528_vm0, %v5457_v8, 0.0  ;;  %v2532_v8 = vsel %vm2528_vm0, %v5444_v23, 0.0 }
 0x3a8   :  { %v2547_v25 = vmul.f32 %v3471_v16, %v2534_v31  ;;  %v2545_v15 = vmul.f32 %v3471_v16, %v2532_v8  ;;  %v2530_v23 = vsel %vm2528_vm0, %v5400_v30, 0.0 }
 0x3a9   :  { %2616 = vmatpush.msra.mxu2 %v2307_v38  ;;  %2644 = vmatpush.msra.mxu3 %v2353_v57  ;;  %v2347_v38 = vmul.f32 %v3470_v62, %v2334_v6  ;;  %v2249_v57 = vsel %vm290_vm3, 0.0, %v5467_v61 }
 0x3aa   :  { %v2261_v61 = vmul.f32 %v3466_v47, %v2249_v57  ;;  %v2443_v57 = vsel %vm537_vm5, %v5465_v1, 0.0  ;;  %v2488_v1 = vsel %vm2482_vm1, %v5490_v11, 0.0  ;;  %v2439_v11 = vsel %vm537_vm5, %v5412_v14, 0.0 }
 0x3ab   :  { %2645 = vmatpush.msra.mxu3 %v2352_v44  ;;  %2617 = vmatpush.msra.mxu2 %v2306_v10  ;;  %v5511_v40 = vpop.permute.xlu1 %2560  ;;  %v2535_v10 = vsel %vm2528_vm0, %v5479_v29, 0.0  ;;  %v2248_v44 = vsel %vm290_vm3, 0.0, %v5472_v56  ;;  %v2533_v29 = vsel %vm2528_vm0, %v5461_v55, 0.0  ;;  %v2246_v56 = vsel %vm290_vm3, 0.0, %v5424_v19 }
 0x3ac   :  { %v5517_v41 = vpop.permute.xlu0 %2470  ;;  %v2260_v2 = vmul.f32 %v3466_v47, %v2248_v44  ;;  %v2546_v53 = vmul.f32 %v3471_v16, %v2533_v29  ;;  %v2258_v19 = vmul.f32 %v3466_v47, %v2246_v56  ;;  %v2441_v44 = vsel %vm537_vm5, %v5434_v13, 0.0 }
 0x3ad   :  { %2618 = vmatpush.msra.mxu2 %v2305_v48  ;;  %2646 = vmatpush.msra.mxu3 %v2351_v46  ;;  %v2247_v48 = vsel %vm290_vm3, 0.0, %v5463_v4  ;;  %v2548_v46 = vmul.f32 %v3471_v16, %v2535_v10  ;;  %v2245_v4 = vsel %vm290_vm3, 0.0, %v5402_v12  ;;  %v2243_v12 = vsel %vm290_vm3, 0.0, %v5347_v24  ;;  %v3472_v24 = vld [vmem:[%s5907_s7 + $0x6] ss:$0 sm:$0xff] }
 0x3ae   :  { %v2257_v6 = vmul.f32 %v3466_v47, %v2245_v4  ;;  %v2255_v30 = vmul.f32 %v3466_v47, %v2243_v12  ;;  %v2489_v10 = vsel %vm2482_vm1, %v5517_v41, 0.0  ;;  %v2437_v14 = vsel %vm537_vm5, %v5392_v39, 0.0 }
 0x3af   :  { %2619 = vmatpush.msra.mxu2 %v2304_v60  ;;  %2647 = vmatpush.msra.mxu3 %v2350_v49  ;;  %v2465_v60 = vpop.permute.xlu2 %2464  ;;  %v2259_v49 = vmul.f32 %v3466_v47, %v2247_v48 }
 0x3b1   :  { %2620 = vmatpush.msra.mxu2 %v2303_v36  ;;  %2648 = vmatpush.msra.mxu3 %v2349_v26  ;;  %v2531_v26 = vsel %vm2528_vm0, %v5422_v58, 0.0  ;;  %v2244_v36 = vsel %vm290_vm3, 0.0, %v5366_v63  ;;  %v2529_v58 = vsel %vm2528_vm0, %v5388_v3, 0.0  ;;  %v2444_v63 = vsel %vm537_vm5, %v5481_v45, 0.0 }
 0x3b3   :  { %2649 = vmatpush.msra.mxu3 %v2348_v7  ;;  %2621 = vmatpush.msra.mxu2 %v2302_v42  ;;  %v2234_v37 = vpop.permute.xlu1 %2233  ;;  %v2544_v7 = vmul.f32 %v3471_v16, %v2531_v26  ;;  %v2256_v42 = vmul.f32 %v3466_v47, %v2244_v36 }
 0x3b4   :  { %v2519_v17 = vpop.permute.xlu0 %2518  ;;  %v2250_v43 = vsel %vm290_vm3, 0.0, %v2234_v37  ;;  %v2542_v37 = vmul.f32 %v3471_v16, %v2529_v58 }
 0x3b5   :  { %v2536_v34 = vsel %vm2528_vm0, %v2519_v17, 0.0  ;;  %v2262_v62 = vmul.f32 %v3466_v47, %v2250_v43  ;;  %2622 = vmatpush.msra.mxu2 %v2301_v54  ;;  %2650 = vmatpush.msra.mxu3 %v2347_v38  ;;  %v2604_v54 = vperm.slane %v5529_v35, 0  ;;  %v3467_v38 = vld [vmem:[%s5907_s7 + $0x5] ss:$0 sm:$0xff] }
 0x3b6   :  { %v2549_v52 = vmul.f32 %v3471_v16, %v2536_v34  ;;  %2651 = vmatmul.f32.vlgmr.msra.gmra.mxu3 %v2605_v27  ;;  %v2543_v27 = vmul.f32 %v3471_v16, %v2530_v23  ;;  %v2457_v43 = vmul.f32 %v3467_v38, %v2444_v63  ;;  %v2456_v16 = vmul.f32 %v3467_v38, %v2443_v57 }
 0x3b7   :  { %2623 = vmatpush.msra.mxu2 %v2262_v62  ;;  %v5581_v45 = vpop.permute.xlu2 %2556  ;;  %v2442_v62 = vsel %vm537_vm5, %v5446_v9, 0.0  ;;  %v2501_v9 = vmul.f32 %v3472_v24, %v2488_v1  ;;  %v2454_v48 = vmul.f32 %v3467_v38, %v2441_v44  ;;  %v2450_v26 = vmul.f32 %v3467_v38, %v2437_v14  ;;  %v3355_v1 = vld [vmem:[%s5908_s8 + $0xc8] sm:$0xff]  ;;  %v2722_v44 = vld [vmem:[%s5908_s8 + $0x30] sm:$0xff]  ;;  %v3376_v14 = vld [vmem:[%s5908_s8 + $0x160] sm:$0xff] }
 0x3b8   :  { %2675 = vmatpush.msrb.mxu3 %v2549_v52  ;;  %v2502_v52 = vmul.f32 %v3472_v24, %v2489_v10  ;;  %v2455_v31 = vmul.f32 %v3467_v38, %v2442_v62  ;;  %v2724_v62 = vld [vmem:[%s5908_s8 + $0x40] sm:$0xff] }
 0x3b9   :  { %2624 = vmatpush.msra.mxu2 %v2261_v61  ;;  %v2440_v61 = vsel %vm537_vm5, %v5448_v51, 0.0  ;;  %v2438_v51 = vsel %vm537_vm5, %v5355_v22, 0.0  ;;  %v3474_v22 = vld [vmem:[%s5907_s7 + $0x4] ss:$0 sm:$0xff]  ;;  %vm3006_vm5 = vcmask 1042432  }
 0x3ba   :  { %2676 = vmatpush.msrb.mxu3 %v2548_v46  ;;  %v2486_v46 = vsel %vm2482_vm1, %v2465_v60, 0.0  ;;  %v2412_v39 = vmul.f32 %v3474_v22, %v5368_v32  ;;  %v2409_v12 = vmul.f32 %v3474_v22, %v5305_v33  ;;  %v2406_v32 = vmul.f32 %v3474_v22, %v5254_v20 }
 0x3bb   :  { %2625 = vmatpush.msra.mxu2 %v2260_v2  ;;  %v5556_v0 = vpop.permute.xlu1 %2462  ;;  %v2453_v2 = vmul.f32 %v3467_v38, %v2440_v61  ;;  %v2405_v33 = vmul.f32 %v3474_v22, %v5246_v5  ;;  %v2579_v20 = vsel %vm629_vm8, %v5511_v40, 0.0  ;;  %v3354_v61 = vld [vmem:[%s5908_s8 + $0xc0] sm:$0xff] }
 0x3bc   :  { %v2467_v55 = vpop.permute.xlu0 %2466  ;;  %2677 = vmatpush.msrb.mxu3 %v2547_v25  ;;  %v2485_v56 = vsel %vm2482_vm1, %v5556_v0, 0.0  ;;  %v2499_v25 = vmul.f32 %v3472_v24, %v2486_v46  ;;  %v2720_v46 = vld [vmem:[%s5908_s8 + $0x20] sm:$0xff] }
 0x3bd   :  { %2626 = vmatpush.msra.mxu2 %v2259_v49  ;;  %v2487_v41 = vsel %vm2482_vm1, %v2467_v55, 0.0  ;;  %v2452_v49 = vmul.f32 %v3467_v38, %v2439_v11  ;;  %v2498_v4 = vmul.f32 %v3472_v24, %v2485_v56  ;;  %v2719_v11 = vld [vmem:[%s5908_s8 + $0x18] sm:$0xff] }
 0x3be   :  { %2678 = vmatpush.msrb.mxu3 %v2546_v53  ;;  %v2500_v29 = vmul.f32 %v3472_v24, %v2487_v41  ;;  %v2451_v53 = vmul.f32 %v3467_v38, %v2438_v51  ;;  %v2577_v38 = vsel %vm629_vm8, %v5581_v45, 0.0  ;;  %v3346_v45 = vld [vmem:[%s5908_s8 + $0x88] sm:$0xff]  ;;  %v3344_v41 = vld [vmem:[%s5908_s8 + $0x78] sm:$0xff]  ;;  %v3363_v51 = vld [vmem:[%s5908_s8 + $0x100] sm:$0xff] }
 0x3bf   :  { %2627 = vmatpush.msra.mxu2 %v2258_v19  ;;  %v2459_v8 = vpop.permute.xlu2 %2458  ;;  %v2607_v19 = vperm.slane %v5529_v35, 3  ;;  %2765 = vmatpush.msrb.mxu0 %v3346_v45  ;;  %v3353_v56 = vld [vmem:[%s5908_s8 + $0xb8] sm:$0xff]  ;;  %v3390_v45 = vld [vmem:[%s5908_s8 + $0x1c0] sm:$0xff] }
 0x3c0   :  { %2679 = vmatpush.msrb.mxu3 %v2545_v15  ;;  %v2483_v55 = vsel %vm2482_vm1, %v2459_v8, 0.0  ;;  %v2411_v15 = vmul.f32 %v3474_v22, %v5339_v18  ;;  %v2606_v18 = vperm.slane %v5529_v35, 2  ;;  %v3342_v8 = vld [vmem:[%s5908_s8 + $0x68] sm:$0xff] }
 0x3c1   :  { %2628 = vmatpush.msra.mxu2 %v2257_v6  ;;  %v2496_v36 = vmul.f32 %v3472_v24, %v2483_v55  ;;  %v2410_v6 = vmul.f32 %v3474_v22, %v5322_v21  ;;  %v3473_v21 = vld [vmem:[%s5907_s7 + $0x8] ss:$0 sm:$0xff]  ;;  %v3361_v55 = vld [vmem:[%s5908_s8 + $0xf0] sm:$0xff] }
 0x3c2   :  { %2680 = vmatpush.msrb.mxu3 %v2544_v7  ;;  %v2408_v7 = vmul.f32 %v3474_v22, %v5288_v50  ;;  %v2580_v50 = vsel %vm629_vm8, %v5488_v59, 0.0 }
 0x3c3   :  { %2629 = vmatpush.msra.mxu2 %v2256_v42  ;;  %v2473_v3 = vpop.permute.xlu1 %2472  ;;  %v2407_v42 = vmul.f32 %v3474_v22, %v5271_v28  ;;  %v2593_v28 = vmul.f32 %v3473_v21, %v2580_v50  ;;  %v3350_v22 = vld [vmem:[%s5908_s8 + $0xa0] sm:$0xff]  ;;  %v3395_v50 = vld [vmem:[%s5908_s8 + $0x1e8] sm:$0xff] }
 0x3c4   :  { %v5583_v17 = vpop.permute.xlu0 %2558  ;;  %2681 = vmatpush.msrb.mxu3 %v2543_v27  ;;  %v2490_v47 = vsel %vm2482_vm1, %v2473_v3, 0.0  ;;  %v2590_v3 = vmul.f32 %v3473_v21, %v2577_v38  ;;  %v3369_v38 = vld [vmem:[%s5908_s8 + $0x128] sm:$0xff] }
 0x3c5   :  { %v2503_v34 = vmul.f32 %v3472_v24, %v2490_v47  ;;  %2630 = vmatpush.msra.mxu2 %v2255_v30  ;;  %v2592_v30 = vmul.f32 %v3473_v21, %v2579_v20  ;;  %v3370_v20 = vld [vmem:[%s5908_s8 + $0x130] sm:$0xff] }
 0x3c6   :  { %2682 = vmatpush.msrb.mxu3 %v2542_v37  ;;  %2631 = vmatmul.f32.vlgmr.msra.gmra.mxu2 %v2604_v54  ;;  %v2578_v54 = vsel %vm629_vm8, %v5583_v17, 0.0 }
 0x3c7   :  { %2655 = vmatpush.msrb.mxu2 %v2457_v43  ;;  %v2591_v5 = vmul.f32 %v3473_v21, %v2578_v54  ;;  %v2608_v43 = vperm.slane %v5529_v35, 4  ;;  %v2723_v35 = vld [vmem:[%s5908_s8 + $0x38] sm:$0xff]  ;;  %v3394_v54 = vld [vmem:[%s5908_s8 + $0x1e0] sm:$0xff] }
 0x3c8   :  { %2683 = vmatpush.msrb.mxu3 %v2503_v34  ;;  %v3356_v34 = vld [vmem:[%s5908_s8 + $0xd0] sm:$0xff] }
 0x3c9   :  { %2656 = vmatpush.msrb.mxu2 %v2456_v16  ;;  %2795 = vmatpush.msrb.mxu1 %v3356_v34  ;;  %v3345_v16 = vld [vmem:[%s5908_s8 + $0x80] sm:$0xff]  ;;  %v3400_v34 = vld [vmem:[%s5908_s8 + $0x208] sm:$0xff] }
 0x3ca   :  { %2684 = vmatpush.msrb.mxu3 %v2502_v52  ;;  %2766 = vmatpush.msrb.mxu0 %v3345_v16  ;;  %v3366_v52 = vld [vmem:[%s5908_s8 + $0x118] sm:$0xff]  ;;  %v3399_v16 = vld [vmem:[%s5908_s8 + $0x200] sm:$0xff] }
 0x3cb   :  { %2657 = vmatpush.msrb.mxu2 %v2455_v31  ;;  %v2565_v23 = vpop.permute.xlu1 %2564  ;;  %2796 = vmatpush.msrb.mxu1 %v3355_v1  ;;  %v3365_v31 = vld [vmem:[%s5908_s8 + $0x110] sm:$0xff]  ;;  %v3378_v1 = vld [vmem:[%s5908_s8 + $0x168] sm:$0xff] }
 0x3cc   :  { %v2461_v13 = vpop.permute.xlu0 %2460  ;;  %2685 = vmatpush.msrb.mxu3 %v2501_v9  ;;  %v2581_v58 = vsel %vm629_vm8, %v2565_v23, 0.0  ;;  %v2721_v9 = vld [vmem:[%s5908_s8 + $0x28] sm:$0xff]  ;;  %2767 = vmatpush.msrb.mxu0 %v3344_v41  ;;  %v3359_v23 = vld [vmem:[%s5908_s8 + $0xe0] sm:$0xff] }
 0x3cd   :  { %2658 = vmatpush.msrb.mxu2 %v2454_v48  ;;  %v2484_v60 = vsel %vm2482_vm1, %v2461_v13, 0.0  ;;  %v2594_v63 = vmul.f32 %v3473_v21, %v2581_v58  ;;  %2797 = vmatpush.msrb.mxu1 %v3354_v61  ;;  %v3364_v48 = vld [vmem:[%s5908_s8 + $0x108] sm:$0xff] }
 0x3ce   :  { %2686 = vmatpush.msrb.mxu3 %v2500_v29  ;;  %v2497_v0 = vmul.f32 %v3472_v24, %v2484_v60  ;;  %v2718_v29 = vld [vmem:[%s5908_s8 + $0x10] sm:$0xff]  ;;  %v2717_v13 = vld [vmem:[%s5908_s8 + $0x8] sm:$0xff]  ;;  %v3362_v60 = vld [vmem:[%s5908_s8 + $0xf8] sm:$0xff] }
 0x3cf   :  { %2659 = vmatpush.msrb.mxu2 %v2453_v2  ;;  %v3343_v2 = vld [vmem:[%s5908_s8 + $0x70] sm:$0xff]  ;;  %2798 = vmatpush.msrb.mxu1 %v3353_v56  ;;  %v3386_v58 = vld [vmem:[%s5908_s8 + $0x1a8] sm:$0xff] }
 0x3d0   :  { %2687 = vmatpush.msrb.mxu3 %v2499_v25  ;;  %2768 = vmatpush.msrb.mxu0 %v3343_v2  ;;  %v2716_v25 = vld [vmem:[%s5908_s8] sm:$0xff] }
 0x3d1   :  { %2660 = vmatpush.msrb.mxu2 %v2452_v49  ;;  %v3352_v49 = vld [vmem:[%s5908_s8 + $0xb0] sm:$0xff] }
 0x3d2   :  { %2688 = vmatpush.msrb.mxu3 %v2498_v4  ;;  %2769 = vmatpush.msrb.mxu0 %v3342_v8  ;;  %v3341_v4 = vld [vmem:[%s5908_s8 + $0x60] sm:$0xff] }
 0x3d3   :  { %2661 = vmatpush.msrb.mxu2 %v2451_v53  ;;  %v2555_v27 = vpop.permute.xlu1 %2554  ;;  %2799 = vmatpush.msrb.mxu1 %v3352_v49  ;;  %v3351_v53 = vld [vmem:[%s5908_s8 + $0xa8] sm:$0xff]  ;;  %v3416_v8 = vld [vmem:[%s5908_s8 + $0x280] sm:$0xff]  ;;  %v3415_v49 = vld [vmem:[%s5908_s8 + $0x278] sm:$0xff] }
 0x3d4   :  { %2689 = vmatpush.msrb.mxu3 %v2497_v0  ;;  %v2553_v24 = vpop.permute.xlu0 %2552  ;;  %v2576_v59 = vsel %vm629_vm8, %v2555_v27, 0.0  ;;  %v3375_v0 = vld [vmem:[%s5908_s8 + $0x158] sm:$0xff]  ;;  %2770 = vmatpush.msrb.mxu0 %v3341_v4  ;;  %v3412_v4 = vld [vmem:[%s5908_s8 + $0x260] sm:$0xff] }
 0x3d5   :  { %2662 = vmatpush.msrb.mxu2 %v2450_v26  ;;  %v2575_v40 = vsel %vm629_vm8, %v2553_v24, 0.0  ;;  %v2589_v57 = vmul.f32 %v3473_v21, %v2576_v59  ;;  %v3340_v26 = vld [vmem:[%s5908_s8 + $0x58] sm:$0xff]  ;;  %2800 = vmatpush.msrb.mxu1 %v3351_v53  ;;  %v3403_v59 = vld [vmem:[%s5908_s8 + $0x220] sm:$0xff] }
 0x3d6   :  { %2690 = vmatpush.msrb.mxu3 %v2496_v36  ;;  %v2588_v17 = vmul.f32 %v3473_v21, %v2575_v40  ;;  %v3374_v36 = vld [vmem:[%s5908_s8 + $0x150] sm:$0xff]  ;;  %2771 = vmatpush.msrb.mxu0 %v3340_v26  ;;  %v3371_v27 = vld [vmem:[%s5908_s8 + $0x138] sm:$0xff]  ;;  %v3408_v26 = vld [vmem:[%s5908_s8 + $0x240] sm:$0xff] }
 0x3d7   :  { %2663 = vmatpush.msrb.mxu2 %v2412_v39  ;;  %2691 = vmatmul.f32.vlgmr.msrb.gmra.mxu3 %v2607_v19  ;;  %v3360_v19 = vld [vmem:[%s5908_s8 + $0xe8] sm:$0xff]  ;;  %v3339_v39 = vld [vmem:[%s5908_s8 + $0x50] sm:$0xff]  ;;  %v3393_v24 = vld [vmem:[%s5908_s8 + $0x1d8] sm:$0xff] }
 0x3d8   :  { %2735 = vmatpush.msra.mxu3 %v2724_v62  ;;  %2801 = vmatpush.msrb.mxu1 %v3350_v22  ;;  %v3392_v40 = vld [vmem:[%s5908_s8 + $0x1d0] sm:$0xff]  ;;  %v3411_v53 = vld [vmem:[%s5908_s8 + $0x258] sm:$0xff] }
 0x3d9   :  { %2664 = vmatpush.msrb.mxu2 %v2411_v15  ;;  %v3349_v15 = vld [vmem:[%s5908_s8 + $0x98] sm:$0xff]  ;;  %2772 = vmatpush.msrb.mxu0 %v3339_v39  ;;  %v3379_v62 = vld [vmem:[%s5908_s8 + $0x170] sm:$0xff] }
 0x3da   :  { %2736 = vmatpush.msra.mxu3 %v2723_v35  ;;  %2802 = vmatpush.msrb.mxu1 %v3349_v15  ;;  %v3389_v35 = vld [vmem:[%s5908_s8 + $0x1b8] sm:$0xff] }
 0x3db   :  { %2665 = vmatpush.msrb.mxu2 %v2410_v6  ;;  %v2551_v37 = vpop.permute.xlu1 %2550  ;;  %v3373_v6 = vld [vmem:[%s5908_s8 + $0x148] sm:$0xff] }
 0x3dc   :  { %v2574_v47 = vsel %vm629_vm8, %v2551_v37, 0.0  ;;  %2737 = vmatpush.msra.mxu3 %v2722_v44  ;;  %v3382_v37 = vld [vmem:[%s5908_s8 + $0x188] sm:$0xff]  ;;  %v3388_v44 = vld [vmem:[%s5908_s8 + $0x1b0] sm:$0xff] }
 0x3dd   :  { %2666 = vmatpush.msrb.mxu2 %v2409_v12  ;;  %v2587_v10 = vmul.f32 %v3473_v21, %v2574_v47  ;;  %v3338_v12 = vld [vmem:[%s5908_s8 + $0x48] sm:$0xff]  ;;  %v3406_v21 = vld [vmem:[%s5908_s8 + $0x238] sm:$0xff]  ;;  %v3381_v47 = vld [vmem:[%s5908_s8 + $0x180] sm:$0xff] }
 0x3de   :  { %2738 = vmatpush.msra.mxu3 %v2721_v9  ;;  %2773 = vmatpush.msrb.mxu0 %v3338_v12 }
 0x3df   :  { %2667 = vmatpush.msrb.mxu2 %v2408_v7  ;;  %v3348_v7 = vld [vmem:[%s5908_s8 + $0x90] sm:$0xff] }
 0x3e0   :  { %2739 = vmatpush.msra.mxu3 %v2720_v46  ;;  %2803 = vmatpush.msrb.mxu1 %v3348_v7 }
 0x3e1   :  { %2668 = vmatpush.msrb.mxu2 %v2407_v42  ;;  %v3358_v42 = vld [vmem:[%s5908_s8 + $0xd8] sm:$0xff]  ;;  %2885 = vmatpush.msra.mxu0 %v3386_v58 }
 0x3e2   :  { %2740 = vmatpush.msra.mxu3 %v2719_v11 }
 0x3e3   :  { %2669 = vmatpush.msrb.mxu2 %v2406_v32  ;;  %v3372_v32 = vld [vmem:[%s5908_s8 + $0x140] sm:$0xff] }
 0x3e4   :  { %2741 = vmatpush.msra.mxu3 %v2718_v29 }
 0x3e5   :  { %2670 = vmatpush.msrb.mxu2 %v2405_v33  ;;  %v3385_v33 = vld [vmem:[%s5908_s8 + $0x1a0] sm:$0xff] }
 0x3e6   :  { %2671 = vmatmul.f32.vlgmr.msrb.gmra.mxu2 %v2606_v18  ;;  %2742 = vmatpush.msra.mxu3 %v2717_v13  ;;  %v3396_v18 = vld [vmem:[%s5908_s8 + $0x1f0] sm:$0xff] }
 0x3e7   :  { %2703 = vmatpush.msra.mxu2 %v2594_v63  ;;  %v3405_v63 = vld [vmem:[%s5908_s8 + $0x230] sm:$0xff]  ;;  %2915 = vmatpush.msra.mxu1 %v3396_v18 }
 0x3e8   :  { %2743 = vmatpush.msra.mxu3 %v2716_v25  ;;  %2886 = vmatpush.msra.mxu0 %v3385_v33 }
 0x3e9   :  { %2704 = vmatpush.msra.mxu2 %v2593_v28  ;;  %2916 = vmatpush.msra.mxu1 %v3395_v50  ;;  %v3384_v28 = vld [vmem:[%s5908_s8 + $0x198] sm:$0xff] }
 0x3ea   :  { %2855 = vmatpush.msrb.mxu3 %v3376_v14  ;;  %2887 = vmatpush.msra.mxu0 %v3384_v28  ;;  %v3413_v14 = vld [vmem:[%s5908_s8 + $0x268] sm:$0xff]  ;;  %v3008_v28 = vld [vmem:[%s5909_s9] sm:$0xff] }
 0x3eb   :  { %2705 = vmatpush.msra.mxu2 %v2592_v30  ;;  %v3404_v30 = vld [vmem:[%s5908_s8 + $0x228] sm:$0xff]  ;;  %2917 = vmatpush.msra.mxu1 %v3394_v54 }
 0x3ec   :  { %2856 = vmatpush.msrb.mxu3 %v3375_v0  ;;  %v3409_v0 = vld [vmem:[%s5908_s8 + $0x248] sm:$0xff] }
 0x3ed   :  { %2706 = vmatpush.msra.mxu2 %v2591_v5  ;;  %v3383_v5 = vld [vmem:[%s5908_s8 + $0x190] sm:$0xff]  ;;  %2918 = vmatpush.msra.mxu1 %v3393_v24 }
 0x3ee   :  { %2857 = vmatpush.msrb.mxu3 %v3374_v36  ;;  %2888 = vmatpush.msra.mxu0 %v3383_v5 }
 0x3ef   :  { %2707 = vmatpush.msra.mxu2 %v2590_v3  ;;  %v3368_v3 = vld [vmem:[%s5908_s8 + $0x120] sm:$0xff]  ;;  %2919 = vmatpush.msra.mxu1 %v3392_v40 }
 0x3f0   :  { %2858 = vmatpush.msrb.mxu3 %v3373_v6  ;;  %2889 = vmatpush.msra.mxu0 %v3382_v37 }
 0x3f1   :  { %2708 = vmatpush.msra.mxu2 %v2589_v57  ;;  %v3402_v57 = vld [vmem:[%s5908_s8 + $0x218] sm:$0xff] }
 0x3f2   :  { %2859 = vmatpush.msrb.mxu3 %v3372_v32  ;;  %2890 = vmatpush.msra.mxu0 %v3381_v47 }
 0x3f3   :  { %2709 = vmatpush.msra.mxu2 %v2588_v17  ;;  %v3391_v17 = vld [vmem:[%s5908_s8 + $0x1c8] sm:$0xff] }
 0x3f4   :  { %2860 = vmatpush.msrb.mxu3 %v3371_v27  ;;  %2920 = vmatpush.msra.mxu1 %v3391_v17 }
 0x3f5   :  { %2710 = vmatpush.msra.mxu2 %v2587_v10  ;;  %v3380_v10 = vld [vmem:[%s5908_s8 + $0x178] sm:$0xff] }
 0x3f6   :  { %3336 = vmatmul.msk.f32.vlgmr.msra.gmra.mxu2 %vm1412_vm12, %v2608_v43  ;;  %2861 = vmatpush.msrb.mxu3 %v3370_v20  ;;  %v3401_v43 = vld [vmem:[%s5908_s8 + $0x210] sm:$0xff] }
 0x3f7   :  { %2825 = vmatpush.msrb.mxu2 %v3366_v52  ;;  %2891 = vmatpush.msra.mxu0 %v3380_v10  ;;  %v3398_v52 = vld [vmem:[%s5908_s8 + $0x1f8] sm:$0xff] }
 0x3f8   :  { %2862 = vmatpush.msrb.mxu3 %v3369_v38  ;;  %2921 = vmatpush.msra.mxu1 %v3390_v45 }
 0x3f9   :  { %2826 = vmatpush.msrb.mxu2 %v3365_v31  ;;  %2892 = vmatpush.msra.mxu0 %v3379_v62  ;;  %v2600_v31 = vpop.permute.xlu2 %2599 }
 0x3fa   :  { %2863 = vmatpush.msrb.mxu3 %v3368_v3  ;;  %2922 = vmatpush.msra.mxu1 %v3389_v35  ;;  %v2602_v61 = vperm.slane %v2600_v31, 0  ;;  %v3048_v3 = vpop.permute.xlu1 %3047 }
 0x3fb   :  { %2827 = vmatpush.msrb.mxu2 %v3364_v48  ;;  %2893 = vmatpush.msra.mxu0 %v3378_v1  ;;  %v3050_v37 = vperm.slane %v3048_v3, 0 }
 0x3fc   :  { %2923 = vmatpush.msra.mxu1 %v3388_v44 }
 0x3fd   :  { %2828 = vmatpush.msrb.mxu2 %v3363_v51 }
 0x3ff   :  { %2829 = vmatpush.msrb.mxu2 %v3362_v60  ;;  %v3414_v60 = vld [vmem:[%s5908_s8 + $0x270] sm:$0xff] }
 0x401   :  { %2830 = vmatpush.msrb.mxu2 %v3361_v55  ;;  %v3410_v55 = vld [vmem:[%s5908_s8 + $0x250] sm:$0xff] }
 0x403   :  { %2831 = vmatpush.msrb.mxu2 %v3360_v19 }
 0x405   :  { %2832 = vmatpush.msrb.mxu2 %v3359_v23 }
 0x407   :  { %2833 = vmatpush.msrb.mxu2 %v3358_v42 }
 0x409   :  { %2945 = vmatpush.msra.mxu2 %v3406_v21 }
 0x40b   :  { %2946 = vmatpush.msra.mxu2 %v3405_v63 }
 0x40d   :  { %2947 = vmatpush.msra.mxu2 %v3404_v30  ;;  %v3013_v30 = vpop.permute.xlu0 %3012 }
 0x40f   :  { %2948 = vmatpush.msra.mxu2 %v3403_v59  ;;  %v3043_v59 = vld [vmem:[%s5911_s11] sm:$0x1] }
 0x411   :  { %2949 = vmatpush.msra.mxu2 %v3402_v57 }
 0x413   :  { %2950 = vmatpush.msra.mxu2 %v3401_v43 }
 0x415   :  { %2951 = vmatpush.msra.mxu2 %v3400_v34 }
 0x417   :  { %2952 = vmatpush.msra.mxu2 %v3399_v16 }
 0x419   :  { %2953 = vmatpush.msra.mxu2 %v3398_v52 }
 0x439   :  { %v2652_v9 = vpop.f32.mrf.mxu3 }
 0x449   :  { %v2632_v41 = vpop.f32.mrf.mxu2 }
 0x44a   :  { %v2633_v48 = vadd.f32 %v2632_v41, %v2602_v61 }
 0x44c   :  { %v2653_v11 = vadd.f32 %v2652_v9, %v2633_v48 }
 0x45a   :  { %v2692_v13 = vpop.f32.mrf.mxu3 }
 0x469   :  { %v2672_v46 = vpop.f32.mrf.mxu2 }
 0x46a   :  { %v2673_v29 = vadd.f32 %v2672_v46, %v2653_v11 }
 0x46c   :  { %v2693_v2 = vadd.f32 %v2692_v13, %v2673_v29 }
 0x479   :  { %v2712_v56 = vpop.f32.mrf.mxu2 }
 0x47a   :  { %v2713_v51 = vadd.f32 %v2712_v56, %v2693_v2 }
 0x47c   :  { %v2715_v25 = vmax.f32 %v2713_v51, 0.0 }
 0x47e   :  { %3337 = vmatmul.msk.f32.vlgmr.msra.gmra.mxu3 %vm1756_vm13, %v2715_v25  ;;  %3347 = vmatmul.msk.f32.vlgmr.msrb.gmra.mxu0 %vm1756_vm13, %v2715_v25 }
 0x47f   :  { %3357 = vmatmul.msk.f32.vlgmr.msrb.gmra.mxu1 %vm1756_vm13, %v2715_v25  ;;  %3367 = vmatmul.msk.f32.vlgmr.msrb.gmra.mxu2 %vm1756_vm13, %v2715_v25 }
 0x480   :  { %2975 = vmatpush.msra.mxu3 %v3416_v8 }
 0x482   :  { %2976 = vmatpush.msra.mxu3 %v3415_v49 }
 0x484   :  { %2977 = vmatpush.msra.mxu3 %v3414_v60 }
 0x486   :  { %2978 = vmatpush.msra.mxu3 %v3413_v14  ;;  %3387 = vmatmul.msk.f32.vlgmr.msra.gmra.mxu0 %vm1756_vm13, %v2715_v25 }
 0x487   :  { %3377 = vmatmul.msk.f32.vlgmr.msrb.gmra.mxu3 %vm1756_vm13, %v2715_v25  ;;  %3397 = vmatmul.msk.f32.vlgmr.msra.gmra.mxu1 %vm1756_vm13, %v2715_v25 }
 0x488   :  { %3407 = vmatmul.msk.f32.vlgmr.msra.gmra.mxu2 %vm1756_vm13, %v2715_v25  ;;  %2979 = vmatpush.msra.mxu3 %v3412_v4 }
 0x48a   :  { %2980 = vmatpush.msra.mxu3 %v3411_v53 }
 0x48c   :  { %2981 = vmatpush.msra.mxu3 %v3410_v55 }
 0x48e   :  { %2982 = vmatpush.msra.mxu3 %v3409_v0 }
 0x490   :  { %2983 = vmatpush.msra.mxu3 %v3408_v26 }
 0x491   :  { %3417 = vmatmul.msk.f32.vlgmr.msra.gmra.mxu3 %vm1756_vm13, %v2715_v25 }
 0x4fb   :  { %v2775_v19 = vpop.f32.mrf.mxu0 }
 0x4fc   :  { %v2805_v36 = vpop.f32.mrf.mxu1 }
 0x4fd   :  { %v2988_v42 = vmax.f32 %v2775_v19, %v2805_v36 }
 0x4ff   :  { %v2994_v27 = vrot.slane %v2988_v42, 7 }
 0x501   :  { %v2745_v22 = vpop.f32.mrf.mxu3 }
 0x502   :  { %v2835_v39 = vpop.f32.mrf.mxu2  ;;  %v3003_v50 = vsel %vm3002_vm2, %v2745_v22, %v2994_v27 }
 0x503   :  { %v2895_v23 = vpop.f32.mrf.mxu0 }
 0x504   :  { %v2925_v6 = vpop.f32.mrf.mxu1 }
 0x505   :  { %v2990_v32 = vmax.f32 %v2895_v23, %v2925_v6 }
 0x50a   :  { %v2865_v15 = vpop.f32.mrf.mxu3 }
 0x50b   :  { %v2989_v12 = vmax.f32 %v2835_v39, %v2865_v15  ;;  %v2955_v7 = vpop.f32.mrf.mxu2 }
 0x50c   :  { %v2991_v58 = vmax.f32 %v2990_v32, %v2955_v7 }
 0x50d   :  { %v2997_v18 = vrot.slane %v2989_v12, 6 }
 0x50f   :  { %v3005_v20 = vsel %vm3004_vm4, %v3003_v50, %v2997_v18 }
 0x514   :  { %v2985_v21 = vpop.f32.mrf.mxu3 }
 0x515   :  { %v2992_v33 = vmax.f32 %v2991_v58, %v2985_v21 }
 0x517   :  { %v3000_v63 = vrot.slane %v2992_v33, 5 }
 0x519   :  { %v3007_v54 = vsel %vm3006_vm5, %v3005_v20, %v3000_v63 }
 0x51a   :  { %3418 = vmatpush.msk.msrb.mxu0 %vm3018_vm6, %v3007_v54 }
 0x51b   :  { %3419 = vmatmul.msk.f32.vlgmr.msrb.gmra.mxu0 %vm290_vm3, %v3008_v28  ;;  %vm3075_vm3 = vcmask 57344  }
 0x598   :  { %v3039_v38 = vpop.f32.mrf.mxu0 }
 0x599   :  { %v3040_v5 = vadd.f32 %v3039_v38, %v3013_v30 }
 0x59b   :  { %v3042_v24 = vmax.f32 %v3040_v5, 0.0 }
 0x59d   :  { %3070 = vmatpush.msrb.mxu1 %v3042_v24 }
 0x59e   :  { %3420 = vmatmul.msk.f32.vlgmr.msrb.gmra.mxu1 %vm3051_vm7, %v3043_v59 }
 0x61b   :  { %v3072_v40 = vpop.f32.mrf.mxu1 }
 0x61c   :  { %v3073_v57 = vadd.f32 %v3072_v40, %v3050_v37 }
 0x61e   :  { %3076 = vst.msk [vmem:[#allocation4] sm:$0x1] %vm3075_vm3, %v3073_v57 }
 0x61f   :  { %3087 = dma.vmem_to_hbm [thread:$0]  %s3083_s20, 16, %s3085_s28, [#allocation5]  }
 0x620   :  { %3499 = dma.done.wait [#allocation5], 16  }
 0x621   :  { %3500 = vsyncadd [#allocation5], 4294967280 }
 0x622   :  { %3092 = vsyncpa [#allocation5], 1 }

</bundles_post_ra>
